<compile_context>
chip_gen: v7x
topology: tpu7x:2x2x1
jax: 0.10.0
libtpu: 0.0.40
codegen_flags: <defaults>
</compile_context>

<pallas_src>
import jax
import jax.numpy as jnp
from jax.experimental import pallas as pl
from jax.experimental.pallas import tpu as pltpu

HID = 128  # LSTM hidden size (a full 128-lane vreg per gate)


def _round_up(x, m):
    return (x + m - 1) // m * m


# ---------------------------------------------------------------------------
# Fused encoder + decoder kernel (single grid step).
#   sel_ref       (steps,) int32 in SMEM   : teacher-forcing mask (1 -> use trg)
#   src_ref       (src_len*BP, IN_P)  VMEM : time-major, batch/feature padded
#   trg_ref       (steps*BP, OUT_P)   VMEM : trg[:, :trg_len-1, :], padded
#   *_w/b refs                        VMEM : split LSTM weights + output Linear
#   y_out_ref     (steps, BP, OUT_P)  VMEM : decoder outputs (times 1..trg_len-1)
#   enc_proj_scr  (src_len*BP, 4H)    VMEM scratch (hoisted src @ W_ih + b)
#   trg_proj_scr  (steps*BP, 4H)      VMEM scratch (hoisted trg @ W_ih + b)
# ---------------------------------------------------------------------------
def _seq2seq_kernel(sel_ref, src_ref, trg_ref,
                    enc_wih_ref, enc_whh_ref, enc_b_ref,
                    dec_wih_ref, dec_whh_ref, dec_b_ref,
                    fc_w_ref, fc_b_ref,
                    y_out_ref,
                    enc_proj_scr, trg_proj_scr):
    steps, BP, OUT_P = y_out_ref.shape
    H = enc_whh_ref.shape[0]
    src_len = src_ref.shape[0] // BP

    # ---- Hoisted input projections: two bulk MXU matmuls, off the recurrence.
    enc_proj_scr[...] = (
        jnp.dot(src_ref[...], enc_wih_ref[...], preferred_element_type=jnp.float32)
        + enc_b_ref[...])
    trg_proj_scr[...] = (
        jnp.dot(trg_ref[...], dec_wih_ref[...], preferred_element_type=jnp.float32)
        + dec_b_ref[...])

    enc_whh = enc_whh_ref[...]
    dec_whh = dec_whh_ref[...]
    dec_wih = dec_wih_ref[...]
    dec_b = dec_b_ref[...]
    fc_w = fc_w_ref[...]
    fc_b = fc_b_ref[...]

    def lstm_step(gates, c):
        # Gate order i, f, g, o; each slice is a full 128-lane vreg.
        i = jax.nn.sigmoid(gates[:, 0 * H:1 * H])
        f = jax.nn.sigmoid(gates[:, 1 * H:2 * H])
        g = jnp.tanh(gates[:, 2 * H:3 * H])
        o = jax.nn.sigmoid(gates[:, 3 * H:4 * H])
        c_new = f * c + i * g
        h_new = o * jnp.tanh(c_new)
        return h_new, c_new

    # ---- Encoder recurrence: only h @ W_hh (aligned K = 128) per step.
    def enc_body(t, carry):
        h, c = carry
        row = pl.multiple_of(t * BP, 8)
        x_proj = enc_proj_scr[pl.ds(row, BP), :]
        gates = jnp.dot(h, enc_whh, preferred_element_type=jnp.float32) + x_proj
        return lstm_step(gates, c)

    h0 = jnp.zeros((BP, H), jnp.float32)
    c0 = jnp.zeros((BP, H), jnp.float32)
    h, c = jax.lax.fori_loop(0, src_len, enc_body, (h0, c0), unroll=True)

    # ---- Decoder recurrence (teacher forcing blended on-device).
    # x @ W_ih = m * (trg @ W_ih) + (1 - m) * (y_prev @ W_ih)   (linearity)
    def dec_body(p, carry):
        h, c, y_prev = carry
        m = sel_ref[p].astype(jnp.float32)      # 1.0 -> trg[:, p, :], 0.0 -> y_prev
        row = pl.multiple_of(p * BP, 8)
        y_proj = jnp.dot(y_prev, dec_wih, preferred_element_type=jnp.float32) + dec_b
        x_proj = m * trg_proj_scr[pl.ds(row, BP), :] + (1.0 - m) * y_proj
        gates = jnp.dot(h, dec_whh, preferred_element_type=jnp.float32) + x_proj
        h_new, c_new = lstm_step(gates, c)
        y = jnp.dot(h_new, fc_w, preferred_element_type=jnp.float32) + fc_b
        y_out_ref[p] = y                         # VMEM store; one HBM writeback at end
        return h_new, c_new, y

    y0 = jnp.zeros((BP, OUT_P), jnp.float32)
    jax.lax.fori_loop(0, steps, dec_body, (h, c, y0), unroll=True)


def _seq2seq_call(sel, src_flat, trg_flat,
                  enc_w_ih, enc_w_hh, enc_b,
                  dec_w_ih, dec_w_hh, dec_b,
                  fc_w, fc_b, *, steps, BP, OUT_P, hid):
    src_rows = src_flat.shape[0]
    vmem = pl.BlockSpec(memory_space=pltpu.MemorySpace.VMEM)
    smem = pl.BlockSpec(memory_space=pltpu.MemorySpace.SMEM)
    return pl.pallas_call(
        _seq2seq_kernel,
        out_shape=jax.ShapeDtypeStruct((steps, BP, OUT_P), jnp.float32),
        in_specs=[smem, vmem, vmem,          # sel, src, trg
                  vmem, vmem, vmem,          # enc_w_ih, enc_w_hh, enc_b
                  vmem, vmem, vmem,          # dec_w_ih, dec_w_hh, dec_b
                  vmem, vmem],               # fc_w, fc_b
        out_specs=vmem,
        scratch_shapes=[pltpu.VMEM((src_rows, 4 * hid), jnp.float32),
                        pltpu.VMEM((steps * BP, 4 * hid), jnp.float32)],
    )(sel, src_flat, trg_flat,
      enc_w_ih, enc_w_hh, enc_b,
      dec_w_ih, dec_w_hh, dec_b,
      fc_w, fc_b)


# ---------------------------------------------------------------------------
# Seq2Seq forward (mirrors the PyTorch module's forward semantics)
# ---------------------------------------------------------------------------
def seq2seq_forward(params, src, trg, teacher_forcing_ratio=0.5, tf_key=None):
    """src: (B, src_len, in_dim), trg: (B, trg_len, out_dim) -> (B, trg_len, out_dim)."""
    B, src_len, in_dim = src.shape
    trg_len, out_dim = trg.shape[1], trg.shape[2]
    hid = params["fc_w"].shape[0]

    # TODO(synk): PyTorch draws torch.rand(1).item() per decoder step on the
    # host; here the full Bernoulli schedule is drawn up front on-device so the
    # decode loop never syncs to the host (same distribution, different RNG).
    if tf_key is None:
        tf_key = jax.random.PRNGKey(1)
    draws = jax.random.uniform(tf_key, (trg_len,))

    if trg_len < 2:
        return trg[:, :1, :]

    steps = trg_len - 1
    # sel[p]: use trg[:, p, :] as decoder input at step p (output time t = p+1).
    # p == 0 always uses trg[:, 0, :]; later steps follow the coin drawn at the
    # end of PyTorch iteration t == p.
    sel = jnp.concatenate(
        [jnp.ones((1,), jnp.int32),
         (draws[1:trg_len - 1] < teacher_forcing_ratio).astype(jnp.int32)])

    # Sublane-align batch, 8-align feature dims (zero-padded weight rows/cols
    # keep the math exact; padding stripped after the call).
    BP = _round_up(B, 8)
    IN_P = _round_up(in_dim, 8)
    OUT_P = _round_up(out_dim, 8)

    def pad2(w, r, c):
        return jnp.pad(w, ((0, r - w.shape[0]), (0, c - w.shape[1])))

    enc_w_ih = pad2(params["enc_w_ih"], IN_P, 4 * hid)
    dec_w_ih = pad2(params["dec_w_ih"], OUT_P, 4 * hid)
    fc_w = pad2(params["fc_w"], hid, OUT_P)
    fc_b = pad2(params["fc_b"], 1, OUT_P)

    # Time-major, padded, flattened to (time*batch, feature) so the hoisted
    # projections are single 2-D MXU matmuls (no in-kernel reshape needed).
    src_tm = jnp.transpose(src, (1, 0, 2))                     # (src_len, B, in)
    src_p = jnp.pad(src_tm, ((0, 0), (0, BP - B), (0, IN_P - in_dim)))
    src_flat = src_p.reshape(src_len * BP, IN_P)

    trg_tm = jnp.transpose(trg[:, :steps, :], (1, 0, 2))       # (steps, B, out)
    trg_p = jnp.pad(trg_tm, ((0, 0), (0, BP - B), (0, OUT_P - out_dim)))
    trg_flat = trg_p.reshape(steps * BP, OUT_P)

    y_p = _seq2seq_call(sel, src_flat, trg_flat,
                        enc_w_ih, params["enc_w_hh"], params["enc_b"],
                        dec_w_ih, params["dec_w_hh"], params["dec_b"],
                        fc_w, fc_b,
                        steps=steps, BP=BP, OUT_P=OUT_P, hid=hid)

    y = jnp.transpose(y_p[:, :B, :out_dim], (1, 0, 2))          # (B, steps, out)
    # outputs[:, 0, :] = trg[:, 0, :], as in the reference module.
    return jnp.concatenate([trg[:, :1, :], y], axis=1)


# ---------------------------------------------------------------------------
# Deterministic parameter init (uniform(-1/sqrt(H), 1/sqrt(H)), PyTorch-like).
# Weights are kept split (W_ih, W_hh) so the input projection can be hoisted;
# bias is the combined b_ih + b_hh.
# ---------------------------------------------------------------------------
def init_params(key, input_dim, output_dim, hid):
    ks = jax.random.split(key, 8)
    s = 1.0 / float(hid) ** 0.5
    u = lambda k, shape: jax.random.uniform(k, shape, jnp.float32, -s, s)
    return dict(
        enc_w_ih=u(ks[0], (input_dim, 4 * hid)),
        enc_w_hh=u(ks[1], (hid, 4 * hid)),
        enc_b=u(ks[2], (1, 4 * hid)),
        dec_w_ih=u(ks[3], (output_dim, 4 * hid)),
        dec_w_hh=u(ks[4], (hid, 4 * hid)),
        dec_b=u(ks[5], (1, 4 * hid)),
        fc_w=u(ks[6], (hid, output_dim)),
        fc_b=u(ks[7], (1, output_dim)),
    )


# ---------------------------------------------------------------------------
# Pure-JAX reference (same math, no Pallas) for a correctness check
# ---------------------------------------------------------------------------
def _reference_forward(params, src, trg, teacher_forcing_ratio, tf_key):
    B, src_len, _ = src.shape
    trg_len = trg.shape[1]
    hid = params["fc_w"].shape[0]
    hp = jax.lax.Precision.HIGHEST

    def cell(x, h, c, w_ih, w_hh, b):
        gates = (jnp.dot(x, w_ih, precision=hp)
                 + jnp.dot(h, w_hh, precision=hp) + b)
        H = hid
        i = jax.nn.sigmoid(gates[:, :H])
        f = jax.nn.sigmoid(gates[:, H:2 * H])
        g = jnp.tanh(gates[:, 2 * H:3 * H])
        o = jax.nn.sigmoid(gates[:, 3 * H:])
        c_new = f * c + i * g
        return o * jnp.tanh(c_new), c_new

    h = jnp.zeros((B, hid), jnp.float32)
    c = jnp.zeros((B, hid), jnp.float32)
    for t in range(src_len):
        h, c = cell(src[:, t, :], h, c,
                    params["enc_w_ih"], params["enc_w_hh"], params["enc_b"])

    draws = jax.random.uniform(tf_key, (trg_len,))
    outputs = [trg[:, 0, :]]
    x = trg[:, 0, :]
    for t in range(1, trg_len):
        h, c = cell(x, h, c,
                    params["dec_w_ih"], params["dec_w_hh"], params["dec_b"])
        y = jnp.dot(h, params["fc_w"], precision=hp) + params["fc_b"]
        outputs.append(y)
        use_trg = draws[t] < teacher_forcing_ratio
        x = jnp.where(use_trg, trg[:, t, :], y)
    return jnp.stack(outputs, axis=1)


if __name__ == "__main__":
    key = jax.random.PRNGKey(0)
    k_src, k_trg, k_par, k_tf = jax.random.split(key, 4)

    B, src_len, trg_len, in_dim, out_dim = 2, 8, 8, 4, 4
    src = jax.random.normal(k_src, (B, src_len, in_dim), jnp.float32)
    trg = jax.random.normal(k_trg, (B, trg_len, out_dim), jnp.float32)
    params = init_params(k_par, in_dim, out_dim, HID)

    fwd = jax.jit(seq2seq_forward)
    out = fwd(params, src, trg, 0.5, k_tf)
    out = jax.block_until_ready(out)

    assert out.shape == (B, trg_len, out_dim), out.shape
    assert out.dtype == jnp.float32
    assert bool(jnp.all(jnp.isfinite(out)))
    # first target step is copied through, as in the reference module
    assert bool(jnp.allclose(out[:, 0, :], trg[:, 0, :]))

    # numerical check against the pure-JAX reference (same TF schedule)
    ref = _reference_forward(params, src, trg, 0.5, k_tf)
    assert bool(jnp.allclose(out, ref, atol=2e-3, rtol=2e-3)), \
        float(jnp.max(jnp.abs(out - ref)))

    print("KERNEL_OK")
</pallas_src>

<mosaic_0001>
module attributes {stable_mosaic.version = 11 : i64} {
  func.func @_seq2seq_kernel(%arg0: memref<7xi32, #tpu.memory_space<smem>>, %arg1: memref<64x8xf32, #tpu.memory_space<vmem>>, %arg2: memref<56x8xf32, #tpu.memory_space<vmem>>, %arg3: memref<8x512xf32, #tpu.memory_space<vmem>>, %arg4: memref<128x512xf32, #tpu.memory_space<vmem>>, %arg5: memref<1x512xf32, #tpu.memory_space<vmem>>, %arg6: memref<8x512xf32, #tpu.memory_space<vmem>>, %arg7: memref<128x512xf32, #tpu.memory_space<vmem>>, %arg8: memref<1x512xf32, #tpu.memory_space<vmem>>, %arg9: memref<128x8xf32, #tpu.memory_space<vmem>>, %arg10: memref<1x8xf32, #tpu.memory_space<vmem>>, %arg11: memref<7x8x8xf32, #tpu.memory_space<vmem>>, %arg12: memref<64x512xf32, #tpu.memory_space<vmem>>, %arg13: memref<56x512xf32, #tpu.memory_space<vmem>>) attributes {dimension_semantics = [], scalar_prefetch = 0 : i64, scratch_operands = 2 : i64, tpu.core_type = #tpu.core_type<tc>} {
    %c0 = arith.constant 0 : index
    %c0_0 = arith.constant 0 : index
    %0 = vector.load %arg1[%c0, %c0_0] : memref<64x8xf32, #tpu.memory_space<vmem>>, vector<64x8xf32>
    %c0_1 = arith.constant 0 : index
    %c0_2 = arith.constant 0 : index
    %1 = vector.load %arg3[%c0_1, %c0_2] : memref<8x512xf32, #tpu.memory_space<vmem>>, vector<8x512xf32>
    %cst = arith.constant dense<0.000000e+00> : vector<64x512xf32>
    %2 = tpu.matmul %0, %1, %cst {dimension_numbers = #tpu.dot_dimension_numbers<[1], [0], [0], [1], [0, 0, 1, 1], [], []>} : vector<64x8xf32>, vector<8x512xf32>, vector<64x512xf32> -> vector<64x512xf32>
    %c0_3 = arith.constant 0 : index
    %c0_4 = arith.constant 0 : index
    %3 = vector.load %arg5[%c0_3, %c0_4] : memref<1x512xf32, #tpu.memory_space<vmem>>, vector<1x512xf32>
    %4 = vector.broadcast %3 : vector<1x512xf32> to vector<64x512xf32>
    %5 = arith.addf %2, %4 : vector<64x512xf32>
    %c0_5 = arith.constant 0 : index
    %c0_6 = arith.constant 0 : index
    %6 = vector.load %arg12[%c0_5, %c0_6] : memref<64x512xf32, #tpu.memory_space<vmem>>, vector<64x512xf32>
    tpu.vector_store %arg12[%c0_5, %c0_6], %5 {strides = array<i32>} : memref<64x512xf32, #tpu.memory_space<vmem>>, vector<64x512xf32>,
    %c0_7 = arith.constant 0 : index
    %c0_8 = arith.constant 0 : index
    %7 = vector.load %arg2[%c0_7, %c0_8] : memref<56x8xf32, #tpu.memory_space<vmem>>, vector<56x8xf32>
    %c0_9 = arith.constant 0 : index
    %c0_10 = arith.constant 0 : index
    %8 = vector.load %arg6[%c0_9, %c0_10] : memref<8x512xf32, #tpu.memory_space<vmem>>, vector<8x512xf32>
    %cst_11 = arith.constant dense<0.000000e+00> : vector<56x512xf32>
    %9 = tpu.matmul %7, %8, %cst_11 {dimension_numbers = #tpu.dot_dimension_numbers<[1], [0], [0], [1], [0, 0, 1, 1], [], []>} : vector<56x8xf32>, vector<8x512xf32>, vector<56x512xf32> -> vector<56x512xf32>
    %c0_12 = arith.constant 0 : index
    %c0_13 = arith.constant 0 : index
    %10 = vector.load %arg8[%c0_12, %c0_13] : memref<1x512xf32, #tpu.memory_space<vmem>>, vector<1x512xf32>
    %11 = vector.broadcast %10 : vector<1x512xf32> to vector<56x512xf32>
    %12 = arith.addf %9, %11 : vector<56x512xf32>
    %c0_14 = arith.constant 0 : index
    %c0_15 = arith.constant 0 : index
    %13 = vector.load %arg13[%c0_14, %c0_15] : memref<56x512xf32, #tpu.memory_space<vmem>>, vector<56x512xf32>
    tpu.vector_store %arg13[%c0_14, %c0_15], %12 {strides = array<i32>} : memref<56x512xf32, #tpu.memory_space<vmem>>, vector<56x512xf32>,
    %c0_16 = arith.constant 0 : index
    %c0_17 = arith.constant 0 : index
    %14 = vector.load %arg4[%c0_16, %c0_17] : memref<128x512xf32, #tpu.memory_space<vmem>>, vector<128x512xf32>
    %c0_18 = arith.constant 0 : index
    %c0_19 = arith.constant 0 : index
    %15 = vector.load %arg7[%c0_18, %c0_19] : memref<128x512xf32, #tpu.memory_space<vmem>>, vector<128x512xf32>
    %c0_20 = arith.constant 0 : index
    %c0_21 = arith.constant 0 : index
    %16 = vector.load %arg6[%c0_20, %c0_21] : memref<8x512xf32, #tpu.memory_space<vmem>>, vector<8x512xf32>
    %c0_22 = arith.constant 0 : index
    %c0_23 = arith.constant 0 : index
    %17 = vector.load %arg8[%c0_22, %c0_23] : memref<1x512xf32, #tpu.memory_space<vmem>>, vector<1x512xf32>
    %c0_24 = arith.constant 0 : index
    %c0_25 = arith.constant 0 : index
    %18 = vector.load %arg9[%c0_24, %c0_25] : memref<128x8xf32, #tpu.memory_space<vmem>>, vector<128x8xf32>
    %c0_26 = arith.constant 0 : index
    %c0_27 = arith.constant 0 : index
    %19 = vector.load %arg10[%c0_26, %c0_27] : memref<1x8xf32, #tpu.memory_space<vmem>>, vector<1x8xf32>
    %cst_28 = arith.constant 0.000000e+00 : f32
    %20 = vector.broadcast %cst_28 : f32 to vector<8x128xf32>
    %cst_29 = arith.constant 0.000000e+00 : f32
    %21 = vector.broadcast %cst_29 : f32 to vector<8x128xf32>
    %c0_i32 = arith.constant 0 : i32
    %c8_i32 = arith.constant 8 : i32
    %22 = arith.muli %c0_i32, %c8_i32 : i32
    %23 = tpu.assume_multiple %22, 8 : i32
    %24 = arith.index_cast %23 : i32 to index
    %c0_30 = arith.constant 0 : index
    %25 = vector.load %arg12[%24, %c0_30] : memref<64x512xf32, #tpu.memory_space<vmem>>, vector<8x512xf32>
    %cst_31 = arith.constant dense<0.000000e+00> : vector<8x512xf32>
    %26 = tpu.matmul %20, %14, %cst_31 {dimension_numbers = #tpu.dot_dimension_numbers<[1], [0], [0], [1], [0, 0, 1, 1], [], []>} : vector<8x128xf32>, vector<128x512xf32>, vector<8x512xf32> -> vector<8x512xf32>
    %27 = arith.addf %26, %25 : vector<8x512xf32>
    %28 = vector.extract_strided_slice %27 {offsets = [0, 0], sizes = [8, 128], strides = [1, 1]} : vector<8x512xf32> to vector<8x128xf32>
    %29 = arith.negf %28 : vector<8x128xf32>
    %30 = math.exp %29 : vector<8x128xf32>
    %cst_32 = arith.constant 1.000000e+00 : f32
    %31 = vector.broadcast %cst_32 : f32 to vector<8x128xf32>
    %32 = arith.addf %31, %30 : vector<8x128xf32>
    %33 = arith.divf %31, %32 : vector<8x128xf32>
    %34 = vector.extract_strided_slice %27 {offsets = [0, 128], sizes = [8, 128], strides = [1, 1]} : vector<8x512xf32> to vector<8x128xf32>
    %35 = arith.negf %34 : vector<8x128xf32>
    %36 = math.exp %35 : vector<8x128xf32>
    %cst_33 = arith.constant 1.000000e+00 : f32
    %37 = vector.broadcast %cst_33 : f32 to vector<8x128xf32>
    %38 = arith.addf %37, %36 : vector<8x128xf32>
    %39 = arith.divf %37, %38 : vector<8x128xf32>
    %40 = vector.extract_strided_slice %27 {offsets = [0, 256], sizes = [8, 128], strides = [1, 1]} : vector<8x512xf32> to vector<8x128xf32>
    %41 = math.tanh %40 : vector<8x128xf32>
    %42 = vector.extract_strided_slice %27 {offsets = [0, 384], sizes = [8, 128], strides = [1, 1]} : vector<8x512xf32> to vector<8x128xf32>
    %43 = arith.negf %42 : vector<8x128xf32>
    %44 = math.exp %43 : vector<8x128xf32>
    %cst_34 = arith.constant 1.000000e+00 : f32
    %45 = vector.broadcast %cst_34 : f32 to vector<8x128xf32>
    %46 = arith.addf %45, %44 : vector<8x128xf32>
    %47 = arith.divf %45, %46 : vector<8x128xf32>
    %48 = arith.mulf %39, %21 : vector<8x128xf32>
    %49 = arith.mulf %33, %41 : vector<8x128xf32>
    %50 = arith.addf %48, %49 : vector<8x128xf32>
    %51 = math.tanh %50 : vector<8x128xf32>
    %52 = arith.mulf %47, %51 : vector<8x128xf32>
    %c1_i32 = arith.constant 1 : i32
    %c8_i32_35 = arith.constant 8 : i32
    %53 = arith.muli %c1_i32, %c8_i32_35 : i32
    %54 = tpu.assume_multiple %53, 8 : i32
    %55 = arith.index_cast %54 : i32 to index
    %c0_36 = arith.constant 0 : index
    %56 = vector.load %arg12[%55, %c0_36] : memref<64x512xf32, #tpu.memory_space<vmem>>, vector<8x512xf32>
    %cst_37 = arith.constant dense<0.000000e+00> : vector<8x512xf32>
    %57 = tpu.matmul %52, %14, %cst_37 {dimension_numbers = #tpu.dot_dimension_numbers<[1], [0], [0], [1], [0, 0, 1, 1], [], []>} : vector<8x128xf32>, vector<128x512xf32>, vector<8x512xf32> -> vector<8x512xf32>
    %58 = arith.addf %57, %56 : vector<8x512xf32>
    %59 = vector.extract_strided_slice %58 {offsets = [0, 0], sizes = [8, 128], strides = [1, 1]} : vector<8x512xf32> to vector<8x128xf32>
    %60 = arith.negf %59 : vector<8x128xf32>
    %61 = math.exp %60 : vector<8x128xf32>
    %cst_38 = arith.constant 1.000000e+00 : f32
    %62 = vector.broadcast %cst_38 : f32 to vector<8x128xf32>
    %63 = arith.addf %62, %61 : vector<8x128xf32>
    %64 = arith.divf %62, %63 : vector<8x128xf32>
    %65 = vector.extract_strided_slice %58 {offsets = [0, 128], sizes = [8, 128], strides = [1, 1]} : vector<8x512xf32> to vector<8x128xf32>
    %66 = arith.negf %65 : vector<8x128xf32>
    %67 = math.exp %66 : vector<8x128xf32>
    %cst_39 = arith.constant 1.000000e+00 : f32
    %68 = vector.broadcast %cst_39 : f32 to vector<8x128xf32>
    %69 = arith.addf %68, %67 : vector<8x128xf32>
    %70 = arith.divf %68, %69 : vector<8x128xf32>
    %71 = vector.extract_strided_slice %58 {offsets = [0, 256], sizes = [8, 128], strides = [1, 1]} : vector<8x512xf32> to vector<8x128xf32>
    %72 = math.tanh %71 : vector<8x128xf32>
    %73 = vector.extract_strided_slice %58 {offsets = [0, 384], sizes = [8, 128], strides = [1, 1]} : vector<8x512xf32> to vector<8x128xf32>
    %74 = arith.negf %73 : vector<8x128xf32>
    %75 = math.exp %74 : vector<8x128xf32>
    %cst_40 = arith.constant 1.000000e+00 : f32
    %76 = vector.broadcast %cst_40 : f32 to vector<8x128xf32>
    %77 = arith.addf %76, %75 : vector<8x128xf32>
    %78 = arith.divf %76, %77 : vector<8x128xf32>
    %79 = arith.mulf %70, %50 : vector<8x128xf32>
    %80 = arith.mulf %64, %72 : vector<8x128xf32>
    %81 = arith.addf %79, %80 : vector<8x128xf32>
    %82 = math.tanh %81 : vector<8x128xf32>
    %83 = arith.mulf %78, %82 : vector<8x128xf32>
    %c2_i32 = arith.constant 2 : i32
    %c8_i32_41 = arith.constant 8 : i32
    %84 = arith.muli %c2_i32, %c8_i32_41 : i32
    %85 = tpu.assume_multiple %84, 8 : i32
    %86 = arith.index_cast %85 : i32 to index
    %c0_42 = arith.constant 0 : index
    %87 = vector.load %arg12[%86, %c0_42] : memref<64x512xf32, #tpu.memory_space<vmem>>, vector<8x512xf32>
    %cst_43 = arith.constant dense<0.000000e+00> : vector<8x512xf32>
    %88 = tpu.matmul %83, %14, %cst_43 {dimension_numbers = #tpu.dot_dimension_numbers<[1], [0], [0], [1], [0, 0, 1, 1], [], []>} : vector<8x128xf32>, vector<128x512xf32>, vector<8x512xf32> -> vector<8x512xf32>
    %89 = arith.addf %88, %87 : vector<8x512xf32>
    %90 = vector.extract_strided_slice %89 {offsets = [0, 0], sizes = [8, 128], strides = [1, 1]} : vector<8x512xf32> to vector<8x128xf32>
    %91 = arith.negf %90 : vector<8x128xf32>
    %92 = math.exp %91 : vector<8x128xf32>
    %cst_44 = arith.constant 1.000000e+00 : f32
    %93 = vector.broadcast %cst_44 : f32 to vector<8x128xf32>
    %94 = arith.addf %93, %92 : vector<8x128xf32>
    %95 = arith.divf %93, %94 : vector<8x128xf32>
    %96 = vector.extract_strided_slice %89 {offsets = [0, 128], sizes = [8, 128], strides = [1, 1]} : vector<8x512xf32> to vector<8x128xf32>
    %97 = arith.negf %96 : vector<8x128xf32>
    %98 = math.exp %97 : vector<8x128xf32>
    %cst_45 = arith.constant 1.000000e+00 : f32
    %99 = vector.broadcast %cst_45 : f32 to vector<8x128xf32>
    %100 = arith.addf %99, %98 : vector<8x128xf32>
    %101 = arith.divf %99, %100 : vector<8x128xf32>
    %102 = vector.extract_strided_slice %89 {offsets = [0, 256], sizes = [8, 128], strides = [1, 1]} : vector<8x512xf32> to vector<8x128xf32>
    %103 = math.tanh %102 : vector<8x128xf32>
    %104 = vector.extract_strided_slice %89 {offsets = [0, 384], sizes = [8, 128], strides = [1, 1]} : vector<8x512xf32> to vector<8x128xf32>
    %105 = arith.negf %104 : vector<8x128xf32>
    %106 = math.exp %105 : vector<8x128xf32>
    %cst_46 = arith.constant 1.000000e+00 : f32
    %107 = vector.broadcast %cst_46 : f32 to vector<8x128xf32>
    %108 = arith.addf %107, %106 : vector<8x128xf32>
    %109 = arith.divf %107, %108 : vector<8x128xf32>
    %110 = arith.mulf %101, %81 : vector<8x128xf32>
    %111 = arith.mulf %95, %103 : vector<8x128xf32>
    %112 = arith.addf %110, %111 : vector<8x128xf32>
    %113 = math.tanh %112 : vector<8x128xf32>
    %114 = arith.mulf %109, %113 : vector<8x128xf32>
    %c3_i32 = arith.constant 3 : i32
    %c8_i32_47 = arith.constant 8 : i32
    %115 = arith.muli %c3_i32, %c8_i32_47 : i32
    %116 = tpu.assume_multiple %115, 8 : i32
    %117 = arith.index_cast %116 : i32 to index
    %c0_48 = arith.constant 0 : index
    %118 = vector.load %arg12[%117, %c0_48] : memref<64x512xf32, #tpu.memory_space<vmem>>, vector<8x512xf32>
    %cst_49 = arith.constant dense<0.000000e+00> : vector<8x512xf32>
    %119 = tpu.matmul %114, %14, %cst_49 {dimension_numbers = #tpu.dot_dimension_numbers<[1], [0], [0], [1], [0, 0, 1, 1], [], []>} : vector<8x128xf32>, vector<128x512xf32>, vector<8x512xf32> -> vector<8x512xf32>
    %120 = arith.addf %119, %118 : vector<8x512xf32>
    %121 = vector.extract_strided_slice %120 {offsets = [0, 0], sizes = [8, 128], strides = [1, 1]} : vector<8x512xf32> to vector<8x128xf32>
    %122 = arith.negf %121 : vector<8x128xf32>
    %123 = math.exp %122 : vector<8x128xf32>
    %cst_50 = arith.constant 1.000000e+00 : f32
    %124 = vector.broadcast %cst_50 : f32 to vector<8x128xf32>
    %125 = arith.addf %124, %123 : vector<8x128xf32>
    %126 = arith.divf %124, %125 : vector<8x128xf32>
    %127 = vector.extract_strided_slice %120 {offsets = [0, 128], sizes = [8, 128], strides = [1, 1]} : vector<8x512xf32> to vector<8x128xf32>
    %128 = arith.negf %127 : vector<8x128xf32>
    %129 = math.exp %128 : vector<8x128xf32>
    %cst_51 = arith.constant 1.000000e+00 : f32
    %130 = vector.broadcast %cst_51 : f32 to vector<8x128xf32>
    %131 = arith.addf %130, %129 : vector<8x128xf32>
    %132 = arith.divf %130, %131 : vector<8x128xf32>
    %133 = vector.extract_strided_slice %120 {offsets = [0, 256], sizes = [8, 128], strides = [1, 1]} : vector<8x512xf32> to vector<8x128xf32>
    %134 = math.tanh %133 : vector<8x128xf32>
    %135 = vector.extract_strided_slice %120 {offsets = [0, 384], sizes = [8, 128], strides = [1, 1]} : vector<8x512xf32> to vector<8x128xf32>
    %136 = arith.negf %135 : vector<8x128xf32>
    %137 = math.exp %136 : vector<8x128xf32>
    %cst_52 = arith.constant 1.000000e+00 : f32
    %138 = vector.broadcast %cst_52 : f32 to vector<8x128xf32>
    %139 = arith.addf %138, %137 : vector<8x128xf32>
    %140 = arith.divf %138, %139 : vector<8x128xf32>
    %141 = arith.mulf %132, %112 : vector<8x128xf32>
    %142 = arith.mulf %126, %134 : vector<8x128xf32>
    %143 = arith.addf %141, %142 : vector<8x128xf32>
    %144 = math.tanh %143 : vector<8x128xf32>
    %145 = arith.mulf %140, %144 : vector<8x128xf32>
    %c4_i32 = arith.constant 4 : i32
    %c8_i32_53 = arith.constant 8 : i32
    %146 = arith.muli %c4_i32, %c8_i32_53 : i32
    %147 = tpu.assume_multiple %146, 8 : i32
    %148 = arith.index_cast %147 : i32 to index
    %c0_54 = arith.constant 0 : index
    %149 = vector.load %arg12[%148, %c0_54] : memref<64x512xf32, #tpu.memory_space<vmem>>, vector<8x512xf32>
    %cst_55 = arith.constant dense<0.000000e+00> : vector<8x512xf32>
    %150 = tpu.matmul %145, %14, %cst_55 {dimension_numbers = #tpu.dot_dimension_numbers<[1], [0], [0], [1], [0, 0, 1, 1], [], []>} : vector<8x128xf32>, vector<128x512xf32>, vector<8x512xf32> -> vector<8x512xf32>
    %151 = arith.addf %150, %149 : vector<8x512xf32>
    %152 = vector.extract_strided_slice %151 {offsets = [0, 0], sizes = [8, 128], strides = [1, 1]} : vector<8x512xf32> to vector<8x128xf32>
    %153 = arith.negf %152 : vector<8x128xf32>
    %154 = math.exp %153 : vector<8x128xf32>
    %cst_56 = arith.constant 1.000000e+00 : f32
    %155 = vector.broadcast %cst_56 : f32 to vector<8x128xf32>
    %156 = arith.addf %155, %154 : vector<8x128xf32>
    %157 = arith.divf %155, %156 : vector<8x128xf32>
    %158 = vector.extract_strided_slice %151 {offsets = [0, 128], sizes = [8, 128], strides = [1, 1]} : vector<8x512xf32> to vector<8x128xf32>
    %159 = arith.negf %158 : vector<8x128xf32>
    %160 = math.exp %159 : vector<8x128xf32>
    %cst_57 = arith.constant 1.000000e+00 : f32
    %161 = vector.broadcast %cst_57 : f32 to vector<8x128xf32>
    %162 = arith.addf %161, %160 : vector<8x128xf32>
    %163 = arith.divf %161, %162 : vector<8x128xf32>
    %164 = vector.extract_strided_slice %151 {offsets = [0, 256], sizes = [8, 128], strides = [1, 1]} : vector<8x512xf32> to vector<8x128xf32>
    %165 = math.tanh %164 : vector<8x128xf32>
    %166 = vector.extract_strided_slice %151 {offsets = [0, 384], sizes = [8, 128], strides = [1, 1]} : vector<8x512xf32> to vector<8x128xf32>
    %167 = arith.negf %166 : vector<8x128xf32>
    %168 = math.exp %167 : vector<8x128xf32>
    %cst_58 = arith.constant 1.000000e+00 : f32
    %169 = vector.broadcast %cst_58 : f32 to vector<8x128xf32>
    %170 = arith.addf %169, %168 : vector<8x128xf32>
    %171 = arith.divf %169, %170 : vector<8x128xf32>
    %172 = arith.mulf %163, %143 : vector<8x128xf32>
    %173 = arith.mulf %157, %165 : vector<8x128xf32>
    %174 = arith.addf %172, %173 : vector<8x128xf32>
    %175 = math.tanh %174 : vector<8x128xf32>
    %176 = arith.mulf %171, %175 : vector<8x128xf32>
    %c5_i32 = arith.constant 5 : i32
    %c8_i32_59 = arith.constant 8 : i32
    %177 = arith.muli %c5_i32, %c8_i32_59 : i32
    %178 = tpu.assume_multiple %177, 8 : i32
    %179 = arith.index_cast %178 : i32 to index
    %c0_60 = arith.constant 0 : index
    %180 = vector.load %arg12[%179, %c0_60] : memref<64x512xf32, #tpu.memory_space<vmem>>, vector<8x512xf32>
    %cst_61 = arith.constant dense<0.000000e+00> : vector<8x512xf32>
    %181 = tpu.matmul %176, %14, %cst_61 {dimension_numbers = #tpu.dot_dimension_numbers<[1], [0], [0], [1], [0, 0, 1, 1], [], []>} : vector<8x128xf32>, vector<128x512xf32>, vector<8x512xf32> -> vector<8x512xf32>
    %182 = arith.addf %181, %180 : vector<8x512xf32>
    %183 = vector.extract_strided_slice %182 {offsets = [0, 0], sizes = [8, 128], strides = [1, 1]} : vector<8x512xf32> to vector<8x128xf32>
    %184 = arith.negf %183 : vector<8x128xf32>
    %185 = math.exp %184 : vector<8x128xf32>
    %cst_62 = arith.constant 1.000000e+00 : f32
    %186 = vector.broadcast %cst_62 : f32 to vector<8x128xf32>
    %187 = arith.addf %186, %185 : vector<8x128xf32>
    %188 = arith.divf %186, %187 : vector<8x128xf32>
    %189 = vector.extract_strided_slice %182 {offsets = [0, 128], sizes = [8, 128], strides = [1, 1]} : vector<8x512xf32> to vector<8x128xf32>
    %190 = arith.negf %189 : vector<8x128xf32>
    %191 = math.exp %190 : vector<8x128xf32>
    %cst_63 = arith.constant 1.000000e+00 : f32
    %192 = vector.broadcast %cst_63 : f32 to vector<8x128xf32>
    %193 = arith.addf %192, %191 : vector<8x128xf32>
    %194 = arith.divf %192, %193 : vector<8x128xf32>
    %195 = vector.extract_strided_slice %182 {offsets = [0, 256], sizes = [8, 128], strides = [1, 1]} : vector<8x512xf32> to vector<8x128xf32>
    %196 = math.tanh %195 : vector<8x128xf32>
    %197 = vector.extract_strided_slice %182 {offsets = [0, 384], sizes = [8, 128], strides = [1, 1]} : vector<8x512xf32> to vector<8x128xf32>
    %198 = arith.negf %197 : vector<8x128xf32>
    %199 = math.exp %198 : vector<8x128xf32>
    %cst_64 = arith.constant 1.000000e+00 : f32
    %200 = vector.broadcast %cst_64 : f32 to vector<8x128xf32>
    %201 = arith.addf %200, %199 : vector<8x128xf32>
    %202 = arith.divf %200, %201 : vector<8x128xf32>
    %203 = arith.mulf %194, %174 : vector<8x128xf32>
    %204 = arith.mulf %188, %196 : vector<8x128xf32>
    %205 = arith.addf %203, %204 : vector<8x128xf32>
    %206 = math.tanh %205 : vector<8x128xf32>
    %207 = arith.mulf %202, %206 : vector<8x128xf32>
    %c6_i32 = arith.constant 6 : i32
    %c8_i32_65 = arith.constant 8 : i32
    %208 = arith.muli %c6_i32, %c8_i32_65 : i32
    %209 = tpu.assume_multiple %208, 8 : i32
    %210 = arith.index_cast %209 : i32 to index
    %c0_66 = arith.constant 0 : index
    %211 = vector.load %arg12[%210, %c0_66] : memref<64x512xf32, #tpu.memory_space<vmem>>, vector<8x512xf32>
    %cst_67 = arith.constant dense<0.000000e+00> : vector<8x512xf32>
    %212 = tpu.matmul %207, %14, %cst_67 {dimension_numbers = #tpu.dot_dimension_numbers<[1], [0], [0], [1], [0, 0, 1, 1], [], []>} : vector<8x128xf32>, vector<128x512xf32>, vector<8x512xf32> -> vector<8x512xf32>
    %213 = arith.addf %212, %211 : vector<8x512xf32>
    %214 = vector.extract_strided_slice %213 {offsets = [0, 0], sizes = [8, 128], strides = [1, 1]} : vector<8x512xf32> to vector<8x128xf32>
    %215 = arith.negf %214 : vector<8x128xf32>
    %216 = math.exp %215 : vector<8x128xf32>
    %cst_68 = arith.constant 1.000000e+00 : f32
    %217 = vector.broadcast %cst_68 : f32 to vector<8x128xf32>
    %218 = arith.addf %217, %216 : vector<8x128xf32>
    %219 = arith.divf %217, %218 : vector<8x128xf32>
    %220 = vector.extract_strided_slice %213 {offsets = [0, 128], sizes = [8, 128], strides = [1, 1]} : vector<8x512xf32> to vector<8x128xf32>
    %221 = arith.negf %220 : vector<8x128xf32>
    %222 = math.exp %221 : vector<8x128xf32>
    %cst_69 = arith.constant 1.000000e+00 : f32
    %223 = vector.broadcast %cst_69 : f32 to vector<8x128xf32>
    %224 = arith.addf %223, %222 : vector<8x128xf32>
    %225 = arith.divf %223, %224 : vector<8x128xf32>
    %226 = vector.extract_strided_slice %213 {offsets = [0, 256], sizes = [8, 128], strides = [1, 1]} : vector<8x512xf32> to vector<8x128xf32>
    %227 = math.tanh %226 : vector<8x128xf32>
    %228 = vector.extract_strided_slice %213 {offsets = [0, 384], sizes = [8, 128], strides = [1, 1]} : vector<8x512xf32> to vector<8x128xf32>
    %229 = arith.negf %228 : vector<8x128xf32>
    %230 = math.exp %229 : vector<8x128xf32>
    %cst_70 = arith.constant 1.000000e+00 : f32
    %231 = vector.broadcast %cst_70 : f32 to vector<8x128xf32>
    %232 = arith.addf %231, %230 : vector<8x128xf32>
    %233 = arith.divf %231, %232 : vector<8x128xf32>
    %234 = arith.mulf %225, %205 : vector<8x128xf32>
    %235 = arith.mulf %219, %227 : vector<8x128xf32>
    %236 = arith.addf %234, %235 : vector<8x128xf32>
    %237 = math.tanh %236 : vector<8x128xf32>
    %238 = arith.mulf %233, %237 : vector<8x128xf32>
    %c7_i32 = arith.constant 7 : i32
    %c8_i32_71 = arith.constant 8 : i32
    %239 = arith.muli %c7_i32, %c8_i32_71 : i32
    %240 = tpu.assume_multiple %239, 8 : i32
    %241 = arith.index_cast %240 : i32 to index
    %c0_72 = arith.constant 0 : index
    %242 = vector.load %arg12[%241, %c0_72] : memref<64x512xf32, #tpu.memory_space<vmem>>, vector<8x512xf32>
    %cst_73 = arith.constant dense<0.000000e+00> : vector<8x512xf32>
    %243 = tpu.matmul %238, %14, %cst_73 {dimension_numbers = #tpu.dot_dimension_numbers<[1], [0], [0], [1], [0, 0, 1, 1], [], []>} : vector<8x128xf32>, vector<128x512xf32>, vector<8x512xf32> -> vector<8x512xf32>
    %244 = arith.addf %243, %242 : vector<8x512xf32>
    %245 = vector.extract_strided_slice %244 {offsets = [0, 0], sizes = [8, 128], strides = [1, 1]} : vector<8x512xf32> to vector<8x128xf32>
    %246 = arith.negf %245 : vector<8x128xf32>
    %247 = math.exp %246 : vector<8x128xf32>
    %cst_74 = arith.constant 1.000000e+00 : f32
    %248 = vector.broadcast %cst_74 : f32 to vector<8x128xf32>
    %249 = arith.addf %248, %247 : vector<8x128xf32>
    %250 = arith.divf %248, %249 : vector<8x128xf32>
    %251 = vector.extract_strided_slice %244 {offsets = [0, 128], sizes = [8, 128], strides = [1, 1]} : vector<8x512xf32> to vector<8x128xf32>
    %252 = arith.negf %251 : vector<8x128xf32>
    %253 = math.exp %252 : vector<8x128xf32>
    %cst_75 = arith.constant 1.000000e+00 : f32
    %254 = vector.broadcast %cst_75 : f32 to vector<8x128xf32>
    %255 = arith.addf %254, %253 : vector<8x128xf32>
    %256 = arith.divf %254, %255 : vector<8x128xf32>
    %257 = vector.extract_strided_slice %244 {offsets = [0, 256], sizes = [8, 128], strides = [1, 1]} : vector<8x512xf32> to vector<8x128xf32>
    %258 = math.tanh %257 : vector<8x128xf32>
    %259 = vector.extract_strided_slice %244 {offsets = [0, 384], sizes = [8, 128], strides = [1, 1]} : vector<8x512xf32> to vector<8x128xf32>
    %260 = arith.negf %259 : vector<8x128xf32>
    %261 = math.exp %260 : vector<8x128xf32>
    %cst_76 = arith.constant 1.000000e+00 : f32
    %262 = vector.broadcast %cst_76 : f32 to vector<8x128xf32>
    %263 = arith.addf %262, %261 : vector<8x128xf32>
    %264 = arith.divf %262, %263 : vector<8x128xf32>
    %265 = arith.mulf %256, %236 : vector<8x128xf32>
    %266 = arith.mulf %250, %258 : vector<8x128xf32>
    %267 = arith.addf %265, %266 : vector<8x128xf32>
    %268 = math.tanh %267 : vector<8x128xf32>
    %269 = arith.mulf %264, %268 : vector<8x128xf32>
    %c8_i32_77 = arith.constant 8 : i32
    %cst_78 = arith.constant 0.000000e+00 : f32
    %270 = vector.broadcast %cst_78 : f32 to vector<8x8xf32>
    %c0_i32_79 = arith.constant 0 : i32
    %271 = arith.index_cast %c0_i32_79 : i32 to index
    %272 = memref.load %arg0[%271] : memref<7xi32, #tpu.memory_space<smem>>
    %273 = arith.sitofp %272 : i32 to f32
    %c8_i32_80 = arith.constant 8 : i32
    %274 = arith.muli %c0_i32_79, %c8_i32_80 : i32
    %275 = tpu.assume_multiple %274, 8 : i32
    %cst_81 = arith.constant dense<0.000000e+00> : vector<8x512xf32>
    %276 = tpu.matmul %270, %16, %cst_81 {dimension_numbers = #tpu.dot_dimension_numbers<[1], [0], [0], [1], [0, 0, 1, 1], [], []>} : vector<8x8xf32>, vector<8x512xf32>, vector<8x512xf32> -> vector<8x512xf32>
    %277 = vector.broadcast %17 : vector<1x512xf32> to vector<8x512xf32>
    %278 = arith.addf %276, %277 : vector<8x512xf32>
    %279 = arith.index_cast %275 : i32 to index
    %c0_82 = arith.constant 0 : index
    %280 = vector.load %arg13[%279, %c0_82] : memref<56x512xf32, #tpu.memory_space<vmem>>, vector<8x512xf32>
    %281 = vector.broadcast %273 : f32 to vector<8x512xf32>
    %282 = arith.mulf %281, %280 : vector<8x512xf32>
    %cst_83 = arith.constant 1.000000e+00 : f32
    %283 = arith.subf %cst_83, %273 : f32
    %284 = vector.broadcast %283 : f32 to vector<8x512xf32>
    %285 = arith.mulf %284, %278 : vector<8x512xf32>
    %286 = arith.addf %282, %285 : vector<8x512xf32>
    %cst_84 = arith.constant dense<0.000000e+00> : vector<8x512xf32>
    %287 = tpu.matmul %269, %15, %cst_84 {dimension_numbers = #tpu.dot_dimension_numbers<[1], [0], [0], [1], [0, 0, 1, 1], [], []>} : vector<8x128xf32>, vector<128x512xf32>, vector<8x512xf32> -> vector<8x512xf32>
    %288 = arith.addf %287, %286 : vector<8x512xf32>
    %289 = vector.extract_strided_slice %288 {offsets = [0, 0], sizes = [8, 128], strides = [1, 1]} : vector<8x512xf32> to vector<8x128xf32>
    %290 = arith.negf %289 : vector<8x128xf32>
    %291 = math.exp %290 : vector<8x128xf32>
    %cst_85 = arith.constant 1.000000e+00 : f32
    %292 = vector.broadcast %cst_85 : f32 to vector<8x128xf32>
    %293 = arith.addf %292, %291 : vector<8x128xf32>
    %294 = arith.divf %292, %293 : vector<8x128xf32>
    %295 = vector.extract_strided_slice %288 {offsets = [0, 128], sizes = [8, 128], strides = [1, 1]} : vector<8x512xf32> to vector<8x128xf32>
    %296 = arith.negf %295 : vector<8x128xf32>
    %297 = math.exp %296 : vector<8x128xf32>
    %cst_86 = arith.constant 1.000000e+00 : f32
    %298 = vector.broadcast %cst_86 : f32 to vector<8x128xf32>
    %299 = arith.addf %298, %297 : vector<8x128xf32>
    %300 = arith.divf %298, %299 : vector<8x128xf32>
    %301 = vector.extract_strided_slice %288 {offsets = [0, 256], sizes = [8, 128], strides = [1, 1]} : vector<8x512xf32> to vector<8x128xf32>
    %302 = math.tanh %301 : vector<8x128xf32>
    %303 = vector.extract_strided_slice %288 {offsets = [0, 384], sizes = [8, 128], strides = [1, 1]} : vector<8x512xf32> to vector<8x128xf32>
    %304 = arith.negf %303 : vector<8x128xf32>
    %305 = math.exp %304 : vector<8x128xf32>
    %cst_87 = arith.constant 1.000000e+00 : f32
    %306 = vector.broadcast %cst_87 : f32 to vector<8x128xf32>
    %307 = arith.addf %306, %305 : vector<8x128xf32>
    %308 = arith.divf %306, %307 : vector<8x128xf32>
    %309 = arith.mulf %300, %267 : vector<8x128xf32>
    %310 = arith.mulf %294, %302 : vector<8x128xf32>
    %311 = arith.addf %309, %310 : vector<8x128xf32>
    %312 = math.tanh %311 : vector<8x128xf32>
    %313 = arith.mulf %308, %312 : vector<8x128xf32>
    %cst_88 = arith.constant dense<0.000000e+00> : vector<8x8xf32>
    %314 = tpu.matmul %313, %18, %cst_88 {dimension_numbers = #tpu.dot_dimension_numbers<[1], [0], [0], [1], [0, 0, 1, 1], [], []>} : vector<8x128xf32>, vector<128x8xf32>, vector<8x8xf32> -> vector<8x8xf32>
    %315 = vector.broadcast %19 : vector<1x8xf32> to vector<8x8xf32>
    %316 = arith.addf %314, %315 : vector<8x8xf32>
    %317 = arith.index_cast %c0_i32_79 : i32 to index
    %c0_89 = arith.constant 0 : index
    %c0_90 = arith.constant 0 : index
    %318 = vector.load %arg11[%317, %c0_89, %c0_90] : memref<7x8x8xf32, #tpu.memory_space<vmem>>, vector<1x8x8xf32>
    %319 = vector.shape_cast %318 : vector<1x8x8xf32> to vector<8x8xf32>
    %320 = vector.shape_cast %316 : vector<8x8xf32> to vector<1x8x8xf32>
    tpu.vector_store %arg11[%317, %c0_89, %c0_90], %320 {strides = array<i32>} : memref<7x8x8xf32, #tpu.memory_space<vmem>>, vector<1x8x8xf32>,
    %c1_i32_91 = arith.constant 1 : i32
    %321 = arith.index_cast %c1_i32_91 : i32 to index
    %322 = memref.load %arg0[%321] : memref<7xi32, #tpu.memory_space<smem>>
    %323 = arith.sitofp %322 : i32 to f32
    %c8_i32_92 = arith.constant 8 : i32
    %324 = arith.muli %c1_i32_91, %c8_i32_92 : i32
    %325 = tpu.assume_multiple %324, 8 : i32
    %cst_93 = arith.constant dense<0.000000e+00> : vector<8x512xf32>
    %326 = tpu.matmul %316, %16, %cst_93 {dimension_numbers = #tpu.dot_dimension_numbers<[1], [0], [0], [1], [0, 0, 1, 1], [], []>} : vector<8x8xf32>, vector<8x512xf32>, vector<8x512xf32> -> vector<8x512xf32>
    %327 = vector.broadcast %17 : vector<1x512xf32> to vector<8x512xf32>
    %328 = arith.addf %326, %327 : vector<8x512xf32>
    %329 = arith.index_cast %325 : i32 to index
    %c0_94 = arith.constant 0 : index
    %330 = vector.load %arg13[%329, %c0_94] : memref<56x512xf32, #tpu.memory_space<vmem>>, vector<8x512xf32>
    %331 = vector.broadcast %323 : f32 to vector<8x512xf32>
    %332 = arith.mulf %331, %330 : vector<8x512xf32>
    %cst_95 = arith.constant 1.000000e+00 : f32
    %333 = arith.subf %cst_95, %323 : f32
    %334 = vector.broadcast %333 : f32 to vector<8x512xf32>
    %335 = arith.mulf %334, %328 : vector<8x512xf32>
    %336 = arith.addf %332, %335 : vector<8x512xf32>
    %cst_96 = arith.constant dense<0.000000e+00> : vector<8x512xf32>
    %337 = tpu.matmul %313, %15, %cst_96 {dimension_numbers = #tpu.dot_dimension_numbers<[1], [0], [0], [1], [0, 0, 1, 1], [], []>} : vector<8x128xf32>, vector<128x512xf32>, vector<8x512xf32> -> vector<8x512xf32>
    %338 = arith.addf %337, %336 : vector<8x512xf32>
    %339 = vector.extract_strided_slice %338 {offsets = [0, 0], sizes = [8, 128], strides = [1, 1]} : vector<8x512xf32> to vector<8x128xf32>
    %340 = arith.negf %339 : vector<8x128xf32>
    %341 = math.exp %340 : vector<8x128xf32>
    %cst_97 = arith.constant 1.000000e+00 : f32
    %342 = vector.broadcast %cst_97 : f32 to vector<8x128xf32>
    %343 = arith.addf %342, %341 : vector<8x128xf32>
    %344 = arith.divf %342, %343 : vector<8x128xf32>
    %345 = vector.extract_strided_slice %338 {offsets = [0, 128], sizes = [8, 128], strides = [1, 1]} : vector<8x512xf32> to vector<8x128xf32>
    %346 = arith.negf %345 : vector<8x128xf32>
    %347 = math.exp %346 : vector<8x128xf32>
    %cst_98 = arith.constant 1.000000e+00 : f32
    %348 = vector.broadcast %cst_98 : f32 to vector<8x128xf32>
    %349 = arith.addf %348, %347 : vector<8x128xf32>
    %350 = arith.divf %348, %349 : vector<8x128xf32>
    %351 = vector.extract_strided_slice %338 {offsets = [0, 256], sizes = [8, 128], strides = [1, 1]} : vector<8x512xf32> to vector<8x128xf32>
    %352 = math.tanh %351 : vector<8x128xf32>
    %353 = vector.extract_strided_slice %338 {offsets = [0, 384], sizes = [8, 128], strides = [1, 1]} : vector<8x512xf32> to vector<8x128xf32>
    %354 = arith.negf %353 : vector<8x128xf32>
    %355 = math.exp %354 : vector<8x128xf32>
    %cst_99 = arith.constant 1.000000e+00 : f32
    %356 = vector.broadcast %cst_99 : f32 to vector<8x128xf32>
    %357 = arith.addf %356, %355 : vector<8x128xf32>
    %358 = arith.divf %356, %357 : vector<8x128xf32>
    %359 = arith.mulf %350, %311 : vector<8x128xf32>
    %360 = arith.mulf %344, %352 : vector<8x128xf32>
    %361 = arith.addf %359, %360 : vector<8x128xf32>
    %362 = math.tanh %361 : vector<8x128xf32>
    %363 = arith.mulf %358, %362 : vector<8x128xf32>
    %cst_100 = arith.constant dense<0.000000e+00> : vector<8x8xf32>
    %364 = tpu.matmul %363, %18, %cst_100 {dimension_numbers = #tpu.dot_dimension_numbers<[1], [0], [0], [1], [0, 0, 1, 1], [], []>} : vector<8x128xf32>, vector<128x8xf32>, vector<8x8xf32> -> vector<8x8xf32>
    %365 = vector.broadcast %19 : vector<1x8xf32> to vector<8x8xf32>
    %366 = arith.addf %364, %365 : vector<8x8xf32>
    %367 = arith.index_cast %c1_i32_91 : i32 to index
    %c0_101 = arith.constant 0 : index
    %c0_102 = arith.constant 0 : index
    %368 = vector.load %arg11[%367, %c0_101, %c0_102] : memref<7x8x8xf32, #tpu.memory_space<vmem>>, vector<1x8x8xf32>
    %369 = vector.shape_cast %368 : vector<1x8x8xf32> to vector<8x8xf32>
    %370 = vector.shape_cast %366 : vector<8x8xf32> to vector<1x8x8xf32>
    tpu.vector_store %arg11[%367, %c0_101, %c0_102], %370 {strides = array<i32>} : memref<7x8x8xf32, #tpu.memory_space<vmem>>, vector<1x8x8xf32>,
    %c2_i32_103 = arith.constant 2 : i32
    %371 = arith.index_cast %c2_i32_103 : i32 to index
    %372 = memref.load %arg0[%371] : memref<7xi32, #tpu.memory_space<smem>>
    %373 = arith.sitofp %372 : i32 to f32
    %c8_i32_104 = arith.constant 8 : i32
    %374 = arith.muli %c2_i32_103, %c8_i32_104 : i32
    %375 = tpu.assume_multiple %374, 8 : i32
    %cst_105 = arith.constant dense<0.000000e+00> : vector<8x512xf32>
    %376 = tpu.matmul %366, %16, %cst_105 {dimension_numbers = #tpu.dot_dimension_numbers<[1], [0], [0], [1], [0, 0, 1, 1], [], []>} : vector<8x8xf32>, vector<8x512xf32>, vector<8x512xf32> -> vector<8x512xf32>
    %377 = vector.broadcast %17 : vector<1x512xf32> to vector<8x512xf32>
    %378 = arith.addf %376, %377 : vector<8x512xf32>
    %379 = arith.index_cast %375 : i32 to index
    %c0_106 = arith.constant 0 : index
    %380 = vector.load %arg13[%379, %c0_106] : memref<56x512xf32, #tpu.memory_space<vmem>>, vector<8x512xf32>
    %381 = vector.broadcast %373 : f32 to vector<8x512xf32>
    %382 = arith.mulf %381, %380 : vector<8x512xf32>
    %cst_107 = arith.constant 1.000000e+00 : f32
    %383 = arith.subf %cst_107, %373 : f32
    %384 = vector.broadcast %383 : f32 to vector<8x512xf32>
    %385 = arith.mulf %384, %378 : vector<8x512xf32>
    %386 = arith.addf %382, %385 : vector<8x512xf32>
    %cst_108 = arith.constant dense<0.000000e+00> : vector<8x512xf32>
    %387 = tpu.matmul %363, %15, %cst_108 {dimension_numbers = #tpu.dot_dimension_numbers<[1], [0], [0], [1], [0, 0, 1, 1], [], []>} : vector<8x128xf32>, vector<128x512xf32>, vector<8x512xf32> -> vector<8x512xf32>
    %388 = arith.addf %387, %386 : vector<8x512xf32>
    %389 = vector.extract_strided_slice %388 {offsets = [0, 0], sizes = [8, 128], strides = [1, 1]} : vector<8x512xf32> to vector<8x128xf32>
    %390 = arith.negf %389 : vector<8x128xf32>
    %391 = math.exp %390 : vector<8x128xf32>
    %cst_109 = arith.constant 1.000000e+00 : f32
    %392 = vector.broadcast %cst_109 : f32 to vector<8x128xf32>
    %393 = arith.addf %392, %391 : vector<8x128xf32>
    %394 = arith.divf %392, %393 : vector<8x128xf32>
    %395 = vector.extract_strided_slice %388 {offsets = [0, 128], sizes = [8, 128], strides = [1, 1]} : vector<8x512xf32> to vector<8x128xf32>
    %396 = arith.negf %395 : vector<8x128xf32>
    %397 = math.exp %396 : vector<8x128xf32>
    %cst_110 = arith.constant 1.000000e+00 : f32
    %398 = vector.broadcast %cst_110 : f32 to vector<8x128xf32>
    %399 = arith.addf %398, %397 : vector<8x128xf32>
    %400 = arith.divf %398, %399 : vector<8x128xf32>
    %401 = vector.extract_strided_slice %388 {offsets = [0, 256], sizes = [8, 128], strides = [1, 1]} : vector<8x512xf32> to vector<8x128xf32>
    %402 = math.tanh %401 : vector<8x128xf32>
    %403 = vector.extract_strided_slice %388 {offsets = [0, 384], sizes = [8, 128], strides = [1, 1]} : vector<8x512xf32> to vector<8x128xf32>
    %404 = arith.negf %403 : vector<8x128xf32>
    %405 = math.exp %404 : vector<8x128xf32>
    %cst_111 = arith.constant 1.000000e+00 : f32
    %406 = vector.broadcast %cst_111 : f32 to vector<8x128xf32>
    %407 = arith.addf %406, %405 : vector<8x128xf32>
    %408 = arith.divf %406, %407 : vector<8x128xf32>
    %409 = arith.mulf %400, %361 : vector<8x128xf32>
    %410 = arith.mulf %394, %402 : vector<8x128xf32>
    %411 = arith.addf %409, %410 : vector<8x128xf32>
    %412 = math.tanh %411 : vector<8x128xf32>
    %413 = arith.mulf %408, %412 : vector<8x128xf32>
    %cst_112 = arith.constant dense<0.000000e+00> : vector<8x8xf32>
    %414 = tpu.matmul %413, %18, %cst_112 {dimension_numbers = #tpu.dot_dimension_numbers<[1], [0], [0], [1], [0, 0, 1, 1], [], []>} : vector<8x128xf32>, vector<128x8xf32>, vector<8x8xf32> -> vector<8x8xf32>
    %415 = vector.broadcast %19 : vector<1x8xf32> to vector<8x8xf32>
    %416 = arith.addf %414, %415 : vector<8x8xf32>
    %417 = arith.index_cast %c2_i32_103 : i32 to index
    %c0_113 = arith.constant 0 : index
    %c0_114 = arith.constant 0 : index
    %418 = vector.load %arg11[%417, %c0_113, %c0_114] : memref<7x8x8xf32, #tpu.memory_space<vmem>>, vector<1x8x8xf32>
    %419 = vector.shape_cast %418 : vector<1x8x8xf32> to vector<8x8xf32>
    %420 = vector.shape_cast %416 : vector<8x8xf32> to vector<1x8x8xf32>
    tpu.vector_store %arg11[%417, %c0_113, %c0_114], %420 {strides = array<i32>} : memref<7x8x8xf32, #tpu.memory_space<vmem>>, vector<1x8x8xf32>,
    %c3_i32_115 = arith.constant 3 : i32
    %421 = arith.index_cast %c3_i32_115 : i32 to index
    %422 = memref.load %arg0[%421] : memref<7xi32, #tpu.memory_space<smem>>
    %423 = arith.sitofp %422 : i32 to f32
    %c8_i32_116 = arith.constant 8 : i32
    %424 = arith.muli %c3_i32_115, %c8_i32_116 : i32
    %425 = tpu.assume_multiple %424, 8 : i32
    %cst_117 = arith.constant dense<0.000000e+00> : vector<8x512xf32>
    %426 = tpu.matmul %416, %16, %cst_117 {dimension_numbers = #tpu.dot_dimension_numbers<[1], [0], [0], [1], [0, 0, 1, 1], [], []>} : vector<8x8xf32>, vector<8x512xf32>, vector<8x512xf32> -> vector<8x512xf32>
    %427 = vector.broadcast %17 : vector<1x512xf32> to vector<8x512xf32>
    %428 = arith.addf %426, %427 : vector<8x512xf32>
    %429 = arith.index_cast %425 : i32 to index
    %c0_118 = arith.constant 0 : index
    %430 = vector.load %arg13[%429, %c0_118] : memref<56x512xf32, #tpu.memory_space<vmem>>, vector<8x512xf32>
    %431 = vector.broadcast %423 : f32 to vector<8x512xf32>
    %432 = arith.mulf %431, %430 : vector<8x512xf32>
    %cst_119 = arith.constant 1.000000e+00 : f32
    %433 = arith.subf %cst_119, %423 : f32
    %434 = vector.broadcast %433 : f32 to vector<8x512xf32>
    %435 = arith.mulf %434, %428 : vector<8x512xf32>
    %436 = arith.addf %432, %435 : vector<8x512xf32>
    %cst_120 = arith.constant dense<0.000000e+00> : vector<8x512xf32>
    %437 = tpu.matmul %413, %15, %cst_120 {dimension_numbers = #tpu.dot_dimension_numbers<[1], [0], [0], [1], [0, 0, 1, 1], [], []>} : vector<8x128xf32>, vector<128x512xf32>, vector<8x512xf32> -> vector<8x512xf32>
    %438 = arith.addf %437, %436 : vector<8x512xf32>
    %439 = vector.extract_strided_slice %438 {offsets = [0, 0], sizes = [8, 128], strides = [1, 1]} : vector<8x512xf32> to vector<8x128xf32>
    %440 = arith.negf %439 : vector<8x128xf32>
    %441 = math.exp %440 : vector<8x128xf32>
    %cst_121 = arith.constant 1.000000e+00 : f32
    %442 = vector.broadcast %cst_121 : f32 to vector<8x128xf32>
    %443 = arith.addf %442, %441 : vector<8x128xf32>
    %444 = arith.divf %442, %443 : vector<8x128xf32>
    %445 = vector.extract_strided_slice %438 {offsets = [0, 128], sizes = [8, 128], strides = [1, 1]} : vector<8x512xf32> to vector<8x128xf32>
    %446 = arith.negf %445 : vector<8x128xf32>
    %447 = math.exp %446 : vector<8x128xf32>
    %cst_122 = arith.constant 1.000000e+00 : f32
    %448 = vector.broadcast %cst_122 : f32 to vector<8x128xf32>
    %449 = arith.addf %448, %447 : vector<8x128xf32>
    %450 = arith.divf %448, %449 : vector<8x128xf32>
    %451 = vector.extract_strided_slice %438 {offsets = [0, 256], sizes = [8, 128], strides = [1, 1]} : vector<8x512xf32> to vector<8x128xf32>
    %452 = math.tanh %451 : vector<8x128xf32>
    %453 = vector.extract_strided_slice %438 {offsets = [0, 384], sizes = [8, 128], strides = [1, 1]} : vector<8x512xf32> to vector<8x128xf32>
    %454 = arith.negf %453 : vector<8x128xf32>
    %455 = math.exp %454 : vector<8x128xf32>
    %cst_123 = arith.constant 1.000000e+00 : f32
    %456 = vector.broadcast %cst_123 : f32 to vector<8x128xf32>
    %457 = arith.addf %456, %455 : vector<8x128xf32>
    %458 = arith.divf %456, %457 : vector<8x128xf32>
    %459 = arith.mulf %450, %411 : vector<8x128xf32>
    %460 = arith.mulf %444, %452 : vector<8x128xf32>
    %461 = arith.addf %459, %460 : vector<8x128xf32>
    %462 = math.tanh %461 : vector<8x128xf32>
    %463 = arith.mulf %458, %462 : vector<8x128xf32>
    %cst_124 = arith.constant dense<0.000000e+00> : vector<8x8xf32>
    %464 = tpu.matmul %463, %18, %cst_124 {dimension_numbers = #tpu.dot_dimension_numbers<[1], [0], [0], [1], [0, 0, 1, 1], [], []>} : vector<8x128xf32>, vector<128x8xf32>, vector<8x8xf32> -> vector<8x8xf32>
    %465 = vector.broadcast %19 : vector<1x8xf32> to vector<8x8xf32>
    %466 = arith.addf %464, %465 : vector<8x8xf32>
    %467 = arith.index_cast %c3_i32_115 : i32 to index
    %c0_125 = arith.constant 0 : index
    %c0_126 = arith.constant 0 : index
    %468 = vector.load %arg11[%467, %c0_125, %c0_126] : memref<7x8x8xf32, #tpu.memory_space<vmem>>, vector<1x8x8xf32>
    %469 = vector.shape_cast %468 : vector<1x8x8xf32> to vector<8x8xf32>
    %470 = vector.shape_cast %466 : vector<8x8xf32> to vector<1x8x8xf32>
    tpu.vector_store %arg11[%467, %c0_125, %c0_126], %470 {strides = array<i32>} : memref<7x8x8xf32, #tpu.memory_space<vmem>>, vector<1x8x8xf32>,
    %c4_i32_127 = arith.constant 4 : i32
    %471 = arith.index_cast %c4_i32_127 : i32 to index
    %472 = memref.load %arg0[%471] : memref<7xi32, #tpu.memory_space<smem>>
    %473 = arith.sitofp %472 : i32 to f32
    %c8_i32_128 = arith.constant 8 : i32
    %474 = arith.muli %c4_i32_127, %c8_i32_128 : i32
    %475 = tpu.assume_multiple %474, 8 : i32
    %cst_129 = arith.constant dense<0.000000e+00> : vector<8x512xf32>
    %476 = tpu.matmul %466, %16, %cst_129 {dimension_numbers = #tpu.dot_dimension_numbers<[1], [0], [0], [1], [0, 0, 1, 1], [], []>} : vector<8x8xf32>, vector<8x512xf32>, vector<8x512xf32> -> vector<8x512xf32>
    %477 = vector.broadcast %17 : vector<1x512xf32> to vector<8x512xf32>
    %478 = arith.addf %476, %477 : vector<8x512xf32>
    %479 = arith.index_cast %475 : i32 to index
    %c0_130 = arith.constant 0 : index
    %480 = vector.load %arg13[%479, %c0_130] : memref<56x512xf32, #tpu.memory_space<vmem>>, vector<8x512xf32>
    %481 = vector.broadcast %473 : f32 to vector<8x512xf32>
    %482 = arith.mulf %481, %480 : vector<8x512xf32>
    %cst_131 = arith.constant 1.000000e+00 : f32
    %483 = arith.subf %cst_131, %473 : f32
    %484 = vector.broadcast %483 : f32 to vector<8x512xf32>
    %485 = arith.mulf %484, %478 : vector<8x512xf32>
    %486 = arith.addf %482, %485 : vector<8x512xf32>
    %cst_132 = arith.constant dense<0.000000e+00> : vector<8x512xf32>
    %487 = tpu.matmul %463, %15, %cst_132 {dimension_numbers = #tpu.dot_dimension_numbers<[1], [0], [0], [1], [0, 0, 1, 1], [], []>} : vector<8x128xf32>, vector<128x512xf32>, vector<8x512xf32> -> vector<8x512xf32>
    %488 = arith.addf %487, %486 : vector<8x512xf32>
    %489 = vector.extract_strided_slice %488 {offsets = [0, 0], sizes = [8, 128], strides = [1, 1]} : vector<8x512xf32> to vector<8x128xf32>
    %490 = arith.negf %489 : vector<8x128xf32>
    %491 = math.exp %490 : vector<8x128xf32>
    %cst_133 = arith.constant 1.000000e+00 : f32
    %492 = vector.broadcast %cst_133 : f32 to vector<8x128xf32>
    %493 = arith.addf %492, %491 : vector<8x128xf32>
    %494 = arith.divf %492, %493 : vector<8x128xf32>
    %495 = vector.extract_strided_slice %488 {offsets = [0, 128], sizes = [8, 128], strides = [1, 1]} : vector<8x512xf32> to vector<8x128xf32>
    %496 = arith.negf %495 : vector<8x128xf32>
    %497 = math.exp %496 : vector<8x128xf32>
    %cst_134 = arith.constant 1.000000e+00 : f32
    %498 = vector.broadcast %cst_134 : f32 to vector<8x128xf32>
    %499 = arith.addf %498, %497 : vector<8x128xf32>
    %500 = arith.divf %498, %499 : vector<8x128xf32>
    %501 = vector.extract_strided_slice %488 {offsets = [0, 256], sizes = [8, 128], strides = [1, 1]} : vector<8x512xf32> to vector<8x128xf32>
    %502 = math.tanh %501 : vector<8x128xf32>
    %503 = vector.extract_strided_slice %488 {offsets = [0, 384], sizes = [8, 128], strides = [1, 1]} : vector<8x512xf32> to vector<8x128xf32>
    %504 = arith.negf %503 : vector<8x128xf32>
    %505 = math.exp %504 : vector<8x128xf32>
    %cst_135 = arith.constant 1.000000e+00 : f32
    %506 = vector.broadcast %cst_135 : f32 to vector<8x128xf32>
    %507 = arith.addf %506, %505 : vector<8x128xf32>
    %508 = arith.divf %506, %507 : vector<8x128xf32>
    %509 = arith.mulf %500, %461 : vector<8x128xf32>
    %510 = arith.mulf %494, %502 : vector<8x128xf32>
    %511 = arith.addf %509, %510 : vector<8x128xf32>
    %512 = math.tanh %511 : vector<8x128xf32>
    %513 = arith.mulf %508, %512 : vector<8x128xf32>
    %cst_136 = arith.constant dense<0.000000e+00> : vector<8x8xf32>
    %514 = tpu.matmul %513, %18, %cst_136 {dimension_numbers = #tpu.dot_dimension_numbers<[1], [0], [0], [1], [0, 0, 1, 1], [], []>} : vector<8x128xf32>, vector<128x8xf32>, vector<8x8xf32> -> vector<8x8xf32>
    %515 = vector.broadcast %19 : vector<1x8xf32> to vector<8x8xf32>
    %516 = arith.addf %514, %515 : vector<8x8xf32>
    %517 = arith.index_cast %c4_i32_127 : i32 to index
    %c0_137 = arith.constant 0 : index
    %c0_138 = arith.constant 0 : index
    %518 = vector.load %arg11[%517, %c0_137, %c0_138] : memref<7x8x8xf32, #tpu.memory_space<vmem>>, vector<1x8x8xf32>
    %519 = vector.shape_cast %518 : vector<1x8x8xf32> to vector<8x8xf32>
    %520 = vector.shape_cast %516 : vector<8x8xf32> to vector<1x8x8xf32>
    tpu.vector_store %arg11[%517, %c0_137, %c0_138], %520 {strides = array<i32>} : memref<7x8x8xf32, #tpu.memory_space<vmem>>, vector<1x8x8xf32>,
    %c5_i32_139 = arith.constant 5 : i32
    %521 = arith.index_cast %c5_i32_139 : i32 to index
    %522 = memref.load %arg0[%521] : memref<7xi32, #tpu.memory_space<smem>>
    %523 = arith.sitofp %522 : i32 to f32
    %c8_i32_140 = arith.constant 8 : i32
    %524 = arith.muli %c5_i32_139, %c8_i32_140 : i32
    %525 = tpu.assume_multiple %524, 8 : i32
    %cst_141 = arith.constant dense<0.000000e+00> : vector<8x512xf32>
    %526 = tpu.matmul %516, %16, %cst_141 {dimension_numbers = #tpu.dot_dimension_numbers<[1], [0], [0], [1], [0, 0, 1, 1], [], []>} : vector<8x8xf32>, vector<8x512xf32>, vector<8x512xf32> -> vector<8x512xf32>
    %527 = vector.broadcast %17 : vector<1x512xf32> to vector<8x512xf32>
    %528 = arith.addf %526, %527 : vector<8x512xf32>
    %529 = arith.index_cast %525 : i32 to index
    %c0_142 = arith.constant 0 : index
    %530 = vector.load %arg13[%529, %c0_142] : memref<56x512xf32, #tpu.memory_space<vmem>>, vector<8x512xf32>
    %531 = vector.broadcast %523 : f32 to vector<8x512xf32>
    %532 = arith.mulf %531, %530 : vector<8x512xf32>
    %cst_143 = arith.constant 1.000000e+00 : f32
    %533 = arith.subf %cst_143, %523 : f32
    %534 = vector.broadcast %533 : f32 to vector<8x512xf32>
    %535 = arith.mulf %534, %528 : vector<8x512xf32>
    %536 = arith.addf %532, %535 : vector<8x512xf32>
    %cst_144 = arith.constant dense<0.000000e+00> : vector<8x512xf32>
    %537 = tpu.matmul %513, %15, %cst_144 {dimension_numbers = #tpu.dot_dimension_numbers<[1], [0], [0], [1], [0, 0, 1, 1], [], []>} : vector<8x128xf32>, vector<128x512xf32>, vector<8x512xf32> -> vector<8x512xf32>
    %538 = arith.addf %537, %536 : vector<8x512xf32>
    %539 = vector.extract_strided_slice %538 {offsets = [0, 0], sizes = [8, 128], strides = [1, 1]} : vector<8x512xf32> to vector<8x128xf32>
    %540 = arith.negf %539 : vector<8x128xf32>
    %541 = math.exp %540 : vector<8x128xf32>
    %cst_145 = arith.constant 1.000000e+00 : f32
    %542 = vector.broadcast %cst_145 : f32 to vector<8x128xf32>
    %543 = arith.addf %542, %541 : vector<8x128xf32>
    %544 = arith.divf %542, %543 : vector<8x128xf32>
    %545 = vector.extract_strided_slice %538 {offsets = [0, 128], sizes = [8, 128], strides = [1, 1]} : vector<8x512xf32> to vector<8x128xf32>
    %546 = arith.negf %545 : vector<8x128xf32>
    %547 = math.exp %546 : vector<8x128xf32>
    %cst_146 = arith.constant 1.000000e+00 : f32
    %548 = vector.broadcast %cst_146 : f32 to vector<8x128xf32>
    %549 = arith.addf %548, %547 : vector<8x128xf32>
    %550 = arith.divf %548, %549 : vector<8x128xf32>
    %551 = vector.extract_strided_slice %538 {offsets = [0, 256], sizes = [8, 128], strides = [1, 1]} : vector<8x512xf32> to vector<8x128xf32>
    %552 = math.tanh %551 : vector<8x128xf32>
    %553 = vector.extract_strided_slice %538 {offsets = [0, 384], sizes = [8, 128], strides = [1, 1]} : vector<8x512xf32> to vector<8x128xf32>
    %554 = arith.negf %553 : vector<8x128xf32>
    %555 = math.exp %554 : vector<8x128xf32>
    %cst_147 = arith.constant 1.000000e+00 : f32
    %556 = vector.broadcast %cst_147 : f32 to vector<8x128xf32>
    %557 = arith.addf %556, %555 : vector<8x128xf32>
    %558 = arith.divf %556, %557 : vector<8x128xf32>
    %559 = arith.mulf %550, %511 : vector<8x128xf32>
    %560 = arith.mulf %544, %552 : vector<8x128xf32>
    %561 = arith.addf %559, %560 : vector<8x128xf32>
    %562 = math.tanh %561 : vector<8x128xf32>
    %563 = arith.mulf %558, %562 : vector<8x128xf32>
    %cst_148 = arith.constant dense<0.000000e+00> : vector<8x8xf32>
    %564 = tpu.matmul %563, %18, %cst_148 {dimension_numbers = #tpu.dot_dimension_numbers<[1], [0], [0], [1], [0, 0, 1, 1], [], []>} : vector<8x128xf32>, vector<128x8xf32>, vector<8x8xf32> -> vector<8x8xf32>
    %565 = vector.broadcast %19 : vector<1x8xf32> to vector<8x8xf32>
    %566 = arith.addf %564, %565 : vector<8x8xf32>
    %567 = arith.index_cast %c5_i32_139 : i32 to index
    %c0_149 = arith.constant 0 : index
    %c0_150 = arith.constant 0 : index
    %568 = vector.load %arg11[%567, %c0_149, %c0_150] : memref<7x8x8xf32, #tpu.memory_space<vmem>>, vector<1x8x8xf32>
    %569 = vector.shape_cast %568 : vector<1x8x8xf32> to vector<8x8xf32>
    %570 = vector.shape_cast %566 : vector<8x8xf32> to vector<1x8x8xf32>
    tpu.vector_store %arg11[%567, %c0_149, %c0_150], %570 {strides = array<i32>} : memref<7x8x8xf32, #tpu.memory_space<vmem>>, vector<1x8x8xf32>,
    %c6_i32_151 = arith.constant 6 : i32
    %571 = arith.index_cast %c6_i32_151 : i32 to index
    %572 = memref.load %arg0[%571] : memref<7xi32, #tpu.memory_space<smem>>
    %573 = arith.sitofp %572 : i32 to f32
    %c8_i32_152 = arith.constant 8 : i32
    %574 = arith.muli %c6_i32_151, %c8_i32_152 : i32
    %575 = tpu.assume_multiple %574, 8 : i32
    %cst_153 = arith.constant dense<0.000000e+00> : vector<8x512xf32>
    %576 = tpu.matmul %566, %16, %cst_153 {dimension_numbers = #tpu.dot_dimension_numbers<[1], [0], [0], [1], [0, 0, 1, 1], [], []>} : vector<8x8xf32>, vector<8x512xf32>, vector<8x512xf32> -> vector<8x512xf32>
    %577 = vector.broadcast %17 : vector<1x512xf32> to vector<8x512xf32>
    %578 = arith.addf %576, %577 : vector<8x512xf32>
    %579 = arith.index_cast %575 : i32 to index
    %c0_154 = arith.constant 0 : index
    %580 = vector.load %arg13[%579, %c0_154] : memref<56x512xf32, #tpu.memory_space<vmem>>, vector<8x512xf32>
    %581 = vector.broadcast %573 : f32 to vector<8x512xf32>
    %582 = arith.mulf %581, %580 : vector<8x512xf32>
    %cst_155 = arith.constant 1.000000e+00 : f32
    %583 = arith.subf %cst_155, %573 : f32
    %584 = vector.broadcast %583 : f32 to vector<8x512xf32>
    %585 = arith.mulf %584, %578 : vector<8x512xf32>
    %586 = arith.addf %582, %585 : vector<8x512xf32>
    %cst_156 = arith.constant dense<0.000000e+00> : vector<8x512xf32>
    %587 = tpu.matmul %563, %15, %cst_156 {dimension_numbers = #tpu.dot_dimension_numbers<[1], [0], [0], [1], [0, 0, 1, 1], [], []>} : vector<8x128xf32>, vector<128x512xf32>, vector<8x512xf32> -> vector<8x512xf32>
    %588 = arith.addf %587, %586 : vector<8x512xf32>
    %589 = vector.extract_strided_slice %588 {offsets = [0, 0], sizes = [8, 128], strides = [1, 1]} : vector<8x512xf32> to vector<8x128xf32>
    %590 = arith.negf %589 : vector<8x128xf32>
    %591 = math.exp %590 : vector<8x128xf32>
    %cst_157 = arith.constant 1.000000e+00 : f32
    %592 = vector.broadcast %cst_157 : f32 to vector<8x128xf32>
    %593 = arith.addf %592, %591 : vector<8x128xf32>
    %594 = arith.divf %592, %593 : vector<8x128xf32>
    %595 = vector.extract_strided_slice %588 {offsets = [0, 128], sizes = [8, 128], strides = [1, 1]} : vector<8x512xf32> to vector<8x128xf32>
    %596 = arith.negf %595 : vector<8x128xf32>
    %597 = math.exp %596 : vector<8x128xf32>
    %cst_158 = arith.constant 1.000000e+00 : f32
    %598 = vector.broadcast %cst_158 : f32 to vector<8x128xf32>
    %599 = arith.addf %598, %597 : vector<8x128xf32>
    %600 = arith.divf %598, %599 : vector<8x128xf32>
    %601 = vector.extract_strided_slice %588 {offsets = [0, 256], sizes = [8, 128], strides = [1, 1]} : vector<8x512xf32> to vector<8x128xf32>
    %602 = math.tanh %601 : vector<8x128xf32>
    %603 = vector.extract_strided_slice %588 {offsets = [0, 384], sizes = [8, 128], strides = [1, 1]} : vector<8x512xf32> to vector<8x128xf32>
    %604 = arith.negf %603 : vector<8x128xf32>
    %605 = math.exp %604 : vector<8x128xf32>
    %cst_159 = arith.constant 1.000000e+00 : f32
    %606 = vector.broadcast %cst_159 : f32 to vector<8x128xf32>
    %607 = arith.addf %606, %605 : vector<8x128xf32>
    %608 = arith.divf %606, %607 : vector<8x128xf32>
    %609 = arith.mulf %600, %561 : vector<8x128xf32>
    %610 = arith.mulf %594, %602 : vector<8x128xf32>
    %611 = arith.addf %609, %610 : vector<8x128xf32>
    %612 = math.tanh %611 : vector<8x128xf32>
    %613 = arith.mulf %608, %612 : vector<8x128xf32>
    %cst_160 = arith.constant dense<0.000000e+00> : vector<8x8xf32>
    %614 = tpu.matmul %613, %18, %cst_160 {dimension_numbers = #tpu.dot_dimension_numbers<[1], [0], [0], [1], [0, 0, 1, 1], [], []>} : vector<8x128xf32>, vector<128x8xf32>, vector<8x8xf32> -> vector<8x8xf32>
    %615 = vector.broadcast %19 : vector<1x8xf32> to vector<8x8xf32>
    %616 = arith.addf %614, %615 : vector<8x8xf32>
    %617 = arith.index_cast %c6_i32_151 : i32 to index
    %c0_161 = arith.constant 0 : index
    %c0_162 = arith.constant 0 : index
    %618 = vector.load %arg11[%617, %c0_161, %c0_162] : memref<7x8x8xf32, #tpu.memory_space<vmem>>, vector<1x8x8xf32>
    %619 = vector.shape_cast %618 : vector<1x8x8xf32> to vector<8x8xf32>
    %620 = vector.shape_cast %616 : vector<8x8xf32> to vector<1x8x8xf32>
    tpu.vector_store %arg11[%617, %c0_161, %c0_162], %620 {strides = array<i32>} : memref<7x8x8xf32, #tpu.memory_space<vmem>>, vector<1x8x8xf32>,
    %c7_i32_163 = arith.constant 7 : i32
    return
  }
}

</mosaic_0001>

<bundles_post_ra>
// kernel: seq2seq_forward.1
= control target key start
LH: loop header
LB: loop body
LE: loop exit
PB: predicated region body
PF: predicated region fallthrough
CT: control target
= control target key end

     0   :  { %16 = vsyncpa [#allocation6], 0  ;;  %s8782_s0 = inlined_call_operand.vmem [shape: s32[7], index: 0, kind: input, shape index: {}]   ;;  %s8783_s1 = inlined_call_operand.vmem [shape: f32[64,8], index: 1, kind: input, shape index: {}]   ;;  %s8784_s2 = inlined_call_operand.vmem [shape: f32[56,8], index: 2, kind: input, shape index: {}]   ;;  %s8785_s3 = inlined_call_operand.vmem [shape: f32[8,512], index: 3, kind: input, shape index: {}]   ;;  %s8786_s4 = inlined_call_operand.vmem [shape: f32[128,512], index: 4, kind: input, shape index: {}]   ;;  %s8787_s5 = inlined_call_operand.vmem [shape: f32[1,512], index: 5, kind: input, shape index: {}]   ;;  %s8788_s6 = inlined_call_operand.vmem [shape: f32[8,512], index: 6, kind: input, shape index: {}]   ;;  %s8789_s7 = inlined_call_operand.hbm [shape: f32[128,512], index: 7, kind: input, shape index: {}]   ;;  %s8790_s8 = inlined_call_operand.vmem [shape: f32[1,512], index: 8, kind: input, shape index: {}]   ;;  %s8791_s9 = inlined_call_operand.vmem [shape: f32[128,8], index: 9, kind: input, shape index: {}]   ;;  %s8792_s10 = inlined_call_operand.vmem [shape: f32[1,8], index: 10, kind: input, shape index: {}]   ;;  %s8793_s11 = inlined_call_operand.vmem [shape: f32[7,8,8], index: 11, kind: output, shape index: {}]  }
   0x1   :  { %s24_s19 = sshll.u32 %s8782_s0, 4  ;;  %s25_s19 = int_to_ptr.vmem [resolvable:$true] %s24_s19 }
   0x2   :  { %17 = vsyncpa [#allocation5], 0  ;;  %s7009_s20 = scalar_lea.vmem %s25_s19, 16  ;;  %p7014_p1 = scmp.lt.s32.totalorder %s25_s19, %s25_s19 }
   0x3   :  { %p7010_p0 = scmp.ne.s32.totalorder %s25_s19, %s7009_s20  ;;  %p7015_p2 = scmp.lt.s32.totalorder %s7009_s20, %s7009_s20 }
   0x5   :  { %p7016_p3 = por %p7015_p2, %p7014_p1 }
   0x7   :  { %p7017_p4 = pnand %p7016_p3, %p7010_p0 }
   0x9   :  { %7020 = shalt.err (!%p7017_p4)
}
   0xa   :  { %s7047_s21 = smov [#allocation4]   ;;  %s7048_s22 = smov [#allocation7]  }
   0xb   :  { %27 = dma.vmem_to_smem %s25_s19, 16, %s7047_s21, [#allocation6]  }
   0xc   :  { %s45_s23 = sshll.u32 %s7048_s22, 4  ;;  %s7021_s26 = scalar_lea.hbm %s8789_s7, 8192  ;;  %s46_s23 = int_to_ptr.vmem [resolvable:$true] %s45_s23 }
   0xd   :  { %p7022_p5 = scmp.ne.s32.totalorder %s8789_s7, %s7021_s26  ;;  %p7025_p6 = scmp.lt.u32.totalorder %s7021_s26, %s8789_s7 }
   0xf   :  { %p7027_p7 = pnand %p7025_p6, %p7022_p5 }
  0x11   :  { %7030 = shalt.err (!%p7027_p7)
}
  0x12   :  { %s7031_s30 = scalar_lea.vmem %s46_s23, 8192  ;;  %p7036_p9 = scmp.lt.s32.totalorder %s46_s23, %s46_s23 }
  0x13   :  { %p7032_p8 = scmp.ne.s32.totalorder %s46_s23, %s7031_s30  ;;  %p7037_p10 = scmp.lt.s32.totalorder %s7031_s30, %s7031_s30 }
  0x15   :  { %p7038_p11 = por %p7037_p10, %p7036_p9 }
  0x17   :  { %p7039_p12 = pnand %p7038_p11, %p7032_p8 }
  0x19   :  { %7042 = shalt.err (!%p7039_p12)
}
  0x1a   :  { %s7049_s12 = smov 512   ;;  %s7050_s13 = smov 32  }
  0x1b   :  { %51 = dma.hbm_to_vmem [thread:$0]  %s8789_s7, 8192, %s46_s23, [#allocation5], %s7049_s12, %s7049_s12, %s7050_s13  }
  0x1c   :  { %7043 = dma.done.wait [#allocation6], 16  }
  0x1d   :  { %7044 = vsyncadd [#allocation6], 4294967280 }
  0x1e   :  { %7045 = dma.done.wait [#allocation5], 8192  }
  0x1f   :  { %7046 = vsyncadd [#allocation5], 4294959104 }
  0x20   :  { %64 = sfence }
  0x21   :  { %v74_v0 = vld [vmem:[%s8785_s3 + $0x8] sm:$0xff]  ;;  %v73_v1 = vld [vmem:[%s8785_s3] sm:$0xff]  ;;  %vm99_vm0 = vcmask 64512   ;;  %v76_v4 = vld [vmem:[%s8785_s3 + $0x18] sm:$0xff]  ;;  %v8794_v5 = vmov 0.0   ;;  %s2212_s14 = sld [smem:[#allocation4]] }
  0x22   :  { %124 = vmatprep.subr.mxu0 %v74_v0  ;;  %6691 = vmatprep.subr.mxu1 %v74_v0  ;;  %v65_v2 = vld [vmem:[%s8783_s1] sm:$0xff]  ;;  %v75_v6 = vld [vmem:[%s8785_s3 + $0x10] sm:$0xff]  ;;  %v66_v7 = vld [vmem:[%s8783_s1 + $0x8] sm:$0xff]  ;;  %vm7053_vm1 = vmmov 0   ;;  %s5157_s24 = sld [smem:[#allocation4 + $0x1]]  ;;  %s5164_s0 = sld [smem:[#allocation4 + $0x2]] }
  0x23   :  { %v7141_v3 = vld [vmem:[%s8783_s1 + $0x20] sm:$0xff]  ;;  %125 = vmatpush1.msra.mxu0 %v73_v1  ;;  %6692 = vmatpush1.msra.mxu1 %v73_v1  ;;  %v390_v8 = vld [vmem:[%s8788_s6 + $0x8] sm:$0xff]  ;;  %v392_v12 = vld [vmem:[%s8788_s6 + $0x18] sm:$0xff]  ;;  %s5178_s20 = sld [smem:[#allocation4 + $0x4]]  ;;  %s5185_s23 = sld [smem:[#allocation4 + $0x5]] }
  0x24   :  { %188 = vmatprep.mubr.f32.mxu0 %v8794_v5  ;;  %212 = vmatprep.mubr.f32.mxu1 %v8794_v5  ;;  %v679_v9 = vld [vmem:[%s8786_s4 + $0x8] sm:$0xff]  ;;  %v389_v13 = vld [vmem:[%s8788_s6] sm:$0xff]  ;;  %v67_v15 = vld [vmem:[%s8783_s1 + $0x10] sm:$0xff] }
  0x25   :  { %5099 = vmatmul.mubr.msk.f32.vlgmr.msra.gmra.mrb[0].mxu0 %vm99_vm0, %v65_v2  ;;  %5103 = vmatmul.mubr.msk.f32.vlgmr.msra.gmra.mrb[0].mxu1 %vm99_vm0, %v7141_v3  ;;  %v7167_v10 = vld [vmem:[%s8783_s1 + $0x28] sm:$0xff]  ;;  %v7192_v16 = vld [vmem:[%s8783_s1 + $0x30] sm:$0xff]  ;;  %v68_v17 = vld [vmem:[%s8783_s1 + $0x18] sm:$0xff] }
  0x26   :  { %237 = vmatprep.subr.mxu1 %v76_v4  ;;  %194 = vmatprep.mubr.f32.mxu0 %v8794_v5  ;;  %v683_v11 = vld [vmem:[%s8786_s4 + $0x28] sm:$0xff]  ;;  %v7206_v18 = vld [vmem:[%s8783_s1 + $0x38] sm:$0xff]  ;;  %v678_v19 = vld [vmem:[%s8786_s4] sm:$0xff] }
  0x27   :  { %238 = vmatpush1.msra.mxu1 %v75_v6  ;;  %218 = vmatprep.mubr.f32.mxu1 %v8794_v5  ;;  %v7179_v14 = vpack.c.bf16 %v683_v11, %v679_v9  ;;  %v682_v20 = vld [vmem:[%s8786_s4 + $0x20] sm:$0xff]  ;;  %v687_v21 = vld [vmem:[%s8786_s4 + $0x48] sm:$0xff]  ;;  %v391_v25 = vld [vmem:[%s8788_s6 + $0x10] sm:$0xff]  ;;  %s2213_s15 = scvt.s32.f32 %s2212_s14 }
  0x28   :  { %436 = vmatprep.subr.mxu0 %v390_v8  ;;  %543 = vmatprep.subr.mxu1 %v392_v12  ;;  %v691_v22 = vld [vmem:[%s8786_s4 + $0x68] sm:$0xff]  ;;  %v7228_v23 = vld [vmem:[%s8784_s2] sm:$0xff]  ;;  %v7230_v24 = vpack.c.bf16 %v682_v20, %v678_v19  ;;  %v681_v29 = vld [vmem:[%s8786_s4 + $0x18] sm:$0xff]  ;;  %s2645_s25 = scvt.s32.f32 %s5157_s24 }
  0x29   :  { %5100 = vmatmul.mubr.msk.f32.gmra.mrb[2].mxu0 %vm99_vm0, %v66_v7  ;;  %5104 = vmatmul.mubr.msk.f32.gmra.mrb[2].mxu1 %vm99_vm0, %v7167_v10  ;;  %v686_v26 = vld [vmem:[%s8786_s4 + $0x40] sm:$0xff]  ;;  %v7238_v27 = vpack.c.bf16 %v691_v22, %v687_v21  ;;  %v685_v30 = vld [vmem:[%s8786_s4 + $0x38] sm:$0xff]  ;;  %v695_v31 = vld [vmem:[%s8786_s4 + $0x88] sm:$0xff]  ;;  %s2391_s17 = ssub.f32 1.0, %s2213_s15  ;;  %s3863_s21 = scvt.s32.f32 %s5178_s20 }
  0x2a   :  { %200 = vmatprep.mubr.f32.mxu0 %v8794_v5  ;;  %224 = vmatprep.mubr.f32.mxu1 %v8794_v5  ;;  %v690_v28 = vld [vmem:[%s8786_s4 + $0x60] sm:$0xff]  ;;  %v699_v32 = vld [vmem:[%s8786_s4 + $0xa8] sm:$0xff]  ;;  %v7255_v33 = vpack.c.bf16 %v685_v30, %v681_v29  ;;  %v7296_v42 = vld [vmem:[%s8784_s2 + $0x10] sm:$0xff]  ;;  %s4269_s24 = scvt.s32.f32 %s5185_s23 }
  0x2b   :  { %437 = vmatpush1.msra.mxu0 %v389_v13  ;;  %v7261_v34 = vpack.c.bf16 %v690_v28, %v686_v26  ;;  %v7266_v35 = vld [vmem:[%s8784_s2 + $0x8] sm:$0xff]  ;;  %v7270_v36 = vpack.c.bf16 %v699_v32, %v695_v31  ;;  %v694_v37 = vld [vmem:[%s8786_s4 + $0x80] sm:$0xff]  ;;  %v7324_v49 = vld [vmem:[%s8784_s2 + $0x18] sm:$0xff] }
  0x2c   :  { %5564 = vmatprep.subr.bf16.mxu0 %v7179_v14  ;;  %v698_v38 = vld [vmem:[%s8786_s4 + $0xa0] sm:$0xff]  ;;  %v703_v39 = vld [vmem:[%s8786_s4 + $0xc8] sm:$0xff]  ;;  %v680_v12 = vld [vmem:[%s8786_s4 + $0x10] sm:$0xff] }
  0x2d   :  { %5101 = vmatmul.mubr.msk.f32.gmra.mrb[4].mxu0 %vm99_vm0, %v67_v15  ;;  %5105 = vmatmul.mubr.msk.f32.gmra.mrb[4].mxu1 %vm99_vm0, %v7192_v16  ;;  %v707_v40 = vld [vmem:[%s8786_s4 + $0xe8] sm:$0xff]  ;;  %v7291_v41 = vpack.c.bf16 %v698_v38, %v694_v37  ;;  %v702_v44 = vld [vmem:[%s8786_s4 + $0xc0] sm:$0xff]  ;;  %v684_v13 = vld [vmem:[%s8786_s4 + $0x30] sm:$0xff] }
  0x2e   :  { %206 = vmatprep.mubr.f32.mxu0 %v8794_v5  ;;  %230 = vmatprep.mubr.f32.mxu1 %v8794_v5  ;;  %v7300_v43 = vpack.c.bf16 %v707_v40, %v703_v39  ;;  %v706_v45 = vld [vmem:[%s8786_s4 + $0xe0] sm:$0xff]  ;;  %v711_v46 = vld [vmem:[%s8786_s4 + $0x108] sm:$0xff]  ;;  %v688_v20 = vld [vmem:[%s8786_s4 + $0x50] sm:$0xff] }
  0x2f   :  { %v715_v47 = vld [vmem:[%s8786_s4 + $0x128] sm:$0xff]  ;;  %v7319_v48 = vpack.c.bf16 %v706_v45, %v702_v44  ;;  %v710_v51 = vld [vmem:[%s8786_s4 + $0x100] sm:$0xff]  ;;  %v692_v21 = vld [vmem:[%s8786_s4 + $0x70] sm:$0xff] }
  0x30   :  { %v7328_v50 = vpack.c.bf16 %v715_v47, %v711_v46  ;;  %v714_v52 = vld [vmem:[%s8786_s4 + $0x120] sm:$0xff]  ;;  %v719_v53 = vld [vmem:[%s8786_s4 + $0x148] sm:$0xff]  ;;  %v701_v22 = vld [vmem:[%s8786_s4 + $0xb8] sm:$0xff] }
  0x31   :  { %5102 = vmatmul.mubr.msk.f32.gmra.mrb[6].mxu0 %vm99_vm0, %v68_v17  ;;  %5106 = vmatmul.mubr.msk.f32.gmra.mrb[6].mxu1 %vm99_vm0, %v7206_v18  ;;  %v723_v54 = vld [vmem:[%s8786_s4 + $0x168] sm:$0xff]  ;;  %v7347_v55 = vpack.c.bf16 %v714_v52, %v710_v51  ;;  %v7352_v56 = vld [vmem:[%s8784_s2 + $0x20] sm:$0xff]  ;;  %v696_v28 = vld [vmem:[%s8786_s4 + $0x90] sm:$0xff] }
  0x32   :  { %301 = vmatprep.mubr.f32.mxu1 %v8794_v5  ;;  %500 = vmatprep.mubr.f32.mxu0 %v8794_v5  ;;  %v7356_v57 = vpack.c.bf16 %v723_v54, %v719_v53  ;;  %v718_v58 = vld [vmem:[%s8786_s4 + $0x140] sm:$0xff]  ;;  %v727_v60 = vld [vmem:[%s8786_s4 + $0x188] sm:$0xff]  ;;  %v700_v29 = vld [vmem:[%s8786_s4 + $0xb0] sm:$0xff] }
  0x33   :  { %v722_v59 = vld [vmem:[%s8786_s4 + $0x160] sm:$0xff]  ;;  %v731_v61 = vld [vmem:[%s8786_s4 + $0x1a8] sm:$0xff]  ;;  %v709_v30 = vld [vmem:[%s8786_s4 + $0xf8] sm:$0xff]  ;;  %v7493_v31 = vpack.c.bf16 %v700_v29, %v696_v28 }
  0x34   :  { %v7376_v62 = vpack.c.bf16 %v722_v59, %v718_v58  ;;  %v7381_v63 = vld [vmem:[%s8784_s2 + $0x28] sm:$0xff]  ;;  %v7385_v0 = vpack.c.bf16 %v731_v61, %v727_v60  ;;  %v726_v1 = vld [vmem:[%s8786_s4 + $0x180] sm:$0xff]  ;;  %v704_v37 = vld [vmem:[%s8786_s4 + $0xd0] sm:$0xff] }
  0x35   :  { %5107 = vmatmul.mubr.msk.f32.vlgmr.msra.gmra.mrb[8].mxu1 %vm99_vm0, %v65_v2  ;;  %5115 = vmatmul.mubr.msk.f32.vlgmr.msra.gmra.mrb[8].mxu0 %vm99_vm0, %v7228_v23  ;;  %v730_v2 = vld [vmem:[%s8786_s4 + $0x1a0] sm:$0xff]  ;;  %v739_v4 = vld [vmem:[%s8786_s4 + $0x1e8] sm:$0xff]  ;;  %v708_v38 = vld [vmem:[%s8786_s4 + $0xf0] sm:$0xff] }
  0x36   :  { %5566 = vmatpush1.bf16.msra.mxu0 %v7230_v24  ;;  %544 = vmatpush1.msra.mxu1 %v391_v25  ;;  %v7405_v6 = vpack.c.bf16 %v730_v2, %v726_v1  ;;  %v734_v9 = vld [vmem:[%s8786_s4 + $0x1c0] sm:$0xff]  ;;  %v7469_v25 = vpack.c.bf16 %v692_v21, %v688_v20  ;;  %v717_v39 = vld [vmem:[%s8786_s4 + $0x138] sm:$0xff]  ;;  %v7516_v40 = vpack.c.bf16 %v708_v38, %v704_v37  ;;  %v712_v45 = vld [vmem:[%s8786_s4 + $0x110] sm:$0xff]  ;;  %v79_v20 = vlaneseq }
  0x37   :  { %307 = vmatprep.mubr.f32.mxu1 %v8794_v5  ;;  %5568 = vmatprep.subr.bf16.mxu0 %v7238_v27  ;;  %v716_v46 = vld [vmem:[%s8786_s4 + $0x130] sm:$0xff]  ;;  %v725_v47 = vld [vmem:[%s8786_s4 + $0x178] sm:$0xff]  ;;  %v393_v29 = vld [vmem:[%s8790_s8] sm:$0xf] }
  0x38   :  { %506 = vmatprep.mubr.f32.mxu0 %v8794_v5  ;;  %5596 = vmatprep.subr.bf16.mxu1 %v7255_v33  ;;  %v7539_v51 = vpack.c.bf16 %v716_v46, %v712_v45  ;;  %v720_v53 = vld [vmem:[%s8786_s4 + $0x150] sm:$0xff]  ;;  %v733_v58 = vld [vmem:[%s8786_s4 + $0x1b8] sm:$0xff] }
  0x39   :  { %5108 = vmatmul.mubr.msk.f32.gmra.mrb[10].mxu1 %vm99_vm0, %v66_v7  ;;  %5116 = vmatmul.mubr.msk.f32.gmra.mrb[10].mxu0 %vm99_vm0, %v7266_v35  ;;  %v7410_v7 = vld [vmem:[%s8784_s2 + $0x30] sm:$0xff]  ;;  %v741_v2 = vld [vmem:[%s8786_s4 + $0x1f8] sm:$0xff] }
  0x3a   :  { %5570 = vmatpush1.bf16.msra.mxu0 %v7261_v34  ;;  %313 = vmatprep.mubr.f32.mxu1 %v8794_v5  ;;  %v724_v54 = vld [vmem:[%s8786_s4 + $0x170] sm:$0xff] }
  0x3b   :  { %5572 = vmatprep.subr.bf16.mxu0 %v7270_v36  ;;  %512 = vmatprep.mubr.f32.mxu0 %v8794_v5  ;;  %v7562_v59 = vpack.c.bf16 %v724_v54, %v720_v53  ;;  %v728_v61 = vld [vmem:[%s8786_s4 + $0x190] sm:$0xff] }
  0x3c   :  { %v732_v1 = vld [vmem:[%s8786_s4 + $0x1b0] sm:$0xff] }
  0x3d   :  { %5109 = vmatmul.mubr.msk.f32.gmra.mrb[12].mxu1 %vm99_vm0, %v67_v15  ;;  %5117 = vmatmul.mubr.msk.f32.gmra.mrb[12].mxu0 %vm99_vm0, %v7296_v42  ;;  %v689_v15 = vld [vmem:[%s8786_s4 + $0x58] sm:$0xff] }
  0x3e   :  { %5574 = vmatpush1.bf16.msra.mxu0 %v7291_v41  ;;  %319 = vmatprep.mubr.f32.mxu1 %v8794_v5 }
  0x3f   :  { %5576 = vmatprep.subr.bf16.mxu0 %v7300_v43  ;;  %518 = vmatprep.mubr.f32.mxu0 %v8794_v5 }
  0x41   :  { %5110 = vmatmul.mubr.msk.f32.gmra.mrb[14].mxu1 %vm99_vm0, %v68_v17  ;;  %5118 = vmatmul.mubr.msk.f32.gmra.mrb[14].mxu0 %vm99_vm0, %v7324_v49  ;;  %v7448_v17 = vpack.c.bf16 %v684_v13, %v680_v12 }
  0x42   :  { %5578 = vmatpush1.bf16.msra.mxu0 %v7319_v48  ;;  %325 = vmatprep.mubr.f32.mxu1 %v8794_v5 }
  0x43   :  { %5580 = vmatprep.subr.bf16.mxu0 %v7328_v50  ;;  %524 = vmatprep.mubr.f32.mxu0 %v8794_v5 }
  0x45   :  { %5111 = vmatmul.mubr.msk.f32.gmra.mrb[16].mxu1 %vm99_vm0, %v7141_v3  ;;  %5119 = vmatmul.mubr.msk.f32.gmra.mrb[16].mxu0 %vm99_vm0, %v7352_v56  ;;  %v735_v3 = vld [vmem:[%s8786_s4 + $0x1c8] sm:$0xff] }
  0x46   :  { %5582 = vmatpush1.bf16.msra.mxu0 %v7347_v55  ;;  %331 = vmatprep.mubr.f32.mxu1 %v8794_v5  ;;  %v7414_v8 = vpack.c.bf16 %v739_v4, %v735_v3  ;;  %v7585_v3 = vpack.c.bf16 %v732_v1, %v728_v61 }
  0x47   :  { %5584 = vmatprep.subr.bf16.mxu0 %v7356_v57  ;;  %530 = vmatprep.mubr.f32.mxu0 %v8794_v5 }
  0x49   :  { %5112 = vmatmul.mubr.msk.f32.gmra.mrb[18].mxu1 %vm99_vm0, %v7167_v10  ;;  %5120 = vmatmul.mubr.msk.f32.gmra.mrb[18].mxu0 %vm99_vm0, %v7381_v63  ;;  %v738_v10 = vld [vmem:[%s8786_s4 + $0x1e0] sm:$0xff] }
  0x4a   :  { %5586 = vmatpush1.bf16.msra.mxu0 %v7376_v62  ;;  %337 = vmatprep.mubr.f32.mxu1 %v8794_v5  ;;  %v7428_v11 = vpack.c.bf16 %v738_v10, %v734_v9  ;;  %v736_v9 = vld [vmem:[%s8786_s4 + $0x1d0] sm:$0xff] }
  0x4b   :  { %5588 = vmatprep.subr.bf16.mxu0 %v7385_v0  ;;  %536 = vmatprep.mubr.f32.mxu0 %v8794_v5  ;;  %v740_v10 = vld [vmem:[%s8786_s4 + $0x1f0] sm:$0xff] }
  0x4d   :  { %5113 = vmatmul.mubr.msk.f32.gmra.mrb[20].mxu1 %vm99_vm0, %v7192_v16  ;;  %5121 = vmatmul.mubr.msk.f32.gmra.mrb[20].mxu0 %vm99_vm0, %v7410_v7  ;;  %v693_v16 = vld [vmem:[%s8786_s4 + $0x78] sm:$0xff] }
  0x4e   :  { %5590 = vmatpush1.bf16.msra.mxu0 %v7405_v6  ;;  %343 = vmatprep.mubr.f32.mxu1 %v8794_v5  ;;  %v7450_v19 = vpack.c.bf16 %v693_v16, %v689_v15 }
  0x4f   :  { %5592 = vmatprep.subr.bf16.mxu0 %v7414_v8  ;;  %899 = vmatprep.mubr.f32.mxu0 %v8794_v5 }
  0x51   :  { %5114 = vmatmul.mubr.msk.f32.gmra.mrb[22].mxu1 %vm99_vm0, %v7206_v18  ;;  %v697_v18 = vld [vmem:[%s8786_s4 + $0x98] sm:$0xff] }
  0x52   :  { %5594 = vmatpush1.bf16.msra.mxu0 %v7428_v11  ;;  %607 = vmatprep.mubr.f32.mxu1 %v8794_v5  ;;  %v7473_v26 = vpack.c.bf16 %v701_v22, %v697_v18  ;;  %v80_v22 = vshrl.u32 %v79_v20, 7 }
  0x53   :  { %5628 = vmatprep.subr.bf16.mxu0 %v7179_v14 }
  0x54   :  { %v7655_v38 = vsub.s32 1, %v80_v22 }
  0x55   :  { %900 = vmatmul.mubr.f32.vlgmr.msra.gmra.mrb[0].mxu0 %v8794_v5  ;;  %5122 = vmatmul.mubr.msk.f32.vlgmr.msra.gmra.mrb[24].mxu1 %vm99_vm0, %v7228_v23  ;;  %v705_v23 = vld [vmem:[%s8786_s4 + $0xd8] sm:$0xff] }
  0x56   :  { %5598 = vmatpush1.bf16.msra.mxu1 %v7448_v17  ;;  %613 = vmatprep.mubr.f32.mxu1 %v8794_v5  ;;  %v7497_v32 = vpack.c.bf16 %v709_v30, %v705_v23  ;;  %v7651_v30 = vsub.s32 0, %v80_v22  ;;  %8850 = vst [vmem:[#allocation12_spill] sm:$0xff] %v7655_v38 }
  0x57   :  { %5600 = vmatprep.subr.bf16.mxu1 %v7450_v19  ;;  %5630 = vmatpush1.bf16.msra.mxu0 %v7230_v24 }
  0x58   :  { %5632 = vmatprep.subr.bf16.mxu0 %v7238_v27  ;;  %1072 = vmatprep.mubr.f32.mxu0 %v8794_v5 }
  0x59   :  { %5123 = vmatmul.mubr.msk.f32.gmra.mrb[26].mxu1 %vm99_vm0, %v7266_v35  ;;  %v713_v35 = vld [vmem:[%s8786_s4 + $0x118] sm:$0xff] }
  0x5a   :  { %5602 = vmatpush1.bf16.msra.mxu1 %v7469_v25  ;;  %619 = vmatprep.mubr.f32.mxu1 %v8794_v5  ;;  %v7520_v44 = vpack.c.bf16 %v717_v39, %v713_v35  ;;  %v7658_v35 = vrot.slane %v393_v29, %v7651_v30  ;;  %v7661_v39 = vrot.slane %v393_v29, %v7655_v38 }
  0x5b   :  { %5604 = vmatprep.subr.bf16.mxu1 %v7473_v26  ;;  %5634 = vmatpush1.bf16.msra.mxu0 %v7261_v34 }
  0x5c   :  { %5636 = vmatprep.subr.bf16.mxu0 %v7270_v36  ;;  %8851 = vst [vmem:[#allocation13_spill] sm:$0xff] %v7658_v35  ;;  %8852 = vst [vmem:[#allocation14_spill] sm:$0xff] %v7661_v39 }
  0x5d   :  { %5124 = vmatmul.mubr.msk.f32.gmra.mrb[28].mxu1 %vm99_vm0, %v7296_v42  ;;  %v721_v42 = vld [vmem:[%s8786_s4 + $0x158] sm:$0xff] }
  0x5e   :  { %5606 = vmatpush1.bf16.msra.mxu1 %v7493_v31  ;;  %625 = vmatprep.mubr.f32.mxu1 %v8794_v5  ;;  %v7543_v52 = vpack.c.bf16 %v725_v47, %v721_v42 }
  0x5f   :  { %5608 = vmatprep.subr.bf16.mxu1 %v7497_v32  ;;  %5638 = vmatpush1.bf16.msra.mxu0 %v7291_v41 }
  0x60   :  { %5640 = vmatprep.subr.bf16.mxu0 %v7300_v43 }
  0x61   :  { %5125 = vmatmul.mubr.msk.f32.gmra.mrb[30].mxu1 %vm99_vm0, %v7324_v49  ;;  %v729_v49 = vld [vmem:[%s8786_s4 + $0x198] sm:$0xff] }
  0x62   :  { %5610 = vmatpush1.bf16.msra.mxu1 %v7516_v40  ;;  %631 = vmatprep.mubr.f32.mxu1 %v8794_v5  ;;  %v7566_v60 = vpack.c.bf16 %v733_v58, %v729_v49 }
  0x63   :  { %5612 = vmatprep.subr.bf16.mxu1 %v7520_v44  ;;  %5642 = vmatpush1.bf16.msra.mxu0 %v7319_v48 }
  0x64   :  { %5644 = vmatprep.subr.bf16.mxu0 %v7328_v50 }
  0x65   :  { %5126 = vmatmul.mubr.msk.f32.gmra.mrb[32].mxu1 %vm99_vm0, %v7352_v56  ;;  %v737_v56 = vld [vmem:[%s8786_s4 + $0x1d8] sm:$0xff]  ;;  %s2802_s4 = ssub.f32 1.0, %s2645_s25 }
  0x66   :  { %5614 = vmatpush1.bf16.msra.mxu1 %v7539_v51  ;;  %637 = vmatprep.mubr.f32.mxu1 %v8794_v5  ;;  %v7589_v4 = vpack.c.bf16 %v741_v2, %v737_v56 }
  0x67   :  { %5616 = vmatprep.subr.bf16.mxu1 %v7543_v52  ;;  %5646 = vmatpush1.bf16.msra.mxu0 %v7347_v55 }
  0x68   :  { %5648 = vmatprep.subr.bf16.mxu0 %v7356_v57 }
  0x69   :  { %5127 = vmatmul.mubr.msk.f32.gmra.mrb[34].mxu1 %vm99_vm0, %v7381_v63  ;;  %v7602_v63 = vpack.c.bf16 %v740_v10, %v736_v9 }
  0x6a   :  { %5618 = vmatpush1.bf16.msra.mxu1 %v7562_v59  ;;  %643 = vmatprep.mubr.f32.mxu1 %v8794_v5 }
  0x6b   :  { %5620 = vmatprep.subr.bf16.mxu1 %v7566_v60  ;;  %5650 = vmatpush1.bf16.msra.mxu0 %v7376_v62 }
  0x6c   :  { %5652 = vmatprep.subr.bf16.mxu0 %v7385_v0 }
  0x6d   :  { %5128 = vmatmul.mubr.msk.f32.gmra.mrb[36].mxu1 %vm99_vm0, %v7410_v7 }
  0x6e   :  { %5622 = vmatpush1.bf16.msra.mxu1 %v7585_v3  ;;  %970 = vmatprep.mubr.f32.mxu1 %v8794_v5 }
  0x6f   :  { %5624 = vmatprep.subr.bf16.mxu1 %v7589_v4  ;;  %5654 = vmatpush1.bf16.msra.mxu0 %v7405_v6 }
  0x70   :  { %5656 = vmatprep.subr.bf16.mxu0 %v7414_v8 }
  0x72   :  { %5626 = vmatpush1.bf16.msra.mxu1 %v7602_v63 }
  0x73   :  { %5660 = vmatprep.subr.bf16.mxu1 %v7255_v33  ;;  %5658 = vmatpush1.bf16.msra.mxu0 %v7428_v11 }
  0x74   :  { %5692 = vmatprep.subr.bf16.mxu0 %v7179_v14 }
  0x75   :  { %971 = vmatmul.mubr.f32.vlgmr.msra.gmra.mrb[8].mxu1 %v8794_v5 }
  0x76   :  { %5662 = vmatpush1.bf16.msra.mxu1 %v7448_v17  ;;  %1143 = vmatprep.mubr.f32.mxu1 %v8794_v5 }
  0x77   :  { %5664 = vmatprep.subr.bf16.mxu1 %v7450_v19 }
  0x7a   :  { %5666 = vmatpush1.bf16.msra.mxu1 %v7469_v25 }
  0x7b   :  { %5668 = vmatprep.subr.bf16.mxu1 %v7473_v26 }
  0x7e   :  { %5670 = vmatpush1.bf16.msra.mxu1 %v7493_v31 }
  0x7f   :  { %5672 = vmatprep.subr.bf16.mxu1 %v7497_v32 }
  0x82   :  { %5674 = vmatpush1.bf16.msra.mxu1 %v7516_v40 }
  0x83   :  { %5676 = vmatprep.subr.bf16.mxu1 %v7520_v44 }
  0x86   :  { %5678 = vmatpush1.bf16.msra.mxu1 %v7539_v51 }
  0x87   :  { %5680 = vmatprep.subr.bf16.mxu1 %v7543_v52 }
  0x8a   :  { %5682 = vmatpush1.bf16.msra.mxu1 %v7562_v59 }
  0x8b   :  { %5684 = vmatprep.subr.bf16.mxu1 %v7566_v60 }
  0x8e   :  { %5686 = vmatpush1.bf16.msra.mxu1 %v7585_v3 }
  0x8f   :  { %5688 = vmatprep.subr.bf16.mxu1 %v7589_v4 }
  0x92   :  { %5690 = vmatpush1.bf16.msra.mxu1 %v7602_v63 }
  0x93   :  { %5724 = vmatprep.subr.bf16.mxu1 %v7255_v33 }
  0xf8   :  { %v7630_v7 = vpop.f32.mrb[0].mxu1 }
  0xf9   :  { %v7632_v12 = vpop.f32.mrb[1].mxu1 }
  0xfc   :  { %v7634_v13 = vpop.f32.mrb[2].mxu1 }
  0xfd   :  { %v7636_v15 = vpop.f32.mrb[3].mxu1 }
 0x100   :  { %v7638_v16 = vpop.f32.mrb[4].mxu1 }
 0x101   :  { %v7640_v21 = vpop.f32.mrb[5].mxu1 }
 0x104   :  { %v7642_v18 = vpop.f32.mrb[6].mxu1 }
 0x105   :  { %v7644_v28 = vpop.f32.mrb[7].mxu1 }
 0x108   :  { %v7649_v23 = vpop.f32.mrb[8].mxu0 }
 0x109   :  { %8848 = vst [vmem:[#allocation10_spill] sm:$0xff] %v7649_v23  ;;  %v7653_v37 = vpop.f32.mrb[9].mxu0 }
 0x10a   :  { %8849 = vst [vmem:[#allocation11_spill] sm:$0xff] %v7653_v37 }
 0x10c   :  { %v508_v45 = vpop.f32.mrb[10].mxu0 }
 0x10d   :  { %v7664_v46 = vadd.f32 %v508_v45, %v7658_v35  ;;  %v510_v42 = vpop.f32.mrb[11].mxu0 }
 0x10e   :  { %v7667_v47 = vadd.f32 %v510_v42, %v7661_v39 }
 0x10f   :  { %8853 = vst [vmem:[#allocation15_spill] sm:$0xff] %v7664_v46 }
 0x110   :  { %8854 = vst [vmem:[#allocation16_spill] sm:$0xff] %v7667_v47  ;;  %v514_v53 = vpop.f32.mrb[12].mxu0 }
 0x111   :  { %v7670_v54 = vadd.f32 %v514_v53, %v7658_v35  ;;  %v516_v49 = vpop.f32.mrb[13].mxu0 }
 0x112   :  { %v7673_v58 = vadd.f32 %v516_v49, %v7661_v39 }
 0x113   :  { %8855 = vst [vmem:[#allocation17_spill] sm:$0xff] %v7670_v54 }
 0x114   :  { %8856 = vst [vmem:[#allocation18_spill] sm:$0xff] %v7673_v58  ;;  %v520_v61 = vpop.f32.mrb[14].mxu0 }
 0x115   :  { %v7676_v1 = vadd.f32 %v520_v61, %v7658_v35  ;;  %v522_v56 = vpop.f32.mrb[15].mxu0 }
 0x116   :  { %v7679_v2 = vadd.f32 %v522_v56, %v7661_v39 }
 0x117   :  { %8857 = vst [vmem:[#allocation19_spill] sm:$0xff] %v7676_v1  ;;  %v7703_v1 = vsub.s32 3, %v80_v22 }
 0x118   :  { %8858 = vst [vmem:[#allocation20_spill] sm:$0xff] %v7679_v2  ;;  %v526_v9 = vpop.f32.mrb[16].mxu0 }
 0x119   :  { %v7682_v10 = vadd.f32 %v526_v9, %v7658_v35  ;;  %v528_v20 = vpop.f32.mrb[17].mxu0  ;;  %8866 = vst [vmem:[#allocation28_spill] sm:$0xff] %v7703_v1 }
 0x11a   :  { %v7685_v45 = vadd.f32 %v528_v20, %v7661_v39 }
 0x11b   :  { %8859 = vst [vmem:[#allocation21_spill] sm:$0xff] %v7682_v10  ;;  %v7699_v10 = vsub.s32 2, %v80_v22 }
 0x11c   :  { %8860 = vst [vmem:[#allocation22_spill] sm:$0xff] %v7685_v45  ;;  %v532_v42 = vpop.f32.mrb[18].mxu0 }
 0x11d   :  { %v7688_v53 = vadd.f32 %v532_v42, %v7658_v35  ;;  %v534_v49 = vpop.f32.mrb[19].mxu0 }
 0x11e   :  { %v7691_v61 = vadd.f32 %v534_v49, %v7661_v39  ;;  %v77_v49 = vld [vmem:[%s8787_s5] sm:$0xf]  ;;  %s3051_s5 = scvt.s32.f32 %s5164_s0 }
 0x11f   :  { %8861 = vst [vmem:[#allocation23_spill] sm:$0xff] %v7688_v53  ;;  %v7720_v22 = vrot.slane %v77_v49, %v7655_v38  ;;  %v7726_v54 = vrot.slane %v77_v49, %v7651_v30 }
 0x120   :  { %8862 = vst [vmem:[#allocation24_spill] sm:$0xff] %v7691_v61  ;;  %v538_v5 = vpop.f32.mrb[20].mxu0  ;;  %s3208_s28 = ssub.f32 1.0, %s3051_s5 }
 0x121   :  { %v7694_v56 = vadd.f32 %v538_v5, %v7658_v35  ;;  %v540_v2 = vpop.f32.mrb[21].mxu0  ;;  %v7711_v5 = vrot.slane %v393_v29, %v7699_v10 }
 0x122   :  { %v7697_v9 = vadd.f32 %v540_v2, %v7661_v39  ;;  %v7714_v2 = vrot.slane %v393_v29, %v7703_v1 }
 0x123   :  { %8863 = vst [vmem:[#allocation25_spill] sm:$0xff] %v7694_v56  ;;  %8868 = vst [vmem:[#allocation30_spill] sm:$0xff] %v7711_v5 }
 0x124   :  { %8864 = vst [vmem:[#allocation26_spill] sm:$0xff] %v7697_v9  ;;  %8869 = vst [vmem:[#allocation31_spill] sm:$0xff] %v7714_v2 }
 0x128   :  { %v901_v20 = vpop.f32.mrb[0].mxu0  ;;  %v7701_v45 = vpop.f32.mrb[24].mxu1 }
 0x129   :  { %8865 = vst [vmem:[#allocation27_spill] sm:$0xff] %v7701_v45  ;;  %v903_v42 = vpop.f32.mrb[1].mxu0  ;;  %v7705_v53 = vpop.f32.mrb[25].mxu1  ;;  %v6693_v29 = vadd.f32 %v901_v20, %v7726_v54 }
 0x12a   :  { %8867 = vst [vmem:[#allocation29_spill] sm:$0xff] %v7705_v53  ;;  %v6694_v47 = vadd.f32 %v903_v42, %v7720_v22 }
 0x12b   :  { %v5129_v39 = vmul.f32 -1.442695, %v6693_v29 }
 0x12c   :  { %v615_v9 = vpop.f32.mrb[26].mxu1  ;;  %v5130_v45 = vmul.f32 -1.442695, %v6694_v47 }
 0x12d   :  { %v7717_v56 = vadd.f32 %v615_v9, %v7711_v5  ;;  %v617_v61 = vpop.f32.mrb[27].mxu1 }
 0x12e   :  { %v7723_v58 = vadd.f32 %v617_v61, %v7714_v2  ;;  %6764 = vpow2.f32 %v5130_v45 }
 0x12f   :  { %8870 = vst [vmem:[#allocation32_spill] sm:$0xff] %v7717_v56  ;;  %6766 = vpow2.f32 %v5129_v39 }
 0x130   :  { %8871 = vst [vmem:[#allocation33_spill] sm:$0xff] %v7723_v58  ;;  %v621_v46 = vpop.f32.mrb[28].mxu1 }
 0x131   :  { %v7731_v53 = vadd.f32 %v621_v46, %v7711_v5  ;;  %v623_v9 = vpop.f32.mrb[29].mxu1 }
 0x132   :  { %v7734_v56 = vadd.f32 %v623_v9, %v7714_v2 }
 0x133   :  { %8872 = vst [vmem:[#allocation34_spill] sm:$0xff] %v7731_v53 }
 0x134   :  { %8873 = vst [vmem:[#allocation35_spill] sm:$0xff] %v7734_v56  ;;  %v627_v37 = vpop.f32.mrb[30].mxu1 }
 0x135   :  { %v7737_v61 = vadd.f32 %v627_v37, %v7711_v5  ;;  %v629_v58 = vpop.f32.mrb[31].mxu1 }
 0x136   :  { %v7740_v38 = vadd.f32 %v629_v58, %v7714_v2 }
 0x137   :  { %8874 = vst [vmem:[#allocation36_spill] sm:$0xff] %v7737_v61 }
 0x138   :  { %8875 = vst [vmem:[#allocation37_spill] sm:$0xff] %v7740_v38  ;;  %v633_v42 = vpop.f32.mrb[32].mxu1  ;;  %v6765_v38 = vpop.eup %6764 }
 0x139   :  { %v7743_v46 = vadd.f32 %v633_v42, %v7711_v5  ;;  %v635_v20 = vpop.f32.mrb[33].mxu1 }
 0x13a   :  { %v7746_v9 = vadd.f32 %v635_v20, %v7714_v2  ;;  %v986_v20 = vadd.f32 1.0, %v6765_v38 }
 0x13b   :  { %8876 = vst [vmem:[#allocation38_spill] sm:$0xff] %v7743_v46  ;;  %v6767_v46 = vpop.eup %6766 }
 0x13c   :  { %8877 = vst [vmem:[#allocation39_spill] sm:$0xff] %v7746_v9  ;;  %v639_v47 = vpop.f32.mrb[34].mxu1  ;;  %v7761_v9 = vrot.slane %v77_v49, %v7699_v10  ;;  %6768 = vrcp.f32 %v986_v20 }
 0x13d   :  { %v7749_v29 = vadd.f32 %v639_v47, %v7711_v5  ;;  %v641_v37 = vpop.f32.mrb[35].mxu1  ;;  %v980_v47 = vadd.f32 1.0, %v6767_v46 }
 0x13e   :  { %v7752_v61 = vadd.f32 %v641_v37, %v7714_v2 }
 0x13f   :  { %8878 = vst [vmem:[#allocation40_spill] sm:$0xff] %v7749_v29  ;;  %v7764_v29 = vrot.slane %v77_v49, %v7703_v1  ;;  %6770 = vrcp.f32 %v980_v47 }
 0x140   :  { %8879 = vst [vmem:[#allocation41_spill] sm:$0xff] %v7752_v61  ;;  %v645_v58 = vpop.f32.mrb[36].mxu1 }
 0x141   :  { %v7755_v45 = vadd.f32 %v645_v58, %v7711_v5  ;;  %v647_v39 = vpop.f32.mrb[37].mxu1 }
 0x142   :  { %v7758_v42 = vadd.f32 %v647_v39, %v7714_v2 }
 0x143   :  { %8880 = vst [vmem:[#allocation42_spill] sm:$0xff] %v7755_v45 }
 0x144   :  { %8881 = vst [vmem:[#allocation43_spill] sm:$0xff] %v7758_v42 }
 0x146   :  { %v6769_v42 = vpop.eup %6768 }
 0x147   :  { %v996_v53 = vmul.f32 0.0, %v6769_v42 }
 0x148   :  { %v972_v37 = vpop.f32.mrb[8].mxu1 }
 0x149   :  { %v6717_v61 = vadd.f32 %v972_v37, %v7761_v9  ;;  %v974_v58 = vpop.f32.mrb[9].mxu1  ;;  %v6771_v38 = vpop.eup %6770 }
 0x14a   :  { %v6718_v45 = vadd.f32 %v974_v58, %v7764_v29 }
 0x14b   :  { %6772 = vtanh.f32 %v6717_v61 }
 0x14c   :  { %v5131_v39 = vmul.f32 -1.442695, %v6718_v45 }
 0x14e   :  { %6774 = vpow2.f32 %v5131_v39 }
 0x155   :  { %v6773_v56 = vpop.eup %6772 }
 0x156   :  { %v997_v2 = vmul.f32 %v6773_v56, %v6771_v38  ;;  %v8882_v56 = vmov 0.0  }
 0x158   :  { %v6775_v46 = vpop.eup %6774  ;;  %v7768_v5 = vadd.f32 %v997_v2, %v996_v53 }
 0x159   :  { %v993_v49 = vadd.f32 1.0, %v6775_v46 }
 0x15a   :  { %6776 = vtanh.f32 %v7768_v5 }
 0x15b   :  { %6778 = vrcp.f32 %v993_v49 }
 0x164   :  { %v6777_v20 = vpop.eup %6776 }
 0x165   :  { %v6779_v37 = vpop.eup %6778 }
 0x166   :  { %v1000_v47 = vmul.f32 %v6779_v37, %v6777_v20 }
 0x168   :  { %1073 = vmatmul.mubr.f32.vlgmr.msra.gmra.mrb[2].mxu0 %v1000_v47  ;;  %1144 = vmatmul.mubr.f32.vlgmr.msra.gmra.mrb[10].mxu1 %v1000_v47 }
 0x169   :  { %5694 = vmatpush1.bf16.msra.mxu0 %v7230_v24  ;;  %5726 = vmatpush1.bf16.msra.mxu1 %v7448_v17 }
 0x16a   :  { %5696 = vmatprep.subr.bf16.mxu0 %v7238_v27  ;;  %5728 = vmatprep.subr.bf16.mxu1 %v7450_v19 }
 0x16b   :  { %1245 = vmatprep.mubr.f32.mxu0 %v8882_v56  ;;  %1316 = vmatprep.mubr.f32.mxu1 %v8882_v56 }
 0x16d   :  { %5698 = vmatpush1.bf16.msra.mxu0 %v7261_v34  ;;  %5730 = vmatpush1.bf16.msra.mxu1 %v7469_v25 }
 0x16e   :  { %5700 = vmatprep.subr.bf16.mxu0 %v7270_v36  ;;  %5732 = vmatprep.subr.bf16.mxu1 %v7473_v26 }
 0x171   :  { %5702 = vmatpush1.bf16.msra.mxu0 %v7291_v41  ;;  %5734 = vmatpush1.bf16.msra.mxu1 %v7493_v31 }
 0x172   :  { %5704 = vmatprep.subr.bf16.mxu0 %v7300_v43  ;;  %5736 = vmatprep.subr.bf16.mxu1 %v7497_v32 }
 0x175   :  { %5706 = vmatpush1.bf16.msra.mxu0 %v7319_v48  ;;  %5738 = vmatpush1.bf16.msra.mxu1 %v7516_v40 }
 0x176   :  { %5708 = vmatprep.subr.bf16.mxu0 %v7328_v50  ;;  %5740 = vmatprep.subr.bf16.mxu1 %v7520_v44 }
 0x179   :  { %5710 = vmatpush1.bf16.msra.mxu0 %v7347_v55  ;;  %5742 = vmatpush1.bf16.msra.mxu1 %v7539_v51 }
 0x17a   :  { %5712 = vmatprep.subr.bf16.mxu0 %v7356_v57  ;;  %5744 = vmatprep.subr.bf16.mxu1 %v7543_v52 }
 0x17d   :  { %5714 = vmatpush1.bf16.msra.mxu0 %v7376_v62  ;;  %5746 = vmatpush1.bf16.msra.mxu1 %v7562_v59 }
 0x17e   :  { %5716 = vmatprep.subr.bf16.mxu0 %v7385_v0  ;;  %5748 = vmatprep.subr.bf16.mxu1 %v7566_v60 }
 0x181   :  { %5718 = vmatpush1.bf16.msra.mxu0 %v7405_v6  ;;  %5750 = vmatpush1.bf16.msra.mxu1 %v7585_v3 }
 0x182   :  { %5720 = vmatprep.subr.bf16.mxu0 %v7414_v8  ;;  %5752 = vmatprep.subr.bf16.mxu1 %v7589_v4 }
 0x185   :  { %5722 = vmatpush1.bf16.msra.mxu0 %v7428_v11  ;;  %5754 = vmatpush1.bf16.msra.mxu1 %v7602_v63 }
 0x186   :  { %5756 = vmatprep.subr.bf16.mxu0 %v7179_v14  ;;  %5788 = vmatprep.subr.bf16.mxu1 %v7255_v33 }
 0x23b   :  { %v1074_v53 = vpop.f32.mrb[2].mxu0  ;;  %v1145_v2 = vpop.f32.mrb[10].mxu1 }
 0x23c   :  { %v6695_v61 = vadd.f32 %v1074_v53, %v7726_v54  ;;  %v1076_v45 = vpop.f32.mrb[3].mxu0  ;;  %v1147_v42 = vpop.f32.mrb[11].mxu1  ;;  %v6719_v20 = vadd.f32 %v1145_v2, %v7761_v9 }
 0x23d   :  { %v6696_v58 = vadd.f32 %v1076_v45, %v7720_v22  ;;  %v6720_v46 = vadd.f32 %v1147_v42, %v7764_v29 }
 0x23e   :  { %v5132_v39 = vmul.f32 -1.442695, %v6695_v61 }
 0x23f   :  { %v5133_v38 = vmul.f32 -1.442695, %v6696_v58  ;;  %v5134_v49 = vmul.f32 -1.442695, %v6720_v46 }
 0x240   :  { %6780 = vpow2.f32 %v5132_v39 }
 0x241   :  { %6782 = vpow2.f32 %v5133_v38 }
 0x242   :  { %6784 = vpow2.f32 %v5134_v49 }
 0x243   :  { %6786 = vtanh.f32 %v6719_v20 }
 0x24a   :  { %v6781_v37 = vpop.eup %6780 }
 0x24b   :  { %v6783_v47 = vpop.eup %6782  ;;  %v1153_v1 = vadd.f32 1.0, %v6781_v37 }
 0x24c   :  { %v1159_v23 = vadd.f32 1.0, %v6783_v47  ;;  %v6785_v53 = vpop.eup %6784 }
 0x24d   :  { %6788 = vrcp.f32 %v1153_v1  ;;  %v6787_v35 = vpop.eup %6786  ;;  %v1166_v39 = vadd.f32 1.0, %v6785_v53 }
 0x24e   :  { %6790 = vrcp.f32 %v1159_v23 }
 0x24f   :  { %6792 = vrcp.f32 %v1166_v39 }
 0x257   :  { %v6789_v45 = vpop.eup %6788 }
 0x258   :  { %v6791_v61 = vpop.eup %6790  ;;  %v1170_v58 = vmul.f32 %v6789_v45, %v6787_v35 }
 0x259   :  { %v1169_v38 = vmul.f32 %v6791_v61, %v7768_v5  ;;  %v6793_v2 = vpop.eup %6792 }
 0x25b   :  { %v7810_v42 = vadd.f32 %v1170_v58, %v1169_v38 }
 0x25d   :  { %6794 = vtanh.f32 %v7810_v42 }
 0x267   :  { %v6795_v46 = vpop.eup %6794 }
 0x268   :  { %v1173_v49 = vmul.f32 %v6795_v46, %v6793_v2 }
 0x26a   :  { %1246 = vmatmul.mubr.f32.vlgmr.msra.gmra.mrb[4].mxu0 %v1173_v49  ;;  %1317 = vmatmul.mubr.f32.vlgmr.msra.gmra.mrb[12].mxu1 %v1173_v49 }
 0x26b   :  { %5758 = vmatpush1.bf16.msra.mxu0 %v7230_v24  ;;  %5790 = vmatpush1.bf16.msra.mxu1 %v7448_v17 }
 0x26c   :  { %5760 = vmatprep.subr.bf16.mxu0 %v7238_v27  ;;  %5792 = vmatprep.subr.bf16.mxu1 %v7450_v19 }
 0x26d   :  { %1418 = vmatprep.mubr.f32.mxu0 %v8882_v56  ;;  %1489 = vmatprep.mubr.f32.mxu1 %v8882_v56 }
 0x26f   :  { %5762 = vmatpush1.bf16.msra.mxu0 %v7261_v34  ;;  %5794 = vmatpush1.bf16.msra.mxu1 %v7469_v25 }
 0x270   :  { %5764 = vmatprep.subr.bf16.mxu0 %v7270_v36  ;;  %5796 = vmatprep.subr.bf16.mxu1 %v7473_v26 }
 0x273   :  { %5766 = vmatpush1.bf16.msra.mxu0 %v7291_v41  ;;  %5798 = vmatpush1.bf16.msra.mxu1 %v7493_v31 }
 0x274   :  { %5768 = vmatprep.subr.bf16.mxu0 %v7300_v43  ;;  %5800 = vmatprep.subr.bf16.mxu1 %v7497_v32 }
 0x277   :  { %5770 = vmatpush1.bf16.msra.mxu0 %v7319_v48  ;;  %5802 = vmatpush1.bf16.msra.mxu1 %v7516_v40 }
 0x278   :  { %5772 = vmatprep.subr.bf16.mxu0 %v7328_v50  ;;  %5804 = vmatprep.subr.bf16.mxu1 %v7520_v44 }
 0x27b   :  { %5774 = vmatpush1.bf16.msra.mxu0 %v7347_v55  ;;  %5806 = vmatpush1.bf16.msra.mxu1 %v7539_v51 }
 0x27c   :  { %5776 = vmatprep.subr.bf16.mxu0 %v7356_v57  ;;  %5808 = vmatprep.subr.bf16.mxu1 %v7543_v52 }
 0x27f   :  { %5778 = vmatpush1.bf16.msra.mxu0 %v7376_v62  ;;  %5810 = vmatpush1.bf16.msra.mxu1 %v7562_v59 }
 0x280   :  { %5780 = vmatprep.subr.bf16.mxu0 %v7385_v0  ;;  %5812 = vmatprep.subr.bf16.mxu1 %v7566_v60 }
 0x283   :  { %5782 = vmatpush1.bf16.msra.mxu0 %v7405_v6  ;;  %5814 = vmatpush1.bf16.msra.mxu1 %v7585_v3 }
 0x284   :  { %5784 = vmatprep.subr.bf16.mxu0 %v7414_v8  ;;  %5816 = vmatprep.subr.bf16.mxu1 %v7589_v4 }
 0x287   :  { %5786 = vmatpush1.bf16.msra.mxu0 %v7428_v11  ;;  %5818 = vmatpush1.bf16.msra.mxu1 %v7602_v63 }
 0x288   :  { %5820 = vmatprep.subr.bf16.mxu0 %v7179_v14  ;;  %5852 = vmatprep.subr.bf16.mxu1 %v7255_v33 }
 0x33d   :  { %v1247_v23 = vpop.f32.mrb[4].mxu0  ;;  %v1318_v35 = vpop.f32.mrb[12].mxu1 }
 0x33e   :  { %v6697_v1 = vadd.f32 %v1247_v23, %v7726_v54  ;;  %v1249_v5 = vpop.f32.mrb[5].mxu0  ;;  %v1320_v20 = vpop.f32.mrb[13].mxu1  ;;  %v6721_v58 = vadd.f32 %v1318_v35, %v7761_v9 }
 0x33f   :  { %v6698_v37 = vadd.f32 %v1249_v5, %v7720_v22  ;;  %v6722_v45 = vadd.f32 %v1320_v20, %v7764_v29 }
 0x340   :  { %v5135_v47 = vmul.f32 -1.442695, %v6697_v1 }
 0x341   :  { %v5136_v53 = vmul.f32 -1.442695, %v6698_v37  ;;  %v5137_v61 = vmul.f32 -1.442695, %v6722_v45 }
 0x342   :  { %6796 = vpow2.f32 %v5135_v47 }
 0x343   :  { %6798 = vpow2.f32 %v5136_v53 }
 0x344   :  { %6800 = vpow2.f32 %v5137_v61 }
 0x345   :  { %6802 = vtanh.f32 %v6721_v58 }
 0x34c   :  { %v6797_v39 = vpop.eup %6796 }
 0x34d   :  { %v6799_v38 = vpop.eup %6798  ;;  %v1326_v2 = vadd.f32 1.0, %v6797_v39 }
 0x34e   :  { %v1332_v46 = vadd.f32 1.0, %v6799_v38  ;;  %v6801_v49 = vpop.eup %6800 }
 0x34f   :  { %6804 = vrcp.f32 %v1326_v2  ;;  %v6803_v23 = vpop.eup %6802  ;;  %v1339_v47 = vadd.f32 1.0, %v6801_v49 }
 0x350   :  { %6806 = vrcp.f32 %v1332_v46 }
 0x351   :  { %6808 = vrcp.f32 %v1339_v47 }
 0x359   :  { %v6805_v5 = vpop.eup %6804 }
 0x35a   :  { %v6807_v1 = vpop.eup %6806  ;;  %v1343_v37 = vmul.f32 %v6805_v5, %v6803_v23 }
 0x35b   :  { %v1342_v53 = vmul.f32 %v6807_v1, %v7810_v42  ;;  %v6809_v35 = vpop.eup %6808 }
 0x35d   :  { %v7852_v20 = vadd.f32 %v1343_v37, %v1342_v53 }
 0x35f   :  { %6810 = vtanh.f32 %v7852_v20 }
 0x369   :  { %v6811_v45 = vpop.eup %6810 }
 0x36a   :  { %v1346_v61 = vmul.f32 %v6811_v45, %v6809_v35 }
 0x36c   :  { %1419 = vmatmul.mubr.f32.vlgmr.msra.gmra.mrb[6].mxu0 %v1346_v61  ;;  %1490 = vmatmul.mubr.f32.vlgmr.msra.gmra.mrb[14].mxu1 %v1346_v61 }
 0x36d   :  { %5822 = vmatpush1.bf16.msra.mxu0 %v7230_v24  ;;  %5854 = vmatpush1.bf16.msra.mxu1 %v7448_v17 }
 0x36e   :  { %5824 = vmatprep.subr.bf16.mxu0 %v7238_v27  ;;  %5856 = vmatprep.subr.bf16.mxu1 %v7450_v19 }
 0x36f   :  { %1591 = vmatprep.mubr.f32.mxu0 %v8882_v56  ;;  %1662 = vmatprep.mubr.f32.mxu1 %v8882_v56 }
 0x371   :  { %5826 = vmatpush1.bf16.msra.mxu0 %v7261_v34  ;;  %5858 = vmatpush1.bf16.msra.mxu1 %v7469_v25 }
 0x372   :  { %5828 = vmatprep.subr.bf16.mxu0 %v7270_v36  ;;  %5860 = vmatprep.subr.bf16.mxu1 %v7473_v26 }
 0x375   :  { %5830 = vmatpush1.bf16.msra.mxu0 %v7291_v41  ;;  %5862 = vmatpush1.bf16.msra.mxu1 %v7493_v31 }
 0x376   :  { %5832 = vmatprep.subr.bf16.mxu0 %v7300_v43  ;;  %5864 = vmatprep.subr.bf16.mxu1 %v7497_v32 }
 0x379   :  { %5834 = vmatpush1.bf16.msra.mxu0 %v7319_v48  ;;  %5866 = vmatpush1.bf16.msra.mxu1 %v7516_v40 }
 0x37a   :  { %5836 = vmatprep.subr.bf16.mxu0 %v7328_v50  ;;  %5868 = vmatprep.subr.bf16.mxu1 %v7520_v44 }
 0x37d   :  { %5838 = vmatpush1.bf16.msra.mxu0 %v7347_v55  ;;  %5870 = vmatpush1.bf16.msra.mxu1 %v7539_v51 }
 0x37e   :  { %5840 = vmatprep.subr.bf16.mxu0 %v7356_v57  ;;  %5872 = vmatprep.subr.bf16.mxu1 %v7543_v52 }
 0x381   :  { %5842 = vmatpush1.bf16.msra.mxu0 %v7376_v62  ;;  %5874 = vmatpush1.bf16.msra.mxu1 %v7562_v59 }
 0x382   :  { %5844 = vmatprep.subr.bf16.mxu0 %v7385_v0  ;;  %5876 = vmatprep.subr.bf16.mxu1 %v7566_v60 }
 0x385   :  { %5846 = vmatpush1.bf16.msra.mxu0 %v7405_v6  ;;  %5878 = vmatpush1.bf16.msra.mxu1 %v7585_v3 }
 0x386   :  { %5848 = vmatprep.subr.bf16.mxu0 %v7414_v8  ;;  %5880 = vmatprep.subr.bf16.mxu1 %v7589_v4 }
 0x389   :  { %5850 = vmatpush1.bf16.msra.mxu0 %v7428_v11  ;;  %5882 = vmatpush1.bf16.msra.mxu1 %v7602_v63 }
 0x38a   :  { %5884 = vmatprep.subr.bf16.mxu0 %v7179_v14  ;;  %5916 = vmatprep.subr.bf16.mxu1 %v7255_v33 }
 0x43f   :  { %v1420_v42 = vpop.f32.mrb[6].mxu0  ;;  %v1491_v58 = vpop.f32.mrb[14].mxu1 }
 0x440   :  { %v6699_v39 = vadd.f32 %v1420_v42, %v7726_v54  ;;  %v1422_v38 = vpop.f32.mrb[7].mxu0  ;;  %v1493_v2 = vpop.f32.mrb[15].mxu1  ;;  %v6723_v37 = vadd.f32 %v1491_v58, %v7761_v9 }
 0x441   :  { %v6700_v46 = vadd.f32 %v1422_v38, %v7720_v22  ;;  %v6724_v5 = vadd.f32 %v1493_v2, %v7764_v29 }
 0x442   :  { %v5138_v49 = vmul.f32 -1.442695, %v6699_v39 }
 0x443   :  { %v5139_v23 = vmul.f32 -1.442695, %v6700_v46  ;;  %v5140_v1 = vmul.f32 -1.442695, %v6724_v5 }
 0x444   :  { %6812 = vpow2.f32 %v5138_v49 }
 0x445   :  { %6814 = vpow2.f32 %v5139_v23 }
 0x446   :  { %6816 = vpow2.f32 %v5140_v1 }
 0x447   :  { %6818 = vtanh.f32 %v6723_v37  ;;  %v217_v37 = vadd.f32 %v7632_v12, %v7720_v22 }
 0x44e   :  { %v6813_v47 = vpop.eup %6812 }
 0x44f   :  { %v6815_v53 = vpop.eup %6814  ;;  %v1499_v35 = vadd.f32 1.0, %v6813_v47 }
 0x450   :  { %v1505_v45 = vadd.f32 1.0, %v6815_v53  ;;  %v6817_v61 = vpop.eup %6816 }
 0x451   :  { %6820 = vrcp.f32 %v1499_v35  ;;  %v6819_v42 = vpop.eup %6818  ;;  %v1512_v49 = vadd.f32 1.0, %v6817_v61 }
 0x452   :  { %6822 = vrcp.f32 %v1505_v45 }
 0x453   :  { %6824 = vrcp.f32 %v1512_v49 }
 0x45b   :  { %v6821_v38 = vpop.eup %6820 }
 0x45c   :  { %v6823_v39 = vpop.eup %6822  ;;  %v1516_v46 = vmul.f32 %v6821_v38, %v6819_v42 }
 0x45d   :  { %v1515_v23 = vmul.f32 %v6823_v39, %v7852_v20  ;;  %v6825_v58 = vpop.eup %6824  ;;  %v215_v20 = vadd.f32 %v7630_v7, %v7726_v54 }
 0x45f   :  { %v7894_v2 = vadd.f32 %v1516_v46, %v1515_v23 }
 0x461   :  { %6826 = vtanh.f32 %v7894_v2 }
 0x46b   :  { %v6827_v5 = vpop.eup %6826 }
 0x46c   :  { %v1519_v1 = vmul.f32 %v6827_v5, %v6825_v58 }
 0x46e   :  { %1592 = vmatmul.mubr.f32.vlgmr.msra.gmra.mrb[22].mxu0 %v1519_v1  ;;  %1663 = vmatmul.mubr.f32.vlgmr.msra.gmra.mrb[16].mxu1 %v1519_v1 }
 0x46f   :  { %5886 = vmatpush1.bf16.msra.mxu0 %v7230_v24  ;;  %5918 = vmatpush1.bf16.msra.mxu1 %v7448_v17 }
 0x470   :  { %5888 = vmatprep.subr.bf16.mxu0 %v7238_v27  ;;  %5920 = vmatprep.subr.bf16.mxu1 %v7450_v19 }
 0x471   :  { %1764 = vmatprep.mubr.f32.mxu0 %v8882_v56  ;;  %1835 = vmatprep.mubr.f32.mxu1 %v8882_v56 }
 0x473   :  { %5890 = vmatpush1.bf16.msra.mxu0 %v7261_v34  ;;  %5922 = vmatpush1.bf16.msra.mxu1 %v7469_v25 }
 0x474   :  { %5892 = vmatprep.subr.bf16.mxu0 %v7270_v36  ;;  %5924 = vmatprep.subr.bf16.mxu1 %v7473_v26 }
 0x477   :  { %5894 = vmatpush1.bf16.msra.mxu0 %v7291_v41  ;;  %5926 = vmatpush1.bf16.msra.mxu1 %v7493_v31 }
 0x478   :  { %5896 = vmatprep.subr.bf16.mxu0 %v7300_v43  ;;  %5928 = vmatprep.subr.bf16.mxu1 %v7497_v32 }
 0x47b   :  { %5898 = vmatpush1.bf16.msra.mxu0 %v7319_v48  ;;  %5930 = vmatpush1.bf16.msra.mxu1 %v7516_v40 }
 0x47c   :  { %5900 = vmatprep.subr.bf16.mxu0 %v7328_v50  ;;  %5932 = vmatprep.subr.bf16.mxu1 %v7520_v44 }
 0x47f   :  { %5902 = vmatpush1.bf16.msra.mxu0 %v7347_v55  ;;  %5934 = vmatpush1.bf16.msra.mxu1 %v7539_v51 }
 0x480   :  { %5904 = vmatprep.subr.bf16.mxu0 %v7356_v57  ;;  %5936 = vmatprep.subr.bf16.mxu1 %v7543_v52 }
 0x483   :  { %5906 = vmatpush1.bf16.msra.mxu0 %v7376_v62  ;;  %5938 = vmatpush1.bf16.msra.mxu1 %v7562_v59 }
 0x484   :  { %5908 = vmatprep.subr.bf16.mxu0 %v7385_v0  ;;  %5940 = vmatprep.subr.bf16.mxu1 %v7566_v60 }
 0x487   :  { %5910 = vmatpush1.bf16.msra.mxu0 %v7405_v6  ;;  %5942 = vmatpush1.bf16.msra.mxu1 %v7585_v3 }
 0x488   :  { %5912 = vmatprep.subr.bf16.mxu0 %v7414_v8  ;;  %5944 = vmatprep.subr.bf16.mxu1 %v7589_v4 }
 0x48b   :  { %5914 = vmatpush1.bf16.msra.mxu0 %v7428_v11  ;;  %5946 = vmatpush1.bf16.msra.mxu1 %v7602_v63 }
 0x48c   :  { %5948 = vmatprep.subr.bf16.mxu0 %v7179_v14  ;;  %5980 = vmatprep.subr.bf16.mxu1 %v7255_v33 }
 0x541   :  { %v1593_v47 = vpop.f32.mrb[22].mxu0  ;;  %v1664_v53 = vpop.f32.mrb[16].mxu1 }
 0x542   :  { %v1594_v35 = vadd.f32 %v1593_v47, %v215_v20  ;;  %v1595_v45 = vpop.f32.mrb[23].mxu0  ;;  %v1666_v61 = vpop.f32.mrb[17].mxu1  ;;  %v6725_v23 = vadd.f32 %v1664_v53, %v7761_v9 }
 0x543   :  { %v1596_v42 = vadd.f32 %v1595_v45, %v217_v37  ;;  %v6726_v46 = vadd.f32 %v1666_v61, %v7764_v29 }
 0x544   :  { %v5141_v38 = vmul.f32 -1.442695, %v1594_v35 }
 0x545   :  { %v5142_v39 = vmul.f32 -1.442695, %v1596_v42  ;;  %v5143_v49 = vmul.f32 -1.442695, %v6726_v46  ;;  %v223_v46 = vadd.f32 %v7636_v15, %v7720_v22 }
 0x546   :  { %6828 = vpow2.f32 %v5141_v38 }
 0x547   :  { %6830 = vpow2.f32 %v5142_v39 }
 0x548   :  { %6832 = vpow2.f32 %v5143_v49 }
 0x549   :  { %6834 = vtanh.f32 %v6725_v23 }
 0x550   :  { %v6829_v58 = vpop.eup %6828 }
 0x551   :  { %v6831_v7 = vpop.eup %6830  ;;  %v1672_v5 = vadd.f32 1.0, %v6829_v58 }
 0x552   :  { %v1678_v12 = vadd.f32 1.0, %v6831_v7  ;;  %v6833_v1 = vpop.eup %6832 }
 0x553   :  { %6836 = vrcp.f32 %v1672_v5  ;;  %v6835_v20 = vpop.eup %6834  ;;  %v1685_v45 = vadd.f32 1.0, %v6833_v1 }
 0x554   :  { %6838 = vrcp.f32 %v1678_v12 }
 0x555   :  { %6840 = vrcp.f32 %v1685_v45 }
 0x55d   :  { %v6837_v37 = vpop.eup %6836 }
 0x55e   :  { %v6839_v47 = vpop.eup %6838  ;;  %v1689_v35 = vmul.f32 %v6837_v37, %v6835_v20 }
 0x55f   :  { %v1688_v42 = vmul.f32 %v6839_v47, %v7894_v2  ;;  %v6841_v53 = vpop.eup %6840  ;;  %v221_v2 = vadd.f32 %v7634_v13, %v7726_v54 }
 0x561   :  { %v7938_v61 = vadd.f32 %v1689_v35, %v1688_v42 }
 0x563   :  { %6842 = vtanh.f32 %v7938_v61 }
 0x56d   :  { %v6843_v38 = vpop.eup %6842 }
 0x56e   :  { %v1692_v39 = vmul.f32 %v6843_v38, %v6841_v53 }
 0x570   :  { %1765 = vmatmul.mubr.f32.vlgmr.msra.gmra.mrb[24].mxu0 %v1692_v39  ;;  %1836 = vmatmul.mubr.f32.vlgmr.msra.gmra.mrb[18].mxu1 %v1692_v39 }
 0x571   :  { %5950 = vmatpush1.bf16.msra.mxu0 %v7230_v24  ;;  %5982 = vmatpush1.bf16.msra.mxu1 %v7448_v17 }
 0x572   :  { %5952 = vmatprep.subr.bf16.mxu0 %v7238_v27  ;;  %5984 = vmatprep.subr.bf16.mxu1 %v7450_v19 }
 0x573   :  { %1937 = vmatprep.mubr.f32.mxu0 %v8882_v56  ;;  %2008 = vmatprep.mubr.f32.mxu1 %v8882_v56 }
 0x575   :  { %5954 = vmatpush1.bf16.msra.mxu0 %v7261_v34  ;;  %5986 = vmatpush1.bf16.msra.mxu1 %v7469_v25 }
 0x576   :  { %5956 = vmatprep.subr.bf16.mxu0 %v7270_v36  ;;  %5988 = vmatprep.subr.bf16.mxu1 %v7473_v26 }
 0x579   :  { %5958 = vmatpush1.bf16.msra.mxu0 %v7291_v41  ;;  %5990 = vmatpush1.bf16.msra.mxu1 %v7493_v31 }
 0x57a   :  { %5960 = vmatprep.subr.bf16.mxu0 %v7300_v43  ;;  %5992 = vmatprep.subr.bf16.mxu1 %v7497_v32 }
 0x57d   :  { %5962 = vmatpush1.bf16.msra.mxu0 %v7319_v48  ;;  %5994 = vmatpush1.bf16.msra.mxu1 %v7516_v40 }
 0x57e   :  { %5964 = vmatprep.subr.bf16.mxu0 %v7328_v50  ;;  %5996 = vmatprep.subr.bf16.mxu1 %v7520_v44 }
 0x581   :  { %5966 = vmatpush1.bf16.msra.mxu0 %v7347_v55  ;;  %5998 = vmatpush1.bf16.msra.mxu1 %v7539_v51 }
 0x582   :  { %5968 = vmatprep.subr.bf16.mxu0 %v7356_v57  ;;  %6000 = vmatprep.subr.bf16.mxu1 %v7543_v52 }
 0x585   :  { %5970 = vmatpush1.bf16.msra.mxu0 %v7376_v62  ;;  %6002 = vmatpush1.bf16.msra.mxu1 %v7562_v59 }
 0x586   :  { %5972 = vmatprep.subr.bf16.mxu0 %v7385_v0  ;;  %6004 = vmatprep.subr.bf16.mxu1 %v7566_v60 }
 0x589   :  { %5974 = vmatpush1.bf16.msra.mxu0 %v7405_v6  ;;  %6006 = vmatpush1.bf16.msra.mxu1 %v7585_v3 }
 0x58a   :  { %5976 = vmatprep.subr.bf16.mxu0 %v7414_v8  ;;  %6008 = vmatprep.subr.bf16.mxu1 %v7589_v4 }
 0x58d   :  { %5978 = vmatpush1.bf16.msra.mxu0 %v7428_v11  ;;  %6010 = vmatpush1.bf16.msra.mxu1 %v7602_v63 }
 0x58e   :  { %6012 = vmatprep.subr.bf16.mxu0 %v7179_v14  ;;  %6044 = vmatprep.subr.bf16.mxu1 %v7255_v33 }
 0x643   :  { %v1766_v49 = vpop.f32.mrb[24].mxu0  ;;  %v1837_v23 = vpop.f32.mrb[18].mxu1 }
 0x644   :  { %v1767_v58 = vadd.f32 %v1766_v49, %v221_v2  ;;  %v1768_v7 = vpop.f32.mrb[25].mxu0  ;;  %v1839_v5 = vpop.f32.mrb[19].mxu1  ;;  %v6727_v33 = vadd.f32 %v1837_v23, %v7761_v9 }
 0x645   :  { %v1769_v12 = vadd.f32 %v1768_v7, %v223_v46  ;;  %v6728_v14 = vadd.f32 %v1839_v5, %v7764_v29  ;;  %v747_v5 = vld [vmem:[#allocation7 + $0x28] sm:$0xff] }
 0x646   :  { %v5144_v1 = vmul.f32 -1.442695, %v1767_v58 }
 0x647   :  { %v5145_v20 = vmul.f32 -1.442695, %v1769_v12  ;;  %v5146_v37 = vmul.f32 -1.442695, %v6728_v14  ;;  %v745_v12 = vld [vmem:[#allocation7 + $0x18] sm:$0xff]  ;;  %v742_v14 = vld [vmem:[#allocation7] sm:$0xff] }
 0x648   :  { %6844 = vpow2.f32 %v5144_v1 }
 0x649   :  { %6846 = vpow2.f32 %v5145_v20  ;;  %v749_v20 = vld [vmem:[#allocation7 + $0x38] sm:$0xff] }
 0x64a   :  { %6848 = vpow2.f32 %v5146_v37  ;;  %v746_v37 = vld [vmem:[#allocation7 + $0x20] sm:$0xff] }
 0x64b   :  { %6850 = vtanh.f32 %v6727_v33  ;;  %v8059_v33 = vpack.c.bf16 %v749_v20, %v745_v12  ;;  %v781_v12 = vld [vmem:[#allocation7 + $0x138] sm:$0xff]  ;;  %v774_v20 = vld [vmem:[#allocation7 + $0x100] sm:$0xff] }
 0x64d   :  { %8883 = vst [vmem:[#allocation44_spill] sm:$0xff] %v8059_v33 }
 0x652   :  { %v6845_v47 = vpop.eup %6844 }
 0x653   :  { %v6847_v13 = vpop.eup %6846  ;;  %v1845_v35 = vadd.f32 1.0, %v6845_v47  ;;  %v8061_v47 = vpack.c.bf16 %v746_v37, %v742_v14  ;;  %v778_v14 = vld [vmem:[#allocation7 + $0x120] sm:$0xff] }
 0x654   :  { %v1851_v15 = vadd.f32 1.0, %v6847_v13  ;;  %v6849_v45 = vpop.eup %6848  ;;  %v744_v13 = vld [vmem:[#allocation7 + $0x10] sm:$0xff] }
 0x655   :  { %6852 = vrcp.f32 %v1845_v35  ;;  %v6851_v42 = vpop.eup %6850  ;;  %v1858_v2 = vadd.f32 1.0, %v6849_v45  ;;  %v748_v35 = vld [vmem:[#allocation7 + $0x30] sm:$0xff]  ;;  %v751_v45 = vld [vmem:[#allocation7 + $0x48] sm:$0xff] }
 0x656   :  { %6854 = vrcp.f32 %v1851_v15  ;;  %v8064_v15 = vpack.c.bf16 %v748_v35, %v744_v13  ;;  %v8109_v13 = vpack.c.bf16 %v778_v14, %v774_v20  ;;  %v776_v35 = vld [vmem:[#allocation7 + $0x110] sm:$0xff]  ;;  %v801_v14 = vld [vmem:[#allocation7 + $0x1d8] sm:$0xff] }
 0x657   :  { %6856 = vrcp.f32 %v1858_v2  ;;  %v750_v2 = vld [vmem:[#allocation7 + $0x40] sm:$0xff] }
 0x65f   :  { %v6853_v53 = vpop.eup %6852 }
 0x660   :  { %v6855_v38 = vpop.eup %6854  ;;  %v1862_v39 = vmul.f32 %v6853_v53, %v6851_v42  ;;  %v755_v42 = vld [vmem:[#allocation7 + $0x68] sm:$0xff]  ;;  %v753_v53 = vld [vmem:[#allocation7 + $0x58] sm:$0xff] }
 0x661   :  { %v1861_v46 = vmul.f32 %v6855_v38, %v7938_v61  ;;  %v6857_v23 = vpop.eup %6856  ;;  %v743_v61 = vld [vmem:[#allocation7 + $0x8] sm:$0xff]  ;;  %v8069_v38 = vpack.c.bf16 %v755_v42, %v751_v45  ;;  %v780_v45 = vld [vmem:[#allocation7 + $0x130] sm:$0xff] }
 0x662   :  { %v8057_v1 = vpack.c.bf16 %v747_v5, %v743_v61  ;;  %v777_v61 = vld [vmem:[#allocation7 + $0x118] sm:$0xff]  ;;  %v8112_v42 = vpack.c.bf16 %v780_v45, %v776_v35  ;;  %v798_v45 = vld [vmem:[#allocation7 + $0x1c0] sm:$0xff] }
 0x663   :  { %v7982_v49 = vadd.f32 %v1862_v39, %v1861_v46  ;;  %v757_v39 = vld [vmem:[#allocation7 + $0x78] sm:$0xff]  ;;  %v754_v46 = vld [vmem:[#allocation7 + $0x60] sm:$0xff]  ;;  %v8107_v37 = vpack.c.bf16 %v781_v12, %v777_v61  ;;  %v803_v61 = vld [vmem:[#allocation7 + $0x1e8] sm:$0xff] }
 0x664   :  { %v805_v35 = vld [vmem:[#allocation7 + $0x1f8] sm:$0xff] }
 0x665   :  { %6858 = vtanh.f32 %v7982_v49 }
 0x66f   :  { %v6859_v58 = vpop.eup %6858 }
 0x670   :  { %v1865_v7 = vmul.f32 %v6859_v58, %v6857_v23  ;;  %v8073_v23 = vpack.c.bf16 %v754_v46, %v750_v2  ;;  %v752_v58 = vld [vmem:[#allocation7 + $0x50] sm:$0xff]  ;;  %v785_v2 = vld [vmem:[#allocation7 + $0x158] sm:$0xff] }
 0x672   :  { %1938 = vmatmul.mubr.f32.vlgmr.msra.gmra.mrb[26].mxu0 %v1865_v7  ;;  %2009 = vmatmul.mubr.f32.vlgmr.msra.gmra.mrb[20].mxu1 %v1865_v7  ;;  %v756_v7 = vld [vmem:[#allocation7 + $0x70] sm:$0xff] }
 0x673   :  { %6014 = vmatpush1.bf16.msra.mxu0 %v7230_v24  ;;  %6046 = vmatpush1.bf16.msra.mxu1 %v7448_v17  ;;  %v8020_v24 = vld [vmem:[%s8788_s6 + $0x8] sm:$0xff] }
 0x674   :  { %6016 = vmatprep.subr.bf16.mxu0 %v7238_v27  ;;  %6048 = vmatprep.subr.bf16.mxu1 %v7450_v19  ;;  %v8025_v27 = vld [vmem:[%s8788_s6 + $0x18] sm:$0xff] }
 0x675   :  { %2110 = vmatprep.mubr.f32.mxu0 %v8882_v56  ;;  %2181 = vmatprep.mubr.f32.mxu1 %v8882_v56 }
 0x677   :  { %6018 = vmatpush1.bf16.msra.mxu0 %v7261_v34  ;;  %6050 = vmatpush1.bf16.msra.mxu1 %v7469_v25  ;;  %v227_v34 = vadd.f32 %v7638_v16, %v7726_v54  ;;  %v8042_v16 = vld [vmem:[%s8788_s6] sm:$0xff] }
 0x678   :  { %6020 = vmatprep.subr.bf16.mxu0 %v7270_v36  ;;  %6052 = vmatprep.subr.bf16.mxu1 %v7473_v26  ;;  %v229_v36 = vadd.f32 %v7640_v21, %v7720_v22  ;;  %v8047_v21 = vld [vmem:[%s8788_s6 + $0x10] sm:$0xff] }
 0x67b   :  { %6022 = vmatpush1.bf16.msra.mxu0 %v7291_v41  ;;  %6054 = vmatpush1.bf16.msra.mxu1 %v7493_v31 }
 0x67c   :  { %6024 = vmatprep.subr.bf16.mxu0 %v7300_v43  ;;  %6056 = vmatprep.subr.bf16.mxu1 %v7497_v32 }
 0x67f   :  { %6026 = vmatpush1.bf16.msra.mxu0 %v7319_v48  ;;  %6058 = vmatpush1.bf16.msra.mxu1 %v7516_v40 }
 0x680   :  { %6028 = vmatprep.subr.bf16.mxu0 %v7328_v50  ;;  %6060 = vmatprep.subr.bf16.mxu1 %v7520_v44 }
 0x683   :  { %6030 = vmatpush1.bf16.msra.mxu0 %v7347_v55  ;;  %6062 = vmatpush1.bf16.msra.mxu1 %v7539_v51 }
 0x684   :  { %6032 = vmatprep.subr.bf16.mxu0 %v7356_v57  ;;  %6064 = vmatprep.subr.bf16.mxu1 %v7543_v52 }
 0x687   :  { %6034 = vmatpush1.bf16.msra.mxu0 %v7376_v62  ;;  %6066 = vmatpush1.bf16.msra.mxu1 %v7562_v59 }
 0x688   :  { %6036 = vmatprep.subr.bf16.mxu0 %v7385_v0  ;;  %6068 = vmatprep.subr.bf16.mxu1 %v7566_v60 }
 0x68b   :  { %6038 = vmatpush1.bf16.msra.mxu0 %v7405_v6  ;;  %6070 = vmatpush1.bf16.msra.mxu1 %v7585_v3 }
 0x68c   :  { %6040 = vmatprep.subr.bf16.mxu0 %v7414_v8  ;;  %6072 = vmatprep.subr.bf16.mxu1 %v7589_v4 }
 0x68f   :  { %6042 = vmatpush1.bf16.msra.mxu0 %v7428_v11  ;;  %6074 = vmatpush1.bf16.msra.mxu1 %v7602_v63 }
 0x690   :  { %2238 = vmatprep.subr.mxu0 %v8020_v24  ;;  %2309 = vmatprep.subr.mxu1 %v8025_v27 }
 0x745   :  { %v1939_v41 = vpop.f32.mrb[26].mxu0  ;;  %v2010_v43 = vpop.f32.mrb[20].mxu1 }
 0x746   :  { %v1940_v48 = vadd.f32 %v1939_v41, %v227_v34  ;;  %v1941_v50 = vpop.f32.mrb[27].mxu0  ;;  %v2012_v55 = vpop.f32.mrb[21].mxu1  ;;  %v6729_v11 = vadd.f32 %v2010_v43, %v7761_v9  ;;  %v8076_v34 = vpack.c.bf16 %v756_v7, %v752_v58  ;;  %v763_v41 = vld [vmem:[#allocation7 + $0xa8] sm:$0xff]  ;;  %v761_v43 = vld [vmem:[#allocation7 + $0x98] sm:$0xff]  ;;  %v782_v7 = vld [vmem:[#allocation7 + $0x140] sm:$0xff] }
 0x747   :  { %v1942_v57 = vadd.f32 %v1941_v50, %v229_v36  ;;  %v6730_v6 = vadd.f32 %v2012_v55, %v7764_v29  ;;  %v759_v36 = vld [vmem:[#allocation7 + $0x88] sm:$0xff]  ;;  %v765_v50 = vld [vmem:[#allocation7 + $0xb8] sm:$0xff]  ;;  %v758_v55 = vld [vmem:[#allocation7 + $0x80] sm:$0xff] }
 0x748   :  { %v5147_v62 = vmul.f32 -1.442695, %v1940_v48  ;;  %v8081_v48 = vpack.c.bf16 %v763_v41, %v759_v36  ;;  %v789_v58 = vld [vmem:[#allocation7 + $0x178] sm:$0xff]  ;;  %v786_v36 = vld [vmem:[#allocation7 + $0x160] sm:$0xff] }
 0x749   :  { %v5148_v0 = vmul.f32 -1.442695, %v1942_v57  ;;  %v5149_v8 = vmul.f32 -1.442695, %v6730_v6  ;;  %v762_v57 = vld [vmem:[#allocation7 + $0xa0] sm:$0xff]  ;;  %v760_v6 = vld [vmem:[#allocation7 + $0x90] sm:$0xff]  ;;  %v8119_v41 = vpack.c.bf16 %v789_v58, %v785_v2 }
 0x74a   :  { %6860 = vpow2.f32 %v5147_v62  ;;  %v8083_v62 = vpack.c.bf16 %v765_v50, %v761_v43  ;;  %v8121_v43 = vpack.c.bf16 %v786_v36, %v782_v7  ;;  %v784_v50 = vld [vmem:[#allocation7 + $0x150] sm:$0xff] }
 0x74b   :  { %6862 = vpow2.f32 %v5148_v0  ;;  %v8085_v0 = vpack.c.bf16 %v762_v57, %v758_v55  ;;  %v788_v55 = vld [vmem:[#allocation7 + $0x170] sm:$0xff]  ;;  %v791_v57 = vld [vmem:[#allocation7 + $0x188] sm:$0xff] }
 0x74c   :  { %6864 = vpow2.f32 %v5149_v8  ;;  %v764_v8 = vld [vmem:[#allocation7 + $0xb0] sm:$0xff]  ;;  %8885 = vst [vmem:[#allocation46_spill] sm:$0xff] %v8121_v43 }
 0x74d   :  { %6866 = vtanh.f32 %v6729_v11  ;;  %v8088_v11 = vpack.c.bf16 %v764_v8, %v760_v6  ;;  %v8124_v6 = vpack.c.bf16 %v788_v55, %v784_v50  ;;  %v795_v8 = vld [vmem:[#allocation7 + $0x1a8] sm:$0xff]  ;;  %v800_v2 = vld [vmem:[#allocation7 + $0x1d0] sm:$0xff]  ;;  %v810_v50 = vld [vmem:[%s8790_s8] sm:$0xf]  ;;  %v233_v55 = vadd.f32 %v7642_v18, %v7726_v54 }
 0x74e   :  { %v804_v58 = vld [vmem:[#allocation7 + $0x1f0] sm:$0xff] }
 0x74f   :  { %v8148_v36 = vpack.c.bf16 %v804_v58, %v800_v2  ;;  %v8894_v18 = vld [vmem:[#allocation12_spill] sm:$0xff]  ;;  %v8898_v2 = vld [vmem:[#allocation11_spill] sm:$0xff] }
 0x750   :  { %v8170_v54 = vrot.slane %v810_v50, %v8894_v18 }
 0x754   :  { %v6861_v17 = vpop.eup %6860 }
 0x755   :  { %v6863_v19 = vpop.eup %6862  ;;  %v2018_v25 = vadd.f32 1.0, %v6861_v17  ;;  %v767_v17 = vld [vmem:[#allocation7 + $0xc8] sm:$0xff] }
 0x756   :  { %v2024_v26 = vadd.f32 1.0, %v6863_v19  ;;  %v6865_v31 = vpop.eup %6864  ;;  %v771_v19 = vld [vmem:[#allocation7 + $0xe8] sm:$0xff] }
 0x757   :  { %6868 = vrcp.f32 %v2018_v25  ;;  %v6867_v32 = vpop.eup %6866  ;;  %v2031_v52 = vadd.f32 1.0, %v6865_v31  ;;  %v769_v25 = vld [vmem:[#allocation7 + $0xd8] sm:$0xff] }
 0x758   :  { %6870 = vrcp.f32 %v2024_v26  ;;  %v8093_v26 = vpack.c.bf16 %v771_v19, %v767_v17  ;;  %v773_v31 = vld [vmem:[#allocation7 + $0xf8] sm:$0xff] }
 0x759   :  { %6872 = vrcp.f32 %v2031_v52  ;;  %v768_v52 = vld [vmem:[#allocation7 + $0xd0] sm:$0xff]  ;;  %v793_v17 = vld [vmem:[#allocation7 + $0x198] sm:$0xff] }
 0x75a   :  { %v797_v19 = vld [vmem:[#allocation7 + $0x1b8] sm:$0xff] }
 0x761   :  { %v6869_v40 = vpop.eup %6868 }
 0x762   :  { %v6871_v44 = vpop.eup %6870  ;;  %v2035_v51 = vmul.f32 %v6869_v40, %v6867_v32  ;;  %v766_v32 = vld [vmem:[#allocation7 + $0xc0] sm:$0xff] }
 0x763   :  { %v2034_v59 = vmul.f32 %v6871_v44, %v7982_v49  ;;  %v6873_v3 = vpop.eup %6872  ;;  %v8071_v49 = vpack.c.bf16 %v757_v39, %v753_v53  ;;  %v770_v40 = vld [vmem:[#allocation7 + $0xe0] sm:$0xff]  ;;  %v8095_v44 = vpack.c.bf16 %v773_v31, %v769_v25  ;;  %v783_v53 = vld [vmem:[#allocation7 + $0x148] sm:$0xff]  ;;  %v8127_v25 = vpack.c.bf16 %v795_v8, %v791_v57 }
 0x764   :  { %v787_v39 = vld [vmem:[#allocation7 + $0x168] sm:$0xff]  ;;  %v8129_v31 = vpack.c.bf16 %v797_v19, %v793_v17  ;;  %v235_v57 = vadd.f32 %v7644_v28, %v7720_v22  ;;  %v8896_v28 = vld [vmem:[#allocation28_spill] sm:$0xff] }
 0x765   :  { %v8036_v60 = vadd.f32 %v2035_v51, %v2034_v59  ;;  %v8097_v51 = vpack.c.bf16 %v770_v40, %v766_v32  ;;  %v772_v59 = vld [vmem:[#allocation7 + $0xf0] sm:$0xff]  ;;  %v8116_v46 = vpack.c.bf16 %v787_v39, %v783_v53  ;;  %8886 = vst [vmem:[#allocation47_spill] sm:$0xff] %v8127_v25  ;;  %v790_v32 = vld [vmem:[#allocation7 + $0x180] sm:$0xff]  ;;  %v8141_v53 = vpack.c.bf16 %v805_v35, %v801_v14 }
 0x766   :  { %v794_v40 = vld [vmem:[#allocation7 + $0x1a0] sm:$0xff]  ;;  %v8173_v22 = vrot.slane %v810_v50, %v8896_v28 }
 0x767   :  { %6874 = vtanh.f32 %v8036_v60  ;;  %8884 = vst [vmem:[#allocation45_spill] sm:$0xff] %v8116_v46  ;;  %v802_v39 = vld [vmem:[#allocation7 + $0x1e0] sm:$0xff] }
 0x768   :  { %v8144_v7 = vpack.c.bf16 %v802_v39, %v798_v45  ;;  %v2386_v45 = vstv %s2213_s15  ;;  %v8897_v39 = vld [vmem:[#allocation14_spill] sm:$0xff] }
 0x769   :  { %v505_v58 = vadd.f32 %v8898_v2, %v8897_v39 }
 0x76a   :  { %8889 = vst [vmem:[#allocation50_spill] sm:$0xff] %v8144_v7 }
 0x76b   :  { %v2388_v2 = vmul.f32 %v2386_v45, %v505_v58 }
 0x771   :  { %v6875_v4 = vpop.eup %6874 }
 0x772   :  { %v2038_v63 = vmul.f32 %v6875_v4, %v6873_v3  ;;  %v8100_v3 = vpack.c.bf16 %v772_v59, %v768_v52  ;;  %v775_v4 = vld [vmem:[#allocation7 + $0x108] sm:$0xff]  ;;  %v792_v52 = vld [vmem:[#allocation7 + $0x190] sm:$0xff]  ;;  %v8132_v59 = vpack.c.bf16 %v794_v40, %v790_v32 }
 0x774   :  { %2111 = vmatmul.mubr.f32.vlgmr.msra.gmra.mrb[28].mxu0 %v2038_v63  ;;  %2182 = vmatmul.mubr.f32.vlgmr.msra.gmra.mrb[22].mxu1 %v2038_v63  ;;  %v779_v63 = vld [vmem:[#allocation7 + $0x128] sm:$0xff]  ;;  %8887 = vst [vmem:[#allocation48_spill] sm:$0xff] %v8132_v59 }
 0x775   :  { %2239 = vmatpush1.msra.mxu0 %v8042_v16  ;;  %2302 = vmatprep.mubr.f32.mxu0 %v8882_v56  ;;  %v8105_v5 = vpack.c.bf16 %v779_v63, %v775_v4  ;;  %v796_v4 = vld [vmem:[#allocation7 + $0x1b0] sm:$0xff]  ;;  %v799_v63 = vld [vmem:[#allocation7 + $0x1c8] sm:$0xff] }
 0x776   :  { %2310 = vmatpush1.msra.mxu1 %v8047_v21  ;;  %2373 = vmatprep.mubr.f32.mxu1 %v8882_v56  ;;  %v8136_v12 = vpack.c.bf16 %v796_v4, %v792_v52  ;;  %v8138_v20 = vpack.c.bf16 %v803_v61, %v799_v63  ;;  %v8162_v52 = vrot.slane %v810_v50, %v7651_v30  ;;  %v8892_v63 = vld [vmem:[#allocation13_spill] sm:$0xff]  ;;  %v8893_v61 = vld [vmem:[#allocation10_spill] sm:$0xff]  ;;  %v8900_v30 = vld [vmem:[#allocation27_spill] sm:$0xff] }
 0x777   :  { %6076 = vmatprep.subr.bf16.mxu0 %v8057_v1  ;;  %6108 = vmatprep.subr.bf16.mxu1 %v8059_v33  ;;  %v8165_v4 = vrot.slane %v810_v50, %v7699_v10  ;;  %v503_v14 = vadd.f32 %v8893_v61, %v8892_v63  ;;  %8895 = vst [vmem:[#allocation13_spill] sm:$0xff] %v8170_v54  ;;  %v8901_v10 = vld [vmem:[#allocation31_spill] sm:$0xff] }
 0x778   :  { %2303 = vmatmul.mubr.f32.vlgmr.msra.gmra.mrb[30].mxu0 %v8882_v56  ;;  %2374 = vmatmul.mubr.f32.vlgmr.msra.gmra.mrb[38].mxu1 %v8882_v56  ;;  %8888 = vst [vmem:[#allocation49_spill] sm:$0xff] %v8138_v20  ;;  %8890 = vst [vmem:[#allocation51_spill] sm:$0xff] %v8162_v52 }
 0x779   :  { %2465 = vmatprep.mubr.f32.mxu0 %v8882_v56  ;;  %2536 = vmatprep.mubr.f32.mxu1 %v8882_v56  ;;  %8891 = vst [vmem:[#allocation52_spill] sm:$0xff] %v8165_v4 }
 0x77a   :  { %6078 = vmatpush1.bf16.msra.mxu0 %v8061_v47  ;;  %6110 = vmatpush1.bf16.msra.mxu1 %v8064_v15 }
 0x77b   :  { %6080 = vmatprep.subr.bf16.mxu0 %v8069_v38  ;;  %6112 = vmatprep.subr.bf16.mxu1 %v8071_v49 }
 0x77e   :  { %6082 = vmatpush1.bf16.msra.mxu0 %v8073_v23  ;;  %6114 = vmatpush1.bf16.msra.mxu1 %v8076_v34 }
 0x77f   :  { %6084 = vmatprep.subr.bf16.mxu0 %v8081_v48  ;;  %6116 = vmatprep.subr.bf16.mxu1 %v8083_v62 }
 0x782   :  { %6086 = vmatpush1.bf16.msra.mxu0 %v8085_v0  ;;  %6118 = vmatpush1.bf16.msra.mxu1 %v8088_v11 }
 0x783   :  { %6088 = vmatprep.subr.bf16.mxu0 %v8093_v26  ;;  %6120 = vmatprep.subr.bf16.mxu1 %v8095_v44 }
 0x786   :  { %6090 = vmatpush1.bf16.msra.mxu0 %v8097_v51  ;;  %6122 = vmatpush1.bf16.msra.mxu1 %v8100_v3 }
 0x787   :  { %6092 = vmatprep.subr.bf16.mxu0 %v8105_v5  ;;  %6124 = vmatprep.subr.bf16.mxu1 %v8107_v37 }
 0x78a   :  { %6094 = vmatpush1.bf16.msra.mxu0 %v8109_v13  ;;  %6126 = vmatpush1.bf16.msra.mxu1 %v8112_v42 }
 0x78b   :  { %6096 = vmatprep.subr.bf16.mxu0 %v8116_v46  ;;  %6128 = vmatprep.subr.bf16.mxu1 %v8119_v41 }
 0x78e   :  { %6098 = vmatpush1.bf16.msra.mxu0 %v8121_v43  ;;  %6130 = vmatpush1.bf16.msra.mxu1 %v8124_v6  ;;  %v2387_v43 = vmul.f32 %v2386_v45, %v503_v14 }
 0x78f   :  { %6100 = vmatprep.subr.bf16.mxu0 %v8127_v25  ;;  %6132 = vmatprep.subr.bf16.mxu1 %v8129_v31 }
 0x792   :  { %6102 = vmatpush1.bf16.msra.mxu0 %v8132_v59  ;;  %6134 = vmatpush1.bf16.msra.mxu1 %v8136_v12 }
 0x793   :  { %6104 = vmatprep.subr.bf16.mxu0 %v8138_v20  ;;  %6136 = vmatprep.subr.bf16.mxu1 %v8141_v53  ;;  %v8902_v20 = vld [vmem:[#allocation29_spill] sm:$0xff] }
 0x794   :  { %v612_v59 = vadd.f32 %v8902_v20, %v8901_v10 }
 0x796   :  { %6106 = vmatpush1.bf16.msra.mxu0 %v8144_v7  ;;  %6138 = vmatpush1.bf16.msra.mxu1 %v8148_v36 }
 0x797   :  { %2649 = vmatprep.subr.mxu1 %v8020_v24 }
 0x847   :  { %v2112_v8 = vpop.f32.mrb[28].mxu0  ;;  %v2183_v17 = vpop.f32.mrb[22].mxu1 }
 0x848   :  { %v2113_v19 = vadd.f32 %v2112_v8, %v233_v55  ;;  %v2114_v32 = vpop.f32.mrb[29].mxu0  ;;  %v2185_v40 = vpop.f32.mrb[23].mxu1  ;;  %v8899_v55 = vld [vmem:[#allocation30_spill] sm:$0xff] }
 0x849   :  { %v2115_v35 = vadd.f32 %v2114_v32, %v235_v57  ;;  %v610_v8 = vadd.f32 %v8900_v30, %v8899_v55  ;;  %v2392_v57 = vstv %s2391_s17  ;;  %v2390_v30 = vmul.f32 %v2386_v45, %v612_v59 }
 0x84a   :  { %v5150_v7 = vmul.f32 -1.442695, %v2113_v19  ;;  %v6732_v10 = vadd.f32 %v2185_v40, %v7764_v29 }
 0x84b   :  { %v5151_v25 = vmul.f32 -1.442695, %v2115_v35  ;;  %v2304_v63 = vpop.f32.mrb[30].mxu0  ;;  %v2375_v32 = vpop.f32.mrb[38].mxu1  ;;  %v2389_v55 = vmul.f32 %v2386_v45, %v610_v8 }
 0x84c   :  { %6876 = vpow2.f32 %v5150_v7  ;;  %v2305_v61 = vadd.f32 %v2304_v63, %v8162_v52  ;;  %v2376_v50 = vadd.f32 %v2375_v32, %v8165_v4  ;;  %v2306_v18 = vpop.f32.mrb[31].mxu0  ;;  %v2377_v28 = vpop.f32.mrb[39].mxu1  ;;  %v5152_v14 = vmul.f32 -1.442695, %v6732_v10  ;;  %v815_v10 = vld [vmem:[%s8791_s9 + $0x20] sm:$0xff] }
 0x84d   :  { %6878 = vpow2.f32 %v5151_v25  ;;  %v2307_v39 = vadd.f32 %v2306_v18, %v8170_v54  ;;  %v2378_v19 = vadd.f32 %v2377_v28, %v8173_v22  ;;  %v6731_v18 = vadd.f32 %v2183_v17, %v7761_v9 }
 0x84e   :  { %v2393_v20 = vmul.f32 %v2392_v57, %v2305_v61  ;;  %v2395_v35 = vmul.f32 %v2392_v57, %v2376_v50  ;;  %6880 = vpow2.f32 %v5152_v14 }
 0x84f   :  { %v2394_v7 = vmul.f32 %v2392_v57, %v2307_v39  ;;  %v2396_v46 = vmul.f32 %v2392_v57, %v2378_v19  ;;  %6882 = vtanh.f32 %v6731_v18  ;;  %v812_v19 = vld [vmem:[%s8791_s9 + $0x8] sm:$0xff]  ;;  %v817_v18 = vld [vmem:[%s8791_s9 + $0x30] sm:$0xff] }
 0x850   :  { %v8186_v63 = vadd.f32 %v2393_v20, %v2387_v43  ;;  %v8188_v32 = vadd.f32 %v2395_v35, %v2389_v55  ;;  %v8816_v55 = vmov 0.0|0.0   ;;  %v813_v20 = vld [vmem:[%s8791_s9 + $0x10] sm:$0xff]  ;;  %v814_v35 = vld [vmem:[%s8791_s9 + $0x18] sm:$0xff] }
 0x851   :  { %v8190_v4 = vadd.f32 %v2394_v7, %v2388_v2  ;;  %v8192_v25 = vadd.f32 %v2396_v46, %v2390_v30  ;;  %6139 = vmatprep.subr.bf16.mxu0 %v8816_v55  ;;  %v8219_v30 = vpack.c.bf16 %v814_v35, %v813_v20  ;;  %v816_v7 = vld [vmem:[%s8791_s9 + $0x28] sm:$0xff] }
 0x852   :  { %v8229_v14 = vpack.c.bf16 %v816_v7, %v815_v10 }
 0x853   :  { %8904 = vst [vmem:[#allocation12_spill] sm:$0xff] %v8219_v30 }
 0x854   :  { %8905 = vst [vmem:[#allocation28_spill] sm:$0xff] %v8229_v14 }
 0x856   :  { %v6877_v58 = vpop.eup %6876 }
 0x857   :  { %v6879_v8 = vpop.eup %6878  ;;  %v2191_v61 = vadd.f32 1.0, %v6877_v58  ;;  %v818_v58 = vld [vmem:[%s8791_s9 + $0x38] sm:$0xff] }
 0x858   :  { %v2197_v59 = vadd.f32 1.0, %v6879_v8  ;;  %v6881_v29 = vpop.eup %6880  ;;  %v8239_v8 = vpack.c.bf16 %v818_v58, %v817_v18 }
 0x859   :  { %6884 = vrcp.f32 %v2191_v61  ;;  %v6883_v43 = vpop.eup %6882  ;;  %v2204_v50 = vadd.f32 1.0, %v6881_v29  ;;  %v819_v61 = vld [vmem:[%s8791_s9 + $0x40] sm:$0xff] }
 0x85a   :  { %6886 = vrcp.f32 %v2197_v59  ;;  %8906 = vst [vmem:[#allocation14_spill] sm:$0xff] %v8239_v8  ;;  %v820_v59 = vld [vmem:[%s8791_s9 + $0x48] sm:$0xff] }
 0x85b   :  { %6888 = vrcp.f32 %v2204_v50  ;;  %v8249_v29 = vpack.c.bf16 %v820_v59, %v819_v61  ;;  %v824_v50 = vld [vmem:[%s8791_s9 + $0x68] sm:$0xff] }
 0x85d   :  { %8907 = vst [vmem:[#allocation11_spill] sm:$0xff] %v8249_v29 }
 0x863   :  { %v6885_v40 = vpop.eup %6884 }
 0x864   :  { %v6887_v45 = vpop.eup %6886  ;;  %v2208_v57 = vmul.f32 %v6885_v40, %v6883_v43  ;;  %v821_v43 = vld [vmem:[%s8791_s9 + $0x50] sm:$0xff]  ;;  %v822_v40 = vld [vmem:[%s8791_s9 + $0x58] sm:$0xff] }
 0x865   :  { %v2207_v46 = vmul.f32 %v6887_v45, %v8036_v60  ;;  %v6889_v9 = vpop.eup %6888  ;;  %v811_v60 = vld [vmem:[%s8791_s9] sm:$0xff]  ;;  %v8259_v45 = vpack.c.bf16 %v822_v40, %v821_v43 }
 0x866   :  { %v8208_v2 = vpack.c.bf16 %v812_v19, %v811_v60 }
 0x867   :  { %v8196_v28 = vadd.f32 %v2208_v57, %v2207_v46  ;;  %8908 = vst [vmem:[#allocation30_spill] sm:$0xff] %v8259_v45  ;;  %v823_v57 = vld [vmem:[%s8791_s9 + $0x60] sm:$0xff] }
 0x868   :  { %8903 = vst [vmem:[#allocation10_spill] sm:$0xff] %v8208_v2  ;;  %v8270_v46 = vpack.c.bf16 %v824_v50, %v823_v57 }
 0x869   :  { %6890 = vtanh.f32 %v8196_v28 }
 0x86a   :  { %8909 = vst [vmem:[#allocation27_spill] sm:$0xff] %v8270_v46 }
 0x873   :  { %v6891_v17 = vpop.eup %6890 }
 0x874   :  { %v2211_v39 = vmul.f32 %v6891_v17, %v6889_v9  ;;  %v825_v9 = vld [vmem:[%s8791_s9 + $0x70] sm:$0xff]  ;;  %v826_v17 = vld [vmem:[%s8791_s9 + $0x78] sm:$0xff]  ;;  %s4020_s9 = ssub.f32 1.0, %s3863_s21 }
 0x876   :  { %2466 = vmatmul.mubr.f32.vlgmr.msra.gmra.mrb[32].mxu0 %v2211_v39  ;;  %2537 = vmatmul.mubr.f32.vlgmr.msra.gmra.mrb[40].mxu1 %v2211_v39  ;;  %v8280_v39 = vpack.c.bf16 %v826_v17, %v825_v9 }
 0x877   :  { %2650 = vmatpush1.msra.mxu1 %v8042_v16  ;;  %2713 = vmatprep.mubr.f32.mxu1 %v8882_v56 }
 0x878   :  { %2720 = vmatprep.subr.mxu1 %v8025_v27  ;;  %6141 = vmatpush3.bf16.msra.mxu0 %v8208_v2  ;;  %8910 = vst [vmem:[#allocation31_spill] sm:$0xff] %v8280_v39 }
 0x879   :  { %6142 = vmatprep.subr.bf16.mxu0 %v8816_v55  ;;  %5350 = vmatprep.mubr.msk.f32.mxu0 %vm7053_vm1, %v8882_v56 }
 0x87c   :  { %6144 = vmatpush3.bf16.msra.mxu0 %v8219_v30 }
 0x87d   :  { %6145 = vmatprep.subr.bf16.mxu0 %v8816_v55 }
 0x880   :  { %6147 = vmatpush3.bf16.msra.mxu0 %v8229_v14 }
 0x881   :  { %6148 = vmatprep.subr.bf16.mxu0 %v8816_v55 }
 0x884   :  { %6150 = vmatpush3.bf16.msra.mxu0 %v8239_v8 }
 0x885   :  { %6151 = vmatprep.subr.bf16.mxu0 %v8816_v55 }
 0x888   :  { %6153 = vmatpush3.bf16.msra.mxu0 %v8249_v29 }
 0x889   :  { %6154 = vmatprep.subr.bf16.mxu0 %v8816_v55 }
 0x88c   :  { %6156 = vmatpush3.bf16.msra.mxu0 %v8259_v45 }
 0x88d   :  { %6157 = vmatprep.subr.bf16.mxu0 %v8816_v55 }
 0x890   :  { %6159 = vmatpush3.bf16.msra.mxu0 %v8270_v46 }
 0x891   :  { %6160 = vmatprep.subr.bf16.mxu0 %v8816_v55 }
 0x894   :  { %6162 = vmatpush3.bf16.msra.mxu0 %v8280_v39 }
 0x895   :  { %6196 = vmatprep.subr.bf16.mxu0 %v8059_v33 }
 0x949   :  { %v2467_v60 = vpop.f32.mrb[32].mxu0  ;;  %v2538_v19 = vpop.f32.mrb[40].mxu1 }
 0x94a   :  { %v2468_v20 = vadd.f32 %v2467_v60, %v8186_v63  ;;  %v2539_v35 = vadd.f32 %v2538_v19, %v8188_v32  ;;  %v2469_v10 = vpop.f32.mrb[33].mxu0  ;;  %v2540_v7 = vpop.f32.mrb[41].mxu1 }
 0x94b   :  { %v2470_v18 = vadd.f32 %v2469_v10, %v8190_v4  ;;  %v2541_v58 = vadd.f32 %v2540_v7, %v8192_v25 }
 0x94c   :  { %v5153_v61 = vmul.f32 -1.442695, %v2468_v20 }
 0x94d   :  { %v5154_v59 = vmul.f32 -1.442695, %v2470_v18  ;;  %v5155_v43 = vmul.f32 -1.442695, %v2541_v58 }
 0x94e   :  { %6892 = vpow2.f32 %v5153_v61 }
 0x94f   :  { %6894 = vpow2.f32 %v5154_v59  ;;  %v8911_v59 = vld [vmem:[#allocation45_spill] sm:$0xff] }
 0x950   :  { %6896 = vpow2.f32 %v5155_v43  ;;  %v8912_v43 = vld [vmem:[#allocation46_spill] sm:$0xff] }
 0x951   :  { %6898 = vtanh.f32 %v2539_v35 }
 0x958   :  { %v6893_v40 = vpop.eup %6892 }
 0x959   :  { %v6895_v57 = vpop.eup %6894  ;;  %v2546_v50 = vadd.f32 1.0, %v6893_v40  ;;  %v8913_v40 = vld [vmem:[#allocation47_spill] sm:$0xff] }
 0x95a   :  { %v2552_v9 = vadd.f32 1.0, %v6895_v57  ;;  %v6897_v63 = vpop.eup %6896  ;;  %v8914_v57 = vld [vmem:[#allocation48_spill] sm:$0xff] }
 0x95b   :  { %6900 = vrcp.f32 %v2546_v50  ;;  %v6899_v32 = vpop.eup %6898  ;;  %v2559_v19 = vadd.f32 1.0, %v6897_v63  ;;  %v8915_v63 = vld [vmem:[#allocation49_spill] sm:$0xff] }
 0x95c   :  { %6902 = vrcp.f32 %v2552_v9 }
 0x95d   :  { %6904 = vrcp.f32 %v2559_v19 }
 0x965   :  { %v6901_v17 = vpop.eup %6900 }
 0x966   :  { %v6903_v60 = vpop.eup %6902  ;;  %v2563_v4 = vmul.f32 %v6901_v17, %v6899_v32  ;;  %v8916_v32 = vld [vmem:[#allocation50_spill] sm:$0xff]  ;;  %v2797_v17 = vstv %s2645_s25  ;;  %s4426_s25 = ssub.f32 1.0, %s4269_s24 }
 0x967   :  { %v2562_v25 = vmul.f32 %v6903_v60, %v8196_v28  ;;  %v6905_v10 = vpop.eup %6904  ;;  %v8316_v28 = vld [vmem:[%s8792_s10] ss:$0 sm:$0xff] }
 0x969   :  { %v8290_v20 = vadd.f32 %v2563_v4, %v2562_v25  ;;  %v2803_v4 = vstv %s2802_s4 }
 0x96b   :  { %6906 = vtanh.f32 %v8290_v20 }
 0x975   :  { %v6907_v7 = vpop.eup %6906 }
 0x976   :  { %v2566_v18 = vmul.f32 %v6907_v7, %v6905_v10  ;;  %v8917_v7 = vld [vmem:[#allocation15_spill] sm:$0xff] }
 0x978   :  { %5351 = vmatmul.mubr.f32.vlgmr.msra.gmra.mrb[34].mxu0 %v2566_v18 }
 0x979   :  { %6198 = vmatpush1.bf16.msra.mxu0 %v8064_v15  ;;  %2947 = vmatprep.mubr.f32.mxu0 %v8882_v56 }
 0x97a   :  { %6200 = vmatprep.subr.bf16.mxu0 %v8071_v49 }
 0x97d   :  { %6202 = vmatpush1.bf16.msra.mxu0 %v8076_v34 }
 0x97e   :  { %6204 = vmatprep.subr.bf16.mxu0 %v8083_v62 }
 0x981   :  { %6206 = vmatpush1.bf16.msra.mxu0 %v8088_v11 }
 0x982   :  { %6208 = vmatprep.subr.bf16.mxu0 %v8095_v44 }
 0x985   :  { %6210 = vmatpush1.bf16.msra.mxu0 %v8100_v3 }
 0x986   :  { %6212 = vmatprep.subr.bf16.mxu0 %v8107_v37 }
 0x989   :  { %6214 = vmatpush1.bf16.msra.mxu0 %v8112_v42 }
 0x98a   :  { %6216 = vmatprep.subr.bf16.mxu0 %v8119_v41 }
 0x98d   :  { %6218 = vmatpush1.bf16.msra.mxu0 %v8124_v6 }
 0x98e   :  { %6220 = vmatprep.subr.bf16.mxu0 %v8129_v31 }
 0x991   :  { %6222 = vmatpush1.bf16.msra.mxu0 %v8136_v12 }
 0x992   :  { %6224 = vmatprep.subr.bf16.mxu0 %v8141_v53 }
 0x995   :  { %6226 = vmatpush1.bf16.msra.mxu0 %v8148_v36 }
 0x996   :  { %3055 = vmatprep.subr.mxu0 %v8020_v24 }
 0x998   :  { %2948 = vmatmul.mubr.f32.vlgmr.msra.gmra.mrb[36].mxu0 %v2566_v18 }
 0x999   :  { %3056 = vmatpush1.msra.mxu0 %v8042_v16  ;;  %3119 = vmatprep.mubr.f32.mxu0 %v8882_v56 }
 0x99a   :  { %3126 = vmatprep.subr.mxu0 %v8025_v27 }
 0xa4b   :  { %v2639_v35 = vpop.f32.mrb[34].mxu0 }
 0xa4c   :  { %v2640_v58 = vadd.f32 %v8316_v28, %v2639_v35  ;;  %v5352_v61 = vpop.f32.mrb[35].mxu0 }
 0xa4e   :  { %2643 = vst.msk [vmem:[%s8793_s11] sm:$0xff] %vm99_vm0, %v2640_v58  ;;  %5158 = vmatmul.mubr.msk.f32.vlgmr.msra.gmra.mrb[42].mxu1 %vm99_vm0, %v2640_v58 }
 0xa4f   :  { %2721 = vmatpush1.msra.mxu1 %v8047_v21  ;;  %2784 = vmatprep.mubr.f32.mxu1 %v8882_v56 }
 0xa50   :  { %6164 = vmatprep.subr.bf16.mxu1 %v8057_v1 }
 0xa52   :  { %5159 = vmatmul.mubr.msk.f32.vlgmr.msra.gmra.mrb[44].mxu1 %vm99_vm0, %v2640_v58  ;;  %v8918_v58 = vld [vmem:[#allocation16_spill] sm:$0xff] }
 0xa53   :  { %6166 = vmatpush1.bf16.msra.mxu1 %v8061_v47  ;;  %2876 = vmatprep.mubr.f32.mxu1 %v8882_v56  ;;  %v2799_v61 = vmul.f32 %v2797_v17, %v8918_v58 }
 0xa54   :  { %6168 = vmatprep.subr.bf16.mxu1 %v8069_v38 }
 0xa57   :  { %6170 = vmatpush1.bf16.msra.mxu1 %v8073_v23 }
 0xa58   :  { %6172 = vmatprep.subr.bf16.mxu1 %v8081_v48 }
 0xa5b   :  { %6174 = vmatpush1.bf16.msra.mxu1 %v8085_v0 }
 0xa5c   :  { %6176 = vmatprep.subr.bf16.mxu1 %v8093_v26 }
 0xa5f   :  { %6178 = vmatpush1.bf16.msra.mxu1 %v8097_v51 }
 0xa60   :  { %6180 = vmatprep.subr.bf16.mxu1 %v8105_v5 }
 0xa63   :  { %6182 = vmatpush1.bf16.msra.mxu1 %v8109_v13 }
 0xa64   :  { %6184 = vmatprep.subr.bf16.mxu1 %v8911_v59 }
 0xa67   :  { %6186 = vmatpush1.bf16.msra.mxu1 %v8912_v43 }
 0xa68   :  { %6188 = vmatprep.subr.bf16.mxu1 %v8913_v40 }
 0xa6b   :  { %6190 = vmatpush1.bf16.msra.mxu1 %v8914_v57  ;;  %v2949_v50 = vpop.f32.mrb[36].mxu0 }
 0xa6c   :  { %v2951_v9 = vpop.f32.mrb[37].mxu0  ;;  %6192 = vmatprep.subr.bf16.mxu1 %v8915_v63 }
 0xa6f   :  { %6194 = vmatpush1.bf16.msra.mxu1 %v8916_v32 }
 0xa70   :  { %6227 = vmatprep.subr.bf16.mxu1 %v8816_v55 }
 0xa72   :  { %2877 = vmatmul.mubr.f32.vlgmr.msra.gmra.mrb[46].mxu1 %v2566_v18  ;;  %v2798_v18 = vmul.f32 %v2797_v17, %v8917_v7 }
 0xa73   :  { %6229 = vmatpush3.bf16.msra.mxu1 %v8208_v2  ;;  %5385 = vmatprep.mubr.msk.f32.mxu1 %vm7053_vm1, %v8882_v56 }
 0xa74   :  { %6230 = vmatprep.subr.bf16.mxu1 %v8816_v55 }
 0xa77   :  { %6232 = vmatpush3.bf16.msra.mxu1 %v8219_v30  ;;  %v8920_v30 = vld [vmem:[#allocation32_spill] sm:$0xff] }
 0xa78   :  { %6233 = vmatprep.subr.bf16.mxu1 %v8816_v55  ;;  %v2800_v2 = vmul.f32 %v2797_v17, %v8920_v30 }
 0xa7b   :  { %6235 = vmatpush3.bf16.msra.mxu1 %v8229_v14 }
 0xa7c   :  { %6236 = vmatprep.subr.bf16.mxu1 %v8816_v55 }
 0xa7f   :  { %6238 = vmatpush3.bf16.msra.mxu1 %v8239_v8 }
 0xa80   :  { %6239 = vmatprep.subr.bf16.mxu1 %v8816_v55 }
 0xa83   :  { %6241 = vmatpush3.bf16.msra.mxu1 %v8249_v29 }
 0xa84   :  { %6242 = vmatprep.subr.bf16.mxu1 %v8816_v55 }
 0xa87   :  { %6244 = vmatpush3.bf16.msra.mxu1 %v8259_v45 }
 0xa88   :  { %6245 = vmatprep.subr.bf16.mxu1 %v8816_v55 }
 0xa8b   :  { %6247 = vmatpush3.bf16.msra.mxu1 %v8270_v46  ;;  %v8919_v46 = vld [vmem:[#allocation52_spill] sm:$0xff] }
 0xa8c   :  { %6248 = vmatprep.subr.bf16.mxu1 %v8816_v55 }
 0xa8f   :  { %6250 = vmatpush3.bf16.msra.mxu1 %v8280_v39 }
 0xa90   :  { %6284 = vmatprep.subr.bf16.mxu1 %v8059_v33 }
 0xb21   :  { %v2715_v60 = vpop.f32.mrb[42].mxu1 }
 0xb22   :  { %v2716_v19 = vadd.f32 %v2715_v60, %v8162_v52  ;;  %v2717_v25 = vpop.f32.mrb[43].mxu1  ;;  %v8921_v52 = vld [vmem:[#allocation33_spill] sm:$0xff] }
 0xb23   :  { %v2718_v10 = vadd.f32 %v2717_v25, %v8170_v54  ;;  %v2801_v32 = vmul.f32 %v2797_v17, %v8921_v52  ;;  %v8924_v17 = vld [vmem:[#allocation49_spill] sm:$0xff] }
 0xb24   :  { %v2804_v35 = vmul.f32 %v2803_v4, %v2716_v19 }
 0xb25   :  { %v2805_v55 = vmul.f32 %v2803_v4, %v2718_v10  ;;  %v2786_v39 = vpop.f32.mrb[44].mxu1 }
 0xb26   :  { %v2787_v33 = vadd.f32 %v2786_v39, %v8919_v46  ;;  %v2788_v45 = vpop.f32.mrb[45].mxu1  ;;  %v2808_v29 = vadd.f32 %v2804_v35, %v2798_v18  ;;  %v8926_v35 = vmov 0.0|0.0  }
 0xb27   :  { %v2789_v8 = vadd.f32 %v2788_v45, %v8173_v22  ;;  %v2809_v14 = vadd.f32 %v2805_v55, %v2799_v61  ;;  %v8927_v61 = vld [vmem:[#allocation10_spill] sm:$0xff] }
 0xb28   :  { %v2806_v60 = vmul.f32 %v2803_v4, %v2787_v33 }
 0xb29   :  { %v2807_v25 = vmul.f32 %v2803_v4, %v2789_v8  ;;  %v8925_v4 = vld [vmem:[#allocation50_spill] sm:$0xff] }
 0xb2a   :  { %v2810_v54 = vadd.f32 %v2806_v60, %v2800_v2  ;;  %v8928_v60 = vld [vmem:[#allocation12_spill] sm:$0xff] }
 0xb2b   :  { %v2811_v7 = vadd.f32 %v2807_v25, %v2801_v32  ;;  %v8929_v25 = vld [vmem:[#allocation28_spill] sm:$0xff] }
 0xb2c   :  { %v2950_v19 = vadd.f32 %v2949_v50, %v2810_v54 }
 0xb2d   :  { %v2952_v63 = vadd.f32 %v2951_v9, %v2811_v7  ;;  %v8930_v7 = vld [vmem:[#allocation14_spill] sm:$0xff] }
 0xb2f   :  { %v5162_v45 = vmul.f32 -1.442695, %v2952_v63 }
 0xb45   :  { %v2878_v58 = vpop.f32.mrb[46].mxu1 }
 0xb46   :  { %v2879_v10 = vadd.f32 %v2878_v58, %v2808_v29  ;;  %v2880_v57 = vpop.f32.mrb[47].mxu1  ;;  %v8932_v58 = vld [vmem:[#allocation30_spill] sm:$0xff] }
 0xb47   :  { %v2881_v40 = vadd.f32 %v2880_v57, %v2809_v14 }
 0xb48   :  { %v5160_v39 = vmul.f32 -1.442695, %v2879_v10  ;;  %v8933_v10 = vld [vmem:[#allocation27_spill] sm:$0xff] }
 0xb49   :  { %v5161_v46 = vmul.f32 -1.442695, %v2881_v40 }
 0xb4a   :  { %6908 = vpow2.f32 %v5160_v39  ;;  %v8934_v39 = vld [vmem:[#allocation31_spill] sm:$0xff] }
 0xb4b   :  { %6910 = vpow2.f32 %v5161_v46 }
 0xb4c   :  { %6912 = vpow2.f32 %v5162_v45  ;;  %v8935_v45 = vld [vmem:[#allocation44_spill] sm:$0xff] }
 0xb4d   :  { %6914 = vtanh.f32 %v2950_v19  ;;  %v8931_v19 = vld [vmem:[#allocation11_spill] sm:$0xff] }
 0xb54   :  { %v6909_v55 = vpop.eup %6908 }
 0xb55   :  { %v6911_v18 = vpop.eup %6910  ;;  %v2957_v33 = vadd.f32 1.0, %v6909_v55  ;;  %v3203_v55 = vstv %s3051_s5 }
 0xb56   :  { %v2963_v52 = vadd.f32 1.0, %v6911_v18  ;;  %v6913_v2 = vpop.eup %6912 }
 0xb57   :  { %6916 = vrcp.f32 %v2957_v33  ;;  %v6915_v54 = vpop.eup %6914  ;;  %v2970_v29 = vadd.f32 1.0, %v6913_v2  ;;  %v3209_v33 = vstv %s3208_s28 }
 0xb58   :  { %6918 = vrcp.f32 %v2963_v52  ;;  %v8936_v52 = vld [vmem:[#allocation51_spill] sm:$0xff] }
 0xb59   :  { %6920 = vrcp.f32 %v2970_v29  ;;  %v8938_v29 = vld [vmem:[#allocation17_spill] sm:$0xff] }
 0xb61   :  { %v6917_v30 = vpop.eup %6916 }
 0xb62   :  { %v6919_v8 = vpop.eup %6918  ;;  %v2974_v50 = vmul.f32 %v6917_v30, %v6915_v54  ;;  %v8937_v30 = vld [vmem:[#allocation13_spill] sm:$0xff] }
 0xb63   :  { %v2973_v14 = vmul.f32 %v6919_v8, %v8290_v20  ;;  %v6921_v46 = vpop.eup %6920 }
 0xb65   :  { %v8372_v40 = vadd.f32 %v2974_v50, %v2973_v14  ;;  %v3204_v50 = vmul.f32 %v3203_v55, %v8938_v29 }
 0xb67   :  { %6922 = vtanh.f32 %v8372_v40 }
 0xb71   :  { %v6923_v57 = vpop.eup %6922 }
 0xb72   :  { %v2977_v9 = vmul.f32 %v6923_v57, %v6921_v46  ;;  %v8939_v46 = vld [vmem:[#allocation18_spill] sm:$0xff] }
 0xb73   :  { %v3205_v57 = vmul.f32 %v3203_v55, %v8939_v46 }
 0xb74   :  { %5386 = vmatmul.mubr.f32.vlgmr.msra.gmra.mrb[48].mxu1 %v2977_v9 }
 0xb75   :  { %6286 = vmatpush1.bf16.msra.mxu1 %v8064_v15  ;;  %3353 = vmatprep.mubr.f32.mxu1 %v8882_v56 }
 0xb76   :  { %6288 = vmatprep.subr.bf16.mxu1 %v8071_v49 }
 0xb79   :  { %6290 = vmatpush1.bf16.msra.mxu1 %v8076_v34 }
 0xb7a   :  { %6292 = vmatprep.subr.bf16.mxu1 %v8083_v62 }
 0xb7d   :  { %6294 = vmatpush1.bf16.msra.mxu1 %v8088_v11 }
 0xb7e   :  { %6296 = vmatprep.subr.bf16.mxu1 %v8095_v44 }
 0xb81   :  { %6298 = vmatpush1.bf16.msra.mxu1 %v8100_v3 }
 0xb82   :  { %6300 = vmatprep.subr.bf16.mxu1 %v8107_v37 }
 0xb85   :  { %6302 = vmatpush1.bf16.msra.mxu1 %v8112_v42 }
 0xb86   :  { %6304 = vmatprep.subr.bf16.mxu1 %v8119_v41 }
 0xb89   :  { %6306 = vmatpush1.bf16.msra.mxu1 %v8124_v6 }
 0xb8a   :  { %6308 = vmatprep.subr.bf16.mxu1 %v8129_v31 }
 0xb8d   :  { %6310 = vmatpush1.bf16.msra.mxu1 %v8136_v12 }
 0xb8e   :  { %6312 = vmatprep.subr.bf16.mxu1 %v8141_v53 }
 0xb91   :  { %6314 = vmatpush1.bf16.msra.mxu1 %v8148_v36 }
 0xb92   :  { %3461 = vmatprep.subr.mxu1 %v8020_v24  ;;  %v8922_v24 = vld [vmem:[#allocation47_spill] sm:$0xff] }
 0xb94   :  { %3354 = vmatmul.mubr.f32.vlgmr.msra.gmra.mrb[50].mxu1 %v2977_v9 }
 0xb95   :  { %3462 = vmatpush1.msra.mxu1 %v8042_v16  ;;  %3525 = vmatprep.mubr.f32.mxu1 %v8882_v56 }
 0xb96   :  { %3532 = vmatprep.subr.mxu1 %v8025_v27  ;;  %v8923_v27 = vld [vmem:[#allocation48_spill] sm:$0xff] }
 0xc47   :  { %v3044_v20 = vpop.f32.mrb[48].mxu1 }
 0xc48   :  { %v3045_v63 = vadd.f32 %v8316_v28, %v3044_v20  ;;  %v5387_v32 = vpop.f32.mrb[49].mxu1 }
 0xc4a   :  { %5163 = vst.msk [vmem:[%s8793_s11 + $0x8] sm:$0xff] %vm99_vm0, %v3045_v63  ;;  %5165 = vmatmul.mubr.msk.f32.vlgmr.msra.gmra.mrb[38].mxu0 %vm99_vm0, %v3045_v63 }
 0xc4b   :  { %3127 = vmatpush1.msra.mxu0 %v8047_v21  ;;  %3190 = vmatprep.mubr.f32.mxu0 %v8882_v56 }
 0xc4c   :  { %6252 = vmatprep.subr.bf16.mxu0 %v8057_v1 }
 0xc4e   :  { %5166 = vmatmul.mubr.msk.f32.vlgmr.msra.gmra.mrb[40].mxu0 %vm99_vm0, %v3045_v63  ;;  %v8940_v63 = vld [vmem:[#allocation52_spill] sm:$0xff] }
 0xc4f   :  { %6254 = vmatpush1.bf16.msra.mxu0 %v8061_v47  ;;  %3282 = vmatprep.mubr.f32.mxu0 %v8882_v56 }
 0xc50   :  { %6256 = vmatprep.subr.bf16.mxu0 %v8069_v38 }
 0xc53   :  { %6258 = vmatpush1.bf16.msra.mxu0 %v8073_v23 }
 0xc54   :  { %6260 = vmatprep.subr.bf16.mxu0 %v8081_v48 }
 0xc57   :  { %6262 = vmatpush1.bf16.msra.mxu0 %v8085_v0 }
 0xc58   :  { %6264 = vmatprep.subr.bf16.mxu0 %v8093_v26 }
 0xc5b   :  { %6266 = vmatpush1.bf16.msra.mxu0 %v8097_v51 }
 0xc5c   :  { %6268 = vmatprep.subr.bf16.mxu0 %v8105_v5 }
 0xc5f   :  { %6270 = vmatpush1.bf16.msra.mxu0 %v8109_v13 }
 0xc60   :  { %6272 = vmatprep.subr.bf16.mxu0 %v8911_v59 }
 0xc63   :  { %6274 = vmatpush1.bf16.msra.mxu0 %v8912_v43 }
 0xc64   :  { %6276 = vmatprep.subr.bf16.mxu0 %v8922_v24 }
 0xc67   :  { %6278 = vmatpush1.bf16.msra.mxu0 %v8923_v27  ;;  %v3355_v16 = vpop.f32.mrb[50].mxu1 }
 0xc68   :  { %v3357_v21 = vpop.f32.mrb[51].mxu1  ;;  %6280 = vmatprep.subr.bf16.mxu0 %v8924_v17 }
 0xc6b   :  { %6282 = vmatpush1.bf16.msra.mxu0 %v8925_v4 }
 0xc6c   :  { %6315 = vmatprep.subr.bf16.mxu0 %v8926_v35 }
 0xc6e   :  { %3283 = vmatmul.mubr.f32.vlgmr.msra.gmra.mrb[42].mxu0 %v2977_v9 }
 0xc6f   :  { %6317 = vmatpush3.bf16.msra.mxu0 %v8927_v61  ;;  %5420 = vmatprep.mubr.msk.f32.mxu0 %vm7053_vm1, %v8882_v56 }
 0xc70   :  { %6318 = vmatprep.subr.bf16.mxu0 %v8926_v35 }
 0xc73   :  { %6320 = vmatpush3.bf16.msra.mxu0 %v8928_v60 }
 0xc74   :  { %6321 = vmatprep.subr.bf16.mxu0 %v8926_v35 }
 0xc77   :  { %6323 = vmatpush3.bf16.msra.mxu0 %v8929_v25 }
 0xc78   :  { %6324 = vmatprep.subr.bf16.mxu0 %v8926_v35 }
 0xc7b   :  { %6326 = vmatpush3.bf16.msra.mxu0 %v8930_v7 }
 0xc7c   :  { %6327 = vmatprep.subr.bf16.mxu0 %v8926_v35 }
 0xc7f   :  { %6329 = vmatpush3.bf16.msra.mxu0 %v8931_v19  ;;  %v8941_v19 = vld [vmem:[#allocation34_spill] sm:$0xff] }
 0xc80   :  { %6330 = vmatprep.subr.bf16.mxu0 %v8926_v35  ;;  %v3206_v7 = vmul.f32 %v3203_v55, %v8941_v19 }
 0xc83   :  { %6332 = vmatpush3.bf16.msra.mxu0 %v8932_v58 }
 0xc84   :  { %6333 = vmatprep.subr.bf16.mxu0 %v8926_v35 }
 0xc87   :  { %6335 = vmatpush3.bf16.msra.mxu0 %v8933_v10 }
 0xc88   :  { %6336 = vmatprep.subr.bf16.mxu0 %v8926_v35 }
 0xc8b   :  { %6338 = vmatpush3.bf16.msra.mxu0 %v8934_v39 }
 0xc8c   :  { %6372 = vmatprep.subr.bf16.mxu0 %v8935_v45 }
 0xd1d   :  { %v3121_v18 = vpop.f32.mrb[38].mxu0 }
 0xd1e   :  { %v3122_v2 = vadd.f32 %v3121_v18, %v8936_v52  ;;  %v3123_v54 = vpop.f32.mrb[39].mxu0  ;;  %v8942_v52 = vld [vmem:[#allocation35_spill] sm:$0xff] }
 0xd1f   :  { %v3124_v8 = vadd.f32 %v3123_v54, %v8937_v30  ;;  %v3207_v25 = vmul.f32 %v3203_v55, %v8942_v52  ;;  %v8477_v52 = vld [vmem:[%s8788_s6] sm:$0xff] }
 0xd20   :  { %v3210_v14 = vmul.f32 %v3209_v33, %v3122_v2 }
 0xd21   :  { %v3211_v9 = vmul.f32 %v3209_v33, %v3124_v8  ;;  %v3192_v20 = vpop.f32.mrb[40].mxu0 }
 0xd22   :  { %v3193_v32 = vadd.f32 %v3192_v20, %v8940_v63  ;;  %v3194_v45 = vpop.f32.mrb[41].mxu0  ;;  %v3214_v39 = vadd.f32 %v3210_v14, %v3204_v50 }
 0xd23   :  { %v3195_v10 = vadd.f32 %v3194_v45, %v8173_v22  ;;  %v3215_v58 = vadd.f32 %v3211_v9, %v3205_v57 }
 0xd24   :  { %v3212_v18 = vmul.f32 %v3209_v33, %v3193_v32  ;;  %v8496_v32 = vld [vmem:[%s8788_s6 + $0x10] sm:$0xff] }
 0xd25   :  { %v3213_v54 = vmul.f32 %v3209_v33, %v3195_v10 }
 0xd26   :  { %v3216_v30 = vadd.f32 %v3212_v18, %v3206_v7 }
 0xd27   :  { %v3217_v29 = vadd.f32 %v3213_v54, %v3207_v25 }
 0xd28   :  { %v3356_v2 = vadd.f32 %v3355_v16, %v3216_v30  ;;  %v8484_v30 = vld [vmem:[%s8788_s6 + $0x18] sm:$0xff] }
 0xd29   :  { %v3358_v60 = vadd.f32 %v3357_v21, %v3217_v29  ;;  %v8943_v29 = vmov 0.0|0.0  }
 0xd2b   :  { %v5169_v45 = vmul.f32 -1.442695, %v3358_v60 }
 0xd41   :  { %v3284_v46 = vpop.f32.mrb[42].mxu0 }
 0xd42   :  { %v3285_v8 = vadd.f32 %v3284_v46, %v3214_v39  ;;  %v3286_v61 = vpop.f32.mrb[43].mxu0  ;;  %v8945_v46 = vld [vmem:[#allocation12_spill] sm:$0xff] }
 0xd43   :  { %v3287_v35 = vadd.f32 %v3286_v61, %v3215_v58 }
 0xd44   :  { %v5167_v20 = vmul.f32 -1.442695, %v3285_v8  ;;  %v8946_v8 = vld [vmem:[#allocation28_spill] sm:$0xff] }
 0xd45   :  { %v5168_v63 = vmul.f32 -1.442695, %v3287_v35 }
 0xd46   :  { %6924 = vpow2.f32 %v5167_v20  ;;  %v8947_v20 = vld [vmem:[#allocation14_spill] sm:$0xff] }
 0xd47   :  { %6926 = vpow2.f32 %v5168_v63 }
 0xd48   :  { %6928 = vpow2.f32 %v5169_v45  ;;  %v8948_v45 = vld [vmem:[#allocation11_spill] sm:$0xff] }
 0xd49   :  { %6930 = vtanh.f32 %v3356_v2  ;;  %v8944_v2 = vld [vmem:[#allocation10_spill] sm:$0xff] }
 0xd50   :  { %v6925_v50 = vpop.eup %6924 }
 0xd51   :  { %v6927_v14 = vpop.eup %6926  ;;  %v3363_v19 = vadd.f32 1.0, %v6925_v50  ;;  %v8949_v50 = vld [vmem:[#allocation30_spill] sm:$0xff] }
 0xd52   :  { %v3369_v55 = vadd.f32 1.0, %v6927_v14  ;;  %v6929_v25 = vpop.eup %6928  ;;  %v8950_v14 = vld [vmem:[#allocation27_spill] sm:$0xff] }
 0xd53   :  { %6932 = vrcp.f32 %v3363_v19  ;;  %v6931_v16 = vpop.eup %6930  ;;  %v3376_v10 = vadd.f32 1.0, %v6929_v25  ;;  %v8951_v19 = vld [vmem:[#allocation31_spill] sm:$0xff] }
 0xd54   :  { %6934 = vrcp.f32 %v3369_v55  ;;  %v8952_v55 = vld [vmem:[#allocation44_spill] sm:$0xff] }
 0xd55   :  { %6936 = vrcp.f32 %v3376_v10 }
 0xd5d   :  { %v6933_v21 = vpop.eup %6932 }
 0xd5e   :  { %v6935_v7 = vpop.eup %6934  ;;  %v3380_v39 = vmul.f32 %v6933_v21, %v6931_v16 }
 0xd5f   :  { %v3379_v61 = vmul.f32 %v6935_v7, %v8372_v40  ;;  %v6937_v60 = vpop.eup %6936  ;;  %v8471_v40 = vld [vmem:[%s8788_s6 + $0x8] sm:$0xff]  ;;  %s5171_s6 = sld [smem:[#allocation4 + $0x3]] }
 0xd60   :  { %v8953_v7 = vld [vmem:[#allocation51_spill] sm:$0xff] }
 0xd61   :  { %v8449_v35 = vadd.f32 %v3380_v39, %v3379_v61  ;;  %v8954_v61 = vld [vmem:[#allocation13_spill] sm:$0xff] }
 0xd63   :  { %6938 = vtanh.f32 %v8449_v35 }
 0xd65   :  { %s3457_s17 = scvt.s32.f32 %s5171_s6 }
 0xd67   :  { %s3614_s8 = ssub.f32 1.0, %s3457_s17  ;;  %v3609_v25 = vstv %s3457_s17 }
 0xd69   :  { %v3615_v21 = vstv %s3614_s8 }
 0xd6d   :  { %v6939_v58 = vpop.eup %6938 }
 0xd6e   :  { %v3383_v33 = vmul.f32 %v6939_v58, %v6937_v60  ;;  %v8955_v58 = vld [vmem:[#allocation19_spill] sm:$0xff] }
 0xd70   :  { %5421 = vmatmul.mubr.f32.vlgmr.msra.gmra.mrb[44].mxu0 %v3383_v33 }
 0xd71   :  { %6374 = vmatpush1.bf16.msra.mxu0 %v8064_v15  ;;  %3759 = vmatprep.mubr.f32.mxu0 %v8882_v56 }
 0xd72   :  { %6376 = vmatprep.subr.bf16.mxu0 %v8071_v49 }
 0xd75   :  { %6378 = vmatpush1.bf16.msra.mxu0 %v8076_v34 }
 0xd76   :  { %6380 = vmatprep.subr.bf16.mxu0 %v8083_v62 }
 0xd79   :  { %6382 = vmatpush1.bf16.msra.mxu0 %v8088_v11 }
 0xd7a   :  { %6384 = vmatprep.subr.bf16.mxu0 %v8095_v44 }
 0xd7d   :  { %6386 = vmatpush1.bf16.msra.mxu0 %v8100_v3 }
 0xd7e   :  { %6388 = vmatprep.subr.bf16.mxu0 %v8107_v37 }
 0xd81   :  { %6390 = vmatpush1.bf16.msra.mxu0 %v8112_v42 }
 0xd82   :  { %6392 = vmatprep.subr.bf16.mxu0 %v8119_v41 }
 0xd85   :  { %6394 = vmatpush1.bf16.msra.mxu0 %v8124_v6 }
 0xd86   :  { %6396 = vmatprep.subr.bf16.mxu0 %v8129_v31 }
 0xd89   :  { %6398 = vmatpush1.bf16.msra.mxu0 %v8136_v12 }
 0xd8a   :  { %6400 = vmatprep.subr.bf16.mxu0 %v8141_v53 }
 0xd8d   :  { %6402 = vmatpush1.bf16.msra.mxu0 %v8148_v36 }
 0xd8e   :  { %3867 = vmatprep.subr.mxu0 %v8471_v40 }
 0xd90   :  { %3760 = vmatmul.mubr.f32.vlgmr.msra.gmra.mrb[46].mxu0 %v3383_v33 }
 0xd91   :  { %3868 = vmatpush1.msra.mxu0 %v8477_v52  ;;  %3931 = vmatprep.mubr.f32.mxu0 %v8882_v56 }
 0xd92   :  { %3938 = vmatprep.subr.mxu0 %v8484_v30 }
 0xe43   :  { %v3450_v57 = vpop.f32.mrb[44].mxu0 }
 0xe44   :  { %v3451_v9 = vadd.f32 %v8316_v28, %v3450_v57  ;;  %v5422_v63 = vpop.f32.mrb[45].mxu0 }
 0xe46   :  { %5170 = vst.msk [vmem:[%s8793_s11 + $0x10] sm:$0xff] %vm99_vm0, %v3451_v9  ;;  %5172 = vmatmul.mubr.msk.f32.vlgmr.msra.gmra.mrb[52].mxu1 %vm99_vm0, %v3451_v9 }
 0xe47   :  { %3533 = vmatpush1.msra.mxu1 %v8496_v32  ;;  %3596 = vmatprep.mubr.f32.mxu1 %v8882_v56 }
 0xe48   :  { %6340 = vmatprep.subr.bf16.mxu1 %v8057_v1 }
 0xe4a   :  { %5173 = vmatmul.mubr.msk.f32.vlgmr.msra.gmra.mrb[54].mxu1 %vm99_vm0, %v3451_v9  ;;  %v8956_v9 = vld [vmem:[#allocation20_spill] sm:$0xff] }
 0xe4b   :  { %6342 = vmatpush1.bf16.msra.mxu1 %v8061_v47  ;;  %3688 = vmatprep.mubr.f32.mxu1 %v8882_v56  ;;  %v3611_v63 = vmul.f32 %v3609_v25, %v8956_v9 }
 0xe4c   :  { %6344 = vmatprep.subr.bf16.mxu1 %v8069_v38 }
 0xe4f   :  { %6346 = vmatpush1.bf16.msra.mxu1 %v8073_v23 }
 0xe50   :  { %6348 = vmatprep.subr.bf16.mxu1 %v8081_v48 }
 0xe53   :  { %6350 = vmatpush1.bf16.msra.mxu1 %v8085_v0 }
 0xe54   :  { %6352 = vmatprep.subr.bf16.mxu1 %v8093_v26 }
 0xe57   :  { %6354 = vmatpush1.bf16.msra.mxu1 %v8097_v51 }
 0xe58   :  { %6356 = vmatprep.subr.bf16.mxu1 %v8105_v5 }
 0xe5b   :  { %6358 = vmatpush1.bf16.msra.mxu1 %v8109_v13 }
 0xe5c   :  { %6360 = vmatprep.subr.bf16.mxu1 %v8911_v59 }
 0xe5f   :  { %6362 = vmatpush1.bf16.msra.mxu1 %v8912_v43 }
 0xe60   :  { %6364 = vmatprep.subr.bf16.mxu1 %v8922_v24 }
 0xe63   :  { %6366 = vmatpush1.bf16.msra.mxu1 %v8923_v27  ;;  %v3761_v18 = vpop.f32.mrb[46].mxu0 }
 0xe64   :  { %v3763_v54 = vpop.f32.mrb[47].mxu0  ;;  %6368 = vmatprep.subr.bf16.mxu1 %v8924_v17 }
 0xe67   :  { %6370 = vmatpush1.bf16.msra.mxu1 %v8925_v4 }
 0xe68   :  { %6403 = vmatprep.subr.bf16.mxu1 %v8943_v29 }
 0xe6a   :  { %3689 = vmatmul.mubr.f32.vlgmr.msra.gmra.mrb[56].mxu1 %v3383_v33  ;;  %v3610_v33 = vmul.f32 %v3609_v25, %v8955_v58 }
 0xe6b   :  { %6405 = vmatpush3.bf16.msra.mxu1 %v8944_v2  ;;  %5455 = vmatprep.mubr.msk.f32.mxu1 %vm7053_vm1, %v8882_v56  ;;  %v8958_v2 = vld [vmem:[#allocation36_spill] sm:$0xff] }
 0xe6c   :  { %6406 = vmatprep.subr.bf16.mxu1 %v8943_v29 }
 0xe6f   :  { %6408 = vmatpush3.bf16.msra.mxu1 %v8945_v46 }
 0xe70   :  { %6409 = vmatprep.subr.bf16.mxu1 %v8943_v29 }
 0xe73   :  { %6411 = vmatpush3.bf16.msra.mxu1 %v8946_v8 }
 0xe74   :  { %6412 = vmatprep.subr.bf16.mxu1 %v8943_v29 }
 0xe77   :  { %6414 = vmatpush3.bf16.msra.mxu1 %v8947_v20 }
 0xe78   :  { %6415 = vmatprep.subr.bf16.mxu1 %v8943_v29 }
 0xe7b   :  { %6417 = vmatpush3.bf16.msra.mxu1 %v8948_v45 }
 0xe7c   :  { %6418 = vmatprep.subr.bf16.mxu1 %v8943_v29 }
 0xe7f   :  { %6420 = vmatpush3.bf16.msra.mxu1 %v8949_v50  ;;  %v8957_v50 = vld [vmem:[#allocation52_spill] sm:$0xff] }
 0xe80   :  { %6421 = vmatprep.subr.bf16.mxu1 %v8943_v29 }
 0xe83   :  { %6423 = vmatpush3.bf16.msra.mxu1 %v8950_v14 }
 0xe84   :  { %6424 = vmatprep.subr.bf16.mxu1 %v8943_v29  ;;  %v3612_v29 = vmul.f32 %v3609_v25, %v8958_v2 }
 0xe87   :  { %6426 = vmatpush3.bf16.msra.mxu1 %v8951_v19 }
 0xe88   :  { %6460 = vmatprep.subr.bf16.mxu1 %v8952_v55 }
 0xf19   :  { %v3527_v16 = vpop.f32.mrb[52].mxu1 }
 0xf1a   :  { %v3528_v10 = vadd.f32 %v3527_v16, %v8953_v7  ;;  %v3529_v39 = vpop.f32.mrb[53].mxu1  ;;  %v8959_v7 = vld [vmem:[#allocation37_spill] sm:$0xff] }
 0xf1b   :  { %v3530_v60 = vadd.f32 %v3529_v39, %v8954_v61  ;;  %v3613_v4 = vmul.f32 %v3609_v25, %v8959_v7  ;;  %v8960_v7 = vld [vmem:[#allocation47_spill] sm:$0xff] }
 0xf1c   :  { %v3616_v57 = vmul.f32 %v3615_v21, %v3528_v10 }
 0xf1d   :  { %v3617_v14 = vmul.f32 %v3615_v21, %v3530_v60  ;;  %v3598_v19 = vpop.f32.mrb[54].mxu1 }
 0xf1e   :  { %v3599_v55 = vadd.f32 %v3598_v19, %v8957_v50  ;;  %v3600_v45 = vpop.f32.mrb[55].mxu1  ;;  %v3620_v20 = vadd.f32 %v3616_v57, %v3610_v33 }
 0xf1f   :  { %v3601_v8 = vadd.f32 %v3600_v45, %v8173_v22  ;;  %v3621_v46 = vadd.f32 %v3617_v14, %v3611_v63 }
 0xf20   :  { %v3618_v16 = vmul.f32 %v3615_v21, %v3599_v55 }
 0xf21   :  { %v3619_v39 = vmul.f32 %v3615_v21, %v3601_v8 }
 0xf22   :  { %v3622_v61 = vadd.f32 %v3618_v16, %v3612_v29  ;;  %v8962_v16 = vld [vmem:[#allocation49_spill] sm:$0xff] }
 0xf23   :  { %v3623_v58 = vadd.f32 %v3619_v39, %v3613_v4  ;;  %v8963_v39 = vld [vmem:[#allocation50_spill] sm:$0xff] }
 0xf24   :  { %v3762_v10 = vadd.f32 %v3761_v18, %v3622_v61  ;;  %v8961_v61 = vld [vmem:[#allocation48_spill] sm:$0xff] }
 0xf25   :  { %v3764_v17 = vadd.f32 %v3763_v54, %v3623_v58  ;;  %v8964_v58 = vmov 0.0|0.0  }
 0xf27   :  { %v5176_v45 = vmul.f32 -1.442695, %v3764_v17 }
 0xf3d   :  { %v3690_v9 = vpop.f32.mrb[56].mxu1 }
 0xf3e   :  { %v3691_v60 = vadd.f32 %v3690_v9, %v3620_v20  ;;  %v3692_v27 = vpop.f32.mrb[57].mxu1  ;;  %v8966_v9 = vld [vmem:[#allocation12_spill] sm:$0xff] }
 0xf3f   :  { %v3693_v24 = vadd.f32 %v3692_v27, %v3621_v46 }
 0xf40   :  { %v5174_v19 = vmul.f32 -1.442695, %v3691_v60  ;;  %v8967_v60 = vld [vmem:[#allocation28_spill] sm:$0xff] }
 0xf41   :  { %v5175_v50 = vmul.f32 -1.442695, %v3693_v24 }
 0xf42   :  { %6940 = vpow2.f32 %v5174_v19  ;;  %v8968_v19 = vld [vmem:[#allocation14_spill] sm:$0xff] }
 0xf43   :  { %6942 = vpow2.f32 %v5175_v50 }
 0xf44   :  { %6944 = vpow2.f32 %v5176_v45  ;;  %v8969_v45 = vld [vmem:[#allocation11_spill] sm:$0xff] }
 0xf45   :  { %6946 = vtanh.f32 %v3762_v10  ;;  %v8965_v10 = vld [vmem:[#allocation10_spill] sm:$0xff] }
 0xf4c   :  { %v6941_v14 = vpop.eup %6940 }
 0xf4d   :  { %v6943_v33 = vpop.eup %6942  ;;  %v3769_v2 = vadd.f32 1.0, %v6941_v14  ;;  %v8970_v14 = vld [vmem:[#allocation30_spill] sm:$0xff] }
 0xf4e   :  { %v3775_v55 = vadd.f32 1.0, %v6943_v33  ;;  %v6945_v4 = vpop.eup %6944  ;;  %v8971_v33 = vld [vmem:[#allocation27_spill] sm:$0xff] }
 0xf4f   :  { %6948 = vrcp.f32 %v3769_v2  ;;  %v6947_v18 = vpop.eup %6946  ;;  %v3782_v8 = vadd.f32 1.0, %v6945_v4  ;;  %v8972_v2 = vld [vmem:[#allocation31_spill] sm:$0xff]  ;;  %v4015_v4 = vstv %s3863_s21 }
 0xf50   :  { %6950 = vrcp.f32 %v3775_v55  ;;  %v8973_v55 = vld [vmem:[#allocation44_spill] sm:$0xff] }
 0xf51   :  { %6952 = vrcp.f32 %v3782_v8 }
 0xf59   :  { %v6949_v54 = vpop.eup %6948 }
 0xf5a   :  { %v6951_v29 = vpop.eup %6950  ;;  %v3786_v20 = vmul.f32 %v6949_v54, %v6947_v18  ;;  %v4021_v54 = vstv %s4020_s9 }
 0xf5b   :  { %v3785_v27 = vmul.f32 %v6951_v29, %v8449_v35  ;;  %v6953_v17 = vpop.eup %6952  ;;  %v8974_v29 = vld [vmem:[#allocation51_spill] sm:$0xff] }
 0xf5d   :  { %v8546_v24 = vadd.f32 %v3786_v20, %v3785_v27  ;;  %v8975_v27 = vld [vmem:[#allocation13_spill] sm:$0xff] }
 0xf5f   :  { %6954 = vtanh.f32 %v8546_v24 }
 0xf69   :  { %v6955_v46 = vpop.eup %6954 }
 0xf6a   :  { %v3789_v50 = vmul.f32 %v6955_v46, %v6953_v17  ;;  %v8976_v46 = vld [vmem:[#allocation21_spill] sm:$0xff] }
 0xf6c   :  { %5456 = vmatmul.mubr.f32.vlgmr.msra.gmra.mrb[58].mxu1 %v3789_v50 }
 0xf6d   :  { %6462 = vmatpush1.bf16.msra.mxu1 %v8064_v15  ;;  %4165 = vmatprep.mubr.f32.mxu1 %v8882_v56 }
 0xf6e   :  { %6464 = vmatprep.subr.bf16.mxu1 %v8071_v49 }
 0xf71   :  { %6466 = vmatpush1.bf16.msra.mxu1 %v8076_v34 }
 0xf72   :  { %6468 = vmatprep.subr.bf16.mxu1 %v8083_v62 }
 0xf75   :  { %6470 = vmatpush1.bf16.msra.mxu1 %v8088_v11 }
 0xf76   :  { %6472 = vmatprep.subr.bf16.mxu1 %v8095_v44 }
 0xf79   :  { %6474 = vmatpush1.bf16.msra.mxu1 %v8100_v3 }
 0xf7a   :  { %6476 = vmatprep.subr.bf16.mxu1 %v8107_v37 }
 0xf7d   :  { %6478 = vmatpush1.bf16.msra.mxu1 %v8112_v42 }
 0xf7e   :  { %6480 = vmatprep.subr.bf16.mxu1 %v8119_v41 }
 0xf81   :  { %6482 = vmatpush1.bf16.msra.mxu1 %v8124_v6 }
 0xf82   :  { %6484 = vmatprep.subr.bf16.mxu1 %v8129_v31 }
 0xf85   :  { %6486 = vmatpush1.bf16.msra.mxu1 %v8136_v12 }
 0xf86   :  { %6488 = vmatprep.subr.bf16.mxu1 %v8141_v53 }
 0xf89   :  { %6490 = vmatpush1.bf16.msra.mxu1 %v8148_v36 }
 0xf8a   :  { %4273 = vmatprep.subr.mxu1 %v8471_v40 }
 0xf8c   :  { %4166 = vmatmul.mubr.f32.vlgmr.msra.gmra.mrb[60].mxu1 %v3789_v50 }
 0xf8d   :  { %4274 = vmatpush1.msra.mxu1 %v8477_v52  ;;  %4337 = vmatprep.mubr.f32.mxu1 %v8882_v56 }
 0xf8e   :  { %4344 = vmatprep.subr.mxu1 %v8484_v30 }
0x103f   :  { %v3856_v35 = vpop.f32.mrb[58].mxu1 }
0x1040   :  { %v3857_v25 = vadd.f32 %v8316_v28, %v3856_v35  ;;  %v5457_v21 = vpop.f32.mrb[59].mxu1 }
0x1042   :  { %5177 = vst.msk [vmem:[%s8793_s11 + $0x18] sm:$0xff] %vm99_vm0, %v3857_v25  ;;  %5179 = vmatmul.mubr.msk.f32.vlgmr.msra.gmra.mrb[48].mxu0 %vm99_vm0, %v3857_v25 }
0x1043   :  { %3939 = vmatpush1.msra.mxu0 %v8496_v32  ;;  %4002 = vmatprep.mubr.f32.mxu0 %v8882_v56 }
0x1044   :  { %6428 = vmatprep.subr.bf16.mxu0 %v8057_v1 }
0x1046   :  { %5180 = vmatmul.mubr.msk.f32.vlgmr.msra.gmra.mrb[50].mxu0 %vm99_vm0, %v3857_v25  ;;  %v8977_v25 = vld [vmem:[#allocation22_spill] sm:$0xff] }
0x1047   :  { %6430 = vmatpush1.bf16.msra.mxu0 %v8061_v47  ;;  %4094 = vmatprep.mubr.f32.mxu0 %v8882_v56  ;;  %v4017_v21 = vmul.f32 %v4015_v4, %v8977_v25 }
0x1048   :  { %6432 = vmatprep.subr.bf16.mxu0 %v8069_v38 }
0x104b   :  { %6434 = vmatpush1.bf16.msra.mxu0 %v8073_v23 }
0x104c   :  { %6436 = vmatprep.subr.bf16.mxu0 %v8081_v48 }
0x104f   :  { %6438 = vmatpush1.bf16.msra.mxu0 %v8085_v0 }
0x1050   :  { %6440 = vmatprep.subr.bf16.mxu0 %v8093_v26 }
0x1053   :  { %6442 = vmatpush1.bf16.msra.mxu0 %v8097_v51 }
0x1054   :  { %6444 = vmatprep.subr.bf16.mxu0 %v8105_v5 }
0x1057   :  { %6446 = vmatpush1.bf16.msra.mxu0 %v8109_v13 }
0x1058   :  { %6448 = vmatprep.subr.bf16.mxu0 %v8911_v59 }
0x105b   :  { %6450 = vmatpush1.bf16.msra.mxu0 %v8912_v43 }
0x105c   :  { %6452 = vmatprep.subr.bf16.mxu0 %v8960_v7 }
0x105f   :  { %6454 = vmatpush1.bf16.msra.mxu0 %v8961_v61  ;;  %v4167_v57 = vpop.f32.mrb[60].mxu1 }
0x1060   :  { %v4169_v63 = vpop.f32.mrb[61].mxu1  ;;  %6456 = vmatprep.subr.bf16.mxu0 %v8962_v16 }
0x1063   :  { %6458 = vmatpush1.bf16.msra.mxu0 %v8963_v39 }
0x1064   :  { %6491 = vmatprep.subr.bf16.mxu0 %v8964_v58 }
0x1066   :  { %4095 = vmatmul.mubr.f32.vlgmr.msra.gmra.mrb[52].mxu0 %v3789_v50  ;;  %v4016_v50 = vmul.f32 %v4015_v4, %v8976_v46 }
0x1067   :  { %6493 = vmatpush3.bf16.msra.mxu0 %v8965_v10  ;;  %5490 = vmatprep.mubr.msk.f32.mxu0 %vm7053_vm1, %v8882_v56  ;;  %v8979_v10 = vld [vmem:[#allocation38_spill] sm:$0xff] }
0x1068   :  { %6494 = vmatprep.subr.bf16.mxu0 %v8964_v58 }
0x106b   :  { %6496 = vmatpush3.bf16.msra.mxu0 %v8966_v9 }
0x106c   :  { %6497 = vmatprep.subr.bf16.mxu0 %v8964_v58 }
0x106f   :  { %6499 = vmatpush3.bf16.msra.mxu0 %v8967_v60 }
0x1070   :  { %6500 = vmatprep.subr.bf16.mxu0 %v8964_v58 }
0x1073   :  { %6502 = vmatpush3.bf16.msra.mxu0 %v8968_v19 }
0x1074   :  { %6503 = vmatprep.subr.bf16.mxu0 %v8964_v58 }
0x1077   :  { %6505 = vmatpush3.bf16.msra.mxu0 %v8969_v45 }
0x1078   :  { %6506 = vmatprep.subr.bf16.mxu0 %v8964_v58 }
0x107b   :  { %6508 = vmatpush3.bf16.msra.mxu0 %v8970_v14  ;;  %v8978_v14 = vld [vmem:[#allocation52_spill] sm:$0xff] }
0x107c   :  { %6509 = vmatprep.subr.bf16.mxu0 %v8964_v58 }
0x107f   :  { %6511 = vmatpush3.bf16.msra.mxu0 %v8971_v33 }
0x1080   :  { %6512 = vmatprep.subr.bf16.mxu0 %v8964_v58  ;;  %v4018_v58 = vmul.f32 %v4015_v4, %v8979_v10 }
0x1083   :  { %6514 = vmatpush3.bf16.msra.mxu0 %v8972_v2 }
0x1084   :  { %6548 = vmatprep.subr.bf16.mxu0 %v8973_v55 }
0x1115   :  { %v3933_v18 = vpop.f32.mrb[48].mxu0 }
0x1116   :  { %v3934_v8 = vadd.f32 %v3933_v18, %v8974_v29  ;;  %v3935_v20 = vpop.f32.mrb[49].mxu0  ;;  %v8980_v29 = vld [vmem:[#allocation39_spill] sm:$0xff] }
0x1117   :  { %v3936_v17 = vadd.f32 %v3935_v20, %v8975_v27  ;;  %v4019_v39 = vmul.f32 %v4015_v4, %v8980_v29  ;;  %v8983_v29 = vld [vmem:[#allocation49_spill] sm:$0xff] }
0x1118   :  { %v4022_v35 = vmul.f32 %v4021_v54, %v3934_v8 }
0x1119   :  { %v4023_v33 = vmul.f32 %v4021_v54, %v3936_v17  ;;  %v4004_v2 = vpop.f32.mrb[50].mxu0 }
0x111a   :  { %v4005_v55 = vadd.f32 %v4004_v2, %v8978_v14  ;;  %v4006_v45 = vpop.f32.mrb[51].mxu0  ;;  %v4026_v19 = vadd.f32 %v4022_v35, %v4016_v50  ;;  %v8985_v35 = vmov 0.0|0.0  }
0x111b   :  { %v4007_v60 = vadd.f32 %v4006_v45, %v8173_v22  ;;  %v4027_v9 = vadd.f32 %v4023_v33, %v4017_v21  ;;  %v8986_v21 = vld [vmem:[#allocation10_spill] sm:$0xff] }
0x111c   :  { %v4024_v18 = vmul.f32 %v4021_v54, %v4005_v55 }
0x111d   :  { %v4025_v20 = vmul.f32 %v4021_v54, %v4007_v60 }
0x111e   :  { %v4028_v27 = vadd.f32 %v4024_v18, %v4018_v58  ;;  %v8987_v18 = vld [vmem:[#allocation12_spill] sm:$0xff] }
0x111f   :  { %v4029_v46 = vadd.f32 %v4025_v20, %v4019_v39  ;;  %v8988_v20 = vld [vmem:[#allocation28_spill] sm:$0xff] }
0x1120   :  { %v4168_v8 = vadd.f32 %v4167_v57, %v4028_v27  ;;  %v8984_v27 = vld [vmem:[#allocation50_spill] sm:$0xff] }
0x1121   :  { %v4170_v16 = vadd.f32 %v4169_v63, %v4029_v46  ;;  %v8989_v46 = vld [vmem:[#allocation14_spill] sm:$0xff] }
0x1123   :  { %v5183_v45 = vmul.f32 -1.442695, %v4170_v16 }
0x1139   :  { %v4096_v25 = vpop.f32.mrb[52].mxu0 }
0x113a   :  { %v4097_v17 = vadd.f32 %v4096_v25, %v4026_v19  ;;  %v4098_v61 = vpop.f32.mrb[53].mxu0  ;;  %v8991_v25 = vld [vmem:[#allocation30_spill] sm:$0xff] }
0x113b   :  { %v4099_v7 = vadd.f32 %v4098_v61, %v4027_v9 }
0x113c   :  { %v5181_v2 = vmul.f32 -1.442695, %v4097_v17  ;;  %v8992_v17 = vld [vmem:[#allocation27_spill] sm:$0xff] }
0x113d   :  { %v5182_v14 = vmul.f32 -1.442695, %v4099_v7 }
0x113e   :  { %6956 = vpow2.f32 %v5181_v2  ;;  %v8993_v2 = vld [vmem:[#allocation31_spill] sm:$0xff] }
0x113f   :  { %6958 = vpow2.f32 %v5182_v14 }
0x1140   :  { %6960 = vpow2.f32 %v5183_v45  ;;  %v8994_v45 = vld [vmem:[#allocation44_spill] sm:$0xff] }
0x1141   :  { %6962 = vtanh.f32 %v4168_v8  ;;  %v8990_v8 = vld [vmem:[#allocation11_spill] sm:$0xff] }
0x1148   :  { %v6957_v33 = vpop.eup %6956 }
0x1149   :  { %v6959_v50 = vpop.eup %6958  ;;  %v4175_v10 = vadd.f32 1.0, %v6957_v33  ;;  %v4421_v33 = vstv %s4269_s24 }
0x114a   :  { %v4181_v55 = vadd.f32 1.0, %v6959_v50  ;;  %v6961_v39 = vpop.eup %6960 }
0x114b   :  { %6964 = vrcp.f32 %v4175_v10  ;;  %v6963_v57 = vpop.eup %6962  ;;  %v4188_v60 = vadd.f32 1.0, %v6961_v39  ;;  %v4427_v10 = vstv %s4426_s25 }
0x114c   :  { %6966 = vrcp.f32 %v4181_v55  ;;  %v8995_v55 = vld [vmem:[#allocation51_spill] sm:$0xff] }
0x114d   :  { %6968 = vrcp.f32 %v4188_v60  ;;  %v8997_v60 = vld [vmem:[#allocation23_spill] sm:$0xff] }
0x1155   :  { %v6965_v63 = vpop.eup %6964 }
0x1156   :  { %v6967_v58 = vpop.eup %6966  ;;  %v4192_v19 = vmul.f32 %v6965_v63, %v6963_v57  ;;  %v8996_v63 = vld [vmem:[#allocation13_spill] sm:$0xff] }
0x1157   :  { %v4191_v61 = vmul.f32 %v6967_v58, %v8546_v24  ;;  %v6969_v16 = vpop.eup %6968 }
0x1159   :  { %v8623_v7 = vadd.f32 %v4192_v19, %v4191_v61  ;;  %v4422_v19 = vmul.f32 %v4421_v33, %v8997_v60 }
0x115b   :  { %6970 = vtanh.f32 %v8623_v7 }
0x1165   :  { %v6971_v9 = vpop.eup %6970 }
0x1166   :  { %v4195_v14 = vmul.f32 %v6971_v9, %v6969_v16  ;;  %v8998_v16 = vld [vmem:[#allocation24_spill] sm:$0xff] }
0x1167   :  { %v4423_v9 = vmul.f32 %v4421_v33, %v8998_v16 }
0x1168   :  { %5491 = vmatmul.mubr.f32.vlgmr.msra.gmra.mrb[54].mxu0 %v4195_v14 }
0x1169   :  { %6550 = vmatpush1.bf16.msra.mxu0 %v8064_v15  ;;  %4571 = vmatprep.mubr.f32.mxu0 %v8882_v56 }
0x116a   :  { %6552 = vmatprep.subr.bf16.mxu0 %v8071_v49 }
0x116d   :  { %6554 = vmatpush1.bf16.msra.mxu0 %v8076_v34 }
0x116e   :  { %6556 = vmatprep.subr.bf16.mxu0 %v8083_v62 }
0x1171   :  { %6558 = vmatpush1.bf16.msra.mxu0 %v8088_v11 }
0x1172   :  { %6560 = vmatprep.subr.bf16.mxu0 %v8095_v44 }
0x1175   :  { %6562 = vmatpush1.bf16.msra.mxu0 %v8100_v3 }
0x1176   :  { %6564 = vmatprep.subr.bf16.mxu0 %v8107_v37 }
0x1179   :  { %6566 = vmatpush1.bf16.msra.mxu0 %v8112_v42 }
0x117a   :  { %6568 = vmatprep.subr.bf16.mxu0 %v8119_v41 }
0x117d   :  { %6570 = vmatpush1.bf16.msra.mxu0 %v8124_v6 }
0x117e   :  { %6572 = vmatprep.subr.bf16.mxu0 %v8129_v31 }
0x1181   :  { %6574 = vmatpush1.bf16.msra.mxu0 %v8136_v12 }
0x1182   :  { %6576 = vmatprep.subr.bf16.mxu0 %v8141_v53 }
0x1185   :  { %6578 = vmatpush1.bf16.msra.mxu0 %v8148_v36 }
0x1186   :  { %4679 = vmatprep.subr.mxu0 %v8471_v40  ;;  %v8982_v40 = vld [vmem:[#allocation48_spill] sm:$0xff] }
0x1188   :  { %4572 = vmatmul.mubr.f32.vlgmr.msra.gmra.mrb[56].mxu0 %v4195_v14 }
0x1189   :  { %4680 = vmatpush1.msra.mxu0 %v8477_v52  ;;  %4743 = vmatprep.mubr.f32.mxu0 %v8882_v56 }
0x118a   :  { %4750 = vmatprep.subr.mxu0 %v8484_v30 }
0x123b   :  { %v4262_v24 = vpop.f32.mrb[54].mxu0 }
0x123c   :  { %v4263_v4 = vadd.f32 %v8316_v28, %v4262_v24  ;;  %v5492_v54 = vpop.f32.mrb[55].mxu0  ;;  %v8981_v28 = vld [vmem:[#allocation47_spill] sm:$0xff] }
0x123e   :  { %5184 = vst.msk [vmem:[%s8793_s11 + $0x20] sm:$0xff] %vm99_vm0, %v4263_v4  ;;  %5186 = vmatmul.mubr.msk.f32.vlgmr.msra.gmra.mrb[62].mxu1 %vm99_vm0, %v4263_v4 }
0x123f   :  { %4345 = vmatpush1.msra.mxu1 %v8496_v32  ;;  %4408 = vmatprep.mubr.f32.mxu1 %v8882_v56 }
0x1240   :  { %6516 = vmatprep.subr.bf16.mxu1 %v8057_v1 }
0x1242   :  { %5187 = vmatmul.mubr.msk.f32.vlgmr.msra.gmra.mrb[64].mxu1 %vm99_vm0, %v4263_v4  ;;  %v8999_v4 = vld [vmem:[#allocation52_spill] sm:$0xff] }
0x1243   :  { %6518 = vmatpush1.bf16.msra.mxu1 %v8061_v47  ;;  %4500 = vmatprep.mubr.f32.mxu1 %v8882_v56 }
0x1244   :  { %6520 = vmatprep.subr.bf16.mxu1 %v8069_v38 }
0x1247   :  { %6522 = vmatpush1.bf16.msra.mxu1 %v8073_v23 }
0x1248   :  { %6524 = vmatprep.subr.bf16.mxu1 %v8081_v48 }
0x124b   :  { %6526 = vmatpush1.bf16.msra.mxu1 %v8085_v0 }
0x124c   :  { %6528 = vmatprep.subr.bf16.mxu1 %v8093_v26 }
0x124f   :  { %6530 = vmatpush1.bf16.msra.mxu1 %v8097_v51 }
0x1250   :  { %6532 = vmatprep.subr.bf16.mxu1 %v8105_v5 }
0x1253   :  { %6534 = vmatpush1.bf16.msra.mxu1 %v8109_v13 }
0x1254   :  { %6536 = vmatprep.subr.bf16.mxu1 %v8911_v59 }
0x1257   :  { %6538 = vmatpush1.bf16.msra.mxu1 %v8912_v43 }
0x1258   :  { %6540 = vmatprep.subr.bf16.mxu1 %v8981_v28 }
0x125b   :  { %6542 = vmatpush1.bf16.msra.mxu1 %v8982_v40  ;;  %v4573_v52 = vpop.f32.mrb[56].mxu0 }
0x125c   :  { %v4575_v30 = vpop.f32.mrb[57].mxu0  ;;  %6544 = vmatprep.subr.bf16.mxu1 %v8983_v29 }
0x125f   :  { %6546 = vmatpush1.bf16.msra.mxu1 %v8984_v27 }
0x1260   :  { %6579 = vmatprep.subr.bf16.mxu1 %v8985_v35 }
0x1262   :  { %4501 = vmatmul.mubr.f32.vlgmr.msra.gmra.mrb[66].mxu1 %v4195_v14 }
0x1263   :  { %6581 = vmatpush3.bf16.msra.mxu1 %v8986_v21  ;;  %5525 = vmatprep.mubr.msk.f32.mxu1 %vm7053_vm1, %v8882_v56 }
0x1264   :  { %6582 = vmatprep.subr.bf16.mxu1 %v8985_v35 }
0x1267   :  { %6584 = vmatpush3.bf16.msra.mxu1 %v8987_v18 }
0x1268   :  { %6585 = vmatprep.subr.bf16.mxu1 %v8985_v35 }
0x126b   :  { %6587 = vmatpush3.bf16.msra.mxu1 %v8988_v20 }
0x126c   :  { %6588 = vmatprep.subr.bf16.mxu1 %v8985_v35 }
0x126f   :  { %6590 = vmatpush3.bf16.msra.mxu1 %v8989_v46 }
0x1270   :  { %6591 = vmatprep.subr.bf16.mxu1 %v8985_v35 }
0x1273   :  { %6593 = vmatpush3.bf16.msra.mxu1 %v8990_v8  ;;  %v9000_v8 = vld [vmem:[#allocation40_spill] sm:$0xff] }
0x1274   :  { %6594 = vmatprep.subr.bf16.mxu1 %v8985_v35  ;;  %v4424_v46 = vmul.f32 %v4421_v33, %v9000_v8 }
0x1277   :  { %6596 = vmatpush3.bf16.msra.mxu1 %v8991_v25 }
0x1278   :  { %6597 = vmatprep.subr.bf16.mxu1 %v8985_v35 }
0x127b   :  { %6599 = vmatpush3.bf16.msra.mxu1 %v8992_v17 }
0x127c   :  { %6600 = vmatprep.subr.bf16.mxu1 %v8985_v35 }
0x127f   :  { %6602 = vmatpush3.bf16.msra.mxu1 %v8993_v2 }
0x1280   :  { %6636 = vmatprep.subr.bf16.mxu1 %v8994_v45 }
0x1311   :  { %v4339_v50 = vpop.f32.mrb[62].mxu1 }
0x1312   :  { %v4340_v39 = vadd.f32 %v4339_v50, %v8995_v55  ;;  %v4341_v57 = vpop.f32.mrb[63].mxu1  ;;  %v9001_v55 = vld [vmem:[#allocation41_spill] sm:$0xff] }
0x1313   :  { %v4342_v58 = vadd.f32 %v4341_v57, %v8996_v63  ;;  %v4425_v20 = vmul.f32 %v4421_v33, %v9001_v55 }
0x1314   :  { %v4428_v61 = vmul.f32 %v4427_v10, %v4340_v39 }
0x1315   :  { %v4429_v14 = vmul.f32 %v4427_v10, %v4342_v58  ;;  %v4410_v24 = vpop.f32.mrb[64].mxu1 }
0x1316   :  { %v4411_v54 = vadd.f32 %v4410_v24, %v8999_v4  ;;  %v4412_v45 = vpop.f32.mrb[65].mxu1  ;;  %v4432_v2 = vadd.f32 %v4428_v61, %v4422_v19 }
0x1317   :  { %v4413_v17 = vadd.f32 %v4412_v45, %v8173_v22  ;;  %v4433_v25 = vadd.f32 %v4429_v14, %v4423_v9  ;;  %v9016_v14 = vld [vmem:[#allocation42_spill] sm:$0xff]  ;;  %v9017_v45 = vld [vmem:[#allocation43_spill] sm:$0xff] }
0x1318   :  { %v4430_v50 = vmul.f32 %v4427_v10, %v4411_v54 }
0x1319   :  { %v4431_v57 = vmul.f32 %v4427_v10, %v4413_v17 }
0x131a   :  { %v4434_v63 = vadd.f32 %v4430_v50, %v4424_v46 }
0x131b   :  { %v4435_v60 = vadd.f32 %v4431_v57, %v4425_v20 }
0x131c   :  { %v4574_v39 = vadd.f32 %v4573_v52, %v4434_v63 }
0x131d   :  { %v4576_v18 = vadd.f32 %v4575_v30, %v4435_v60 }
0x131f   :  { %v5190_v19 = vmul.f32 -1.442695, %v4576_v18 }
0x1335   :  { %v4502_v16 = vpop.f32.mrb[66].mxu1 }
0x1336   :  { %v4503_v58 = vadd.f32 %v4502_v16, %v4432_v2  ;;  %v4504_v21 = vpop.f32.mrb[67].mxu1 }
0x1337   :  { %v4505_v35 = vadd.f32 %v4504_v21, %v4433_v25 }
0x1338   :  { %v5188_v24 = vmul.f32 -1.442695, %v4503_v58 }
0x1339   :  { %v5189_v4 = vmul.f32 -1.442695, %v4505_v35 }
0x133a   :  { %6972 = vpow2.f32 %v5188_v24 }
0x133b   :  { %6974 = vpow2.f32 %v5189_v4 }
0x133c   :  { %6976 = vpow2.f32 %v5190_v19 }
0x133d   :  { %6978 = vtanh.f32 %v4574_v39 }
0x1344   :  { %v6973_v61 = vpop.eup %6972 }
0x1345   :  { %v6975_v9 = vpop.eup %6974  ;;  %v4581_v8 = vadd.f32 1.0, %v6973_v61 }
0x1346   :  { %v4587_v33 = vadd.f32 1.0, %v6975_v9  ;;  %v6977_v20 = vpop.eup %6976 }
0x1347   :  { %6980 = vrcp.f32 %v4581_v8  ;;  %v6979_v52 = vpop.eup %6978  ;;  %v4594_v17 = vadd.f32 1.0, %v6977_v20 }
0x1348   :  { %6982 = vrcp.f32 %v4587_v33 }
0x1349   :  { %6984 = vrcp.f32 %v4594_v17 }
0x1351   :  { %v6981_v30 = vpop.eup %6980 }
0x1352   :  { %v6983_v46 = vpop.eup %6982  ;;  %v4598_v2 = vmul.f32 %v6981_v30, %v6979_v52 }
0x1353   :  { %v4597_v21 = vmul.f32 %v6983_v46, %v8623_v7  ;;  %v6985_v18 = vpop.eup %6984 }
0x1355   :  { %v8700_v35 = vadd.f32 %v4598_v2, %v4597_v21 }
0x1357   :  { %6986 = vtanh.f32 %v8700_v35 }
0x1361   :  { %v6987_v25 = vpop.eup %6986 }
0x1362   :  { %v4601_v10 = vmul.f32 %v6987_v25, %v6985_v18 }
0x1364   :  { %5526 = vmatmul.mubr.f32.vlgmr.msra.gmra.mrb[68].mxu1 %v4601_v10 }
0x1365   :  { %6638 = vmatpush1.bf16.msra.mxu1 %v8064_v15  ;;  %4977 = vmatprep.mubr.f32.mxu1 %v8882_v56 }
0x1366   :  { %6640 = vmatprep.subr.bf16.mxu1 %v8071_v49  ;;  %v8722_v49 = vld [vmem:[%s8792_s10] ss:$0 sm:$0xff]  ;;  %s5192_s10 = sld [smem:[#allocation4 + $0x6]] }
0x1369   :  { %6642 = vmatpush1.bf16.msra.mxu1 %v8076_v34 }
0x136a   :  { %6644 = vmatprep.subr.bf16.mxu1 %v8083_v62 }
0x136c   :  { %s4675_s5 = scvt.s32.f32 %s5192_s10 }
0x136d   :  { %6646 = vmatpush1.bf16.msra.mxu1 %v8088_v11  ;;  %v9006_v11 = vld [vmem:[#allocation14_spill] sm:$0xff] }
0x136e   :  { %6648 = vmatprep.subr.bf16.mxu1 %v8095_v44  ;;  %v9008_v44 = vld [vmem:[#allocation30_spill] sm:$0xff]  ;;  %s4832_s28 = ssub.f32 1.0, %s4675_s5 }
0x1371   :  { %6650 = vmatpush1.bf16.msra.mxu1 %v8100_v3  ;;  %v4827_v3 = vstv %s4675_s5 }
0x1372   :  { %6652 = vmatprep.subr.bf16.mxu1 %v8107_v37  ;;  %v4833_v37 = vstv %s4832_s28  ;;  %v4830_v4 = vmul.f32 %v4827_v3, %v9016_v14  ;;  %v4831_v50 = vmul.f32 %v4827_v3, %v9017_v45 }
0x1375   :  { %6654 = vmatpush1.bf16.msra.mxu1 %v8112_v42 }
0x1376   :  { %6656 = vmatprep.subr.bf16.mxu1 %v8119_v41 }
0x1379   :  { %6658 = vmatpush1.bf16.msra.mxu1 %v8124_v6  ;;  %v9012_v6 = vld [vmem:[#allocation13_spill] sm:$0xff] }
0x137a   :  { %6660 = vmatprep.subr.bf16.mxu1 %v8129_v31 }
0x137d   :  { %6662 = vmatpush1.bf16.msra.mxu1 %v8136_v12  ;;  %v9013_v12 = vld [vmem:[#allocation25_spill] sm:$0xff] }
0x137e   :  { %6664 = vmatprep.subr.bf16.mxu1 %v8141_v53  ;;  %v4828_v53 = vmul.f32 %v4827_v3, %v9013_v12 }
0x1381   :  { %6666 = vmatpush1.bf16.msra.mxu1 %v8148_v36 }
0x1384   :  { %4978 = vmatmul.mubr.f32.vlgmr.msra.gmra.mrb[70].mxu1 %v4601_v10 }
0x1437   :  { %v4668_v15 = vpop.f32.mrb[68].mxu1 }
0x1438   :  { %v4669_v34 = vadd.f32 %v8722_v49, %v4668_v15  ;;  %v5527_v62 = vpop.f32.mrb[69].mxu1 }
0x143a   :  { %5191 = vst.msk [vmem:[%s8793_s11 + $0x28] sm:$0xff] %vm99_vm0, %v4669_v34  ;;  %5193 = vmatmul.mubr.msk.f32.vlgmr.msra.gmra.mrb[58].mxu0 %vm99_vm0, %v4669_v34 }
0x143b   :  { %4751 = vmatpush1.msra.mxu0 %v8496_v32  ;;  %4814 = vmatprep.mubr.f32.mxu0 %v8882_v56 }
0x143c   :  { %6604 = vmatprep.subr.bf16.mxu0 %v8057_v1 }
0x143e   :  { %5194 = vmatmul.mubr.msk.f32.vlgmr.msra.gmra.mrb[60].mxu0 %vm99_vm0, %v4669_v34 }
0x143f   :  { %6606 = vmatpush1.bf16.msra.mxu0 %v8061_v47  ;;  %4906 = vmatprep.mubr.f32.mxu0 %v8882_v56 }
0x1440   :  { %6608 = vmatprep.subr.bf16.mxu0 %v8069_v38  ;;  %v9002_v38 = vmov 0.0|0.0  }
0x1443   :  { %6610 = vmatpush1.bf16.msra.mxu0 %v8073_v23  ;;  %v9003_v23 = vld [vmem:[#allocation10_spill] sm:$0xff] }
0x1444   :  { %6612 = vmatprep.subr.bf16.mxu0 %v8081_v48  ;;  %v9004_v48 = vld [vmem:[#allocation12_spill] sm:$0xff] }
0x1447   :  { %6614 = vmatpush1.bf16.msra.mxu0 %v8085_v0  ;;  %v9005_v0 = vld [vmem:[#allocation28_spill] sm:$0xff] }
0x1448   :  { %6616 = vmatprep.subr.bf16.mxu0 %v8093_v26  ;;  %v9007_v26 = vld [vmem:[#allocation11_spill] sm:$0xff] }
0x144b   :  { %6618 = vmatpush1.bf16.msra.mxu0 %v8097_v51  ;;  %v9010_v51 = vld [vmem:[#allocation31_spill] sm:$0xff] }
0x144c   :  { %6620 = vmatprep.subr.bf16.mxu0 %v8105_v5 }
0x144f   :  { %6622 = vmatpush1.bf16.msra.mxu0 %v8109_v13  ;;  %v9011_v13 = vld [vmem:[#allocation51_spill] sm:$0xff] }
0x1450   :  { %6624 = vmatprep.subr.bf16.mxu0 %v8911_v59  ;;  %v9014_v59 = vld [vmem:[#allocation26_spill] sm:$0xff] }
0x1453   :  { %6626 = vmatpush1.bf16.msra.mxu0 %v8912_v43  ;;  %v4829_v43 = vmul.f32 %v4827_v3, %v9014_v59 }
0x1454   :  { %6628 = vmatprep.subr.bf16.mxu0 %v8981_v28  ;;  %v9015_v28 = vld [vmem:[#allocation52_spill] sm:$0xff] }
0x1457   :  { %6630 = vmatpush1.bf16.msra.mxu0 %v8982_v40  ;;  %v4979_v1 = vpop.f32.mrb[70].mxu1 }
0x1458   :  { %v4981_v47 = vpop.f32.mrb[71].mxu1  ;;  %6632 = vmatprep.subr.bf16.mxu0 %v8983_v29 }
0x145b   :  { %6634 = vmatpush1.bf16.msra.mxu0 %v8984_v27 }
0x145c   :  { %6667 = vmatprep.subr.bf16.mxu0 %v9002_v38 }
0x145e   :  { %4907 = vmatmul.mubr.f32.vlgmr.msra.gmra.mrb[62].mxu0 %v4601_v10 }
0x145f   :  { %6669 = vmatpush3.bf16.msra.mxu0 %v9003_v23  ;;  %5560 = vmatprep.mubr.msk.f32.mxu0 %vm7053_vm1, %v8882_v56  ;;  %v9009_v56 = vld [vmem:[#allocation27_spill] sm:$0xff] }
0x1460   :  { %6670 = vmatprep.subr.bf16.mxu0 %v9002_v38 }
0x1463   :  { %6672 = vmatpush3.bf16.msra.mxu0 %v9004_v48 }
0x1464   :  { %6673 = vmatprep.subr.bf16.mxu0 %v9002_v38 }
0x1467   :  { %6675 = vmatpush3.bf16.msra.mxu0 %v9005_v0 }
0x1468   :  { %6676 = vmatprep.subr.bf16.mxu0 %v9002_v38 }
0x146b   :  { %6678 = vmatpush3.bf16.msra.mxu0 %v9006_v11 }
0x146c   :  { %6679 = vmatprep.subr.bf16.mxu0 %v9002_v38 }
0x146f   :  { %6681 = vmatpush3.bf16.msra.mxu0 %v9007_v26 }
0x1470   :  { %6682 = vmatprep.subr.bf16.mxu0 %v9002_v38 }
0x1473   :  { %6684 = vmatpush3.bf16.msra.mxu0 %v9008_v44 }
0x1474   :  { %6685 = vmatprep.subr.bf16.mxu0 %v9002_v38 }
0x1477   :  { %6687 = vmatpush3.bf16.msra.mxu0 %v9009_v56 }
0x1478   :  { %6688 = vmatprep.subr.bf16.mxu0 %v9002_v38 }
0x147b   :  { %6690 = vmatpush3.bf16.msra.mxu0 %v9010_v51 }
0x150d   :  { %v4745_v5 = vpop.f32.mrb[58].mxu0 }
0x150e   :  { %v4746_v42 = vadd.f32 %v4745_v5, %v9011_v13  ;;  %v4747_v41 = vpop.f32.mrb[59].mxu0 }
0x150f   :  { %v4748_v31 = vadd.f32 %v4747_v41, %v9012_v6 }
0x1510   :  { %v4834_v36 = vmul.f32 %v4833_v37, %v4746_v42 }
0x1511   :  { %v4835_v32 = vmul.f32 %v4833_v37, %v4748_v31  ;;  %v4816_v7 = vpop.f32.mrb[60].mxu0 }
0x1512   :  { %v4817_v40 = vadd.f32 %v4816_v7, %v9015_v28  ;;  %v4818_v29 = vpop.f32.mrb[61].mxu0  ;;  %v4838_v27 = vadd.f32 %v4834_v36, %v4828_v53 }
0x1513   :  { %v4819_v55 = vadd.f32 %v4818_v29, %v8173_v22  ;;  %v4839_v63 = vadd.f32 %v4835_v32, %v4829_v43 }
0x1514   :  { %v4836_v54 = vmul.f32 %v4833_v37, %v4817_v40 }
0x1515   :  { %v4837_v57 = vmul.f32 %v4833_v37, %v4819_v55 }
0x1516   :  { %v4840_v60 = vadd.f32 %v4836_v54, %v4830_v4 }
0x1517   :  { %v4841_v39 = vadd.f32 %v4837_v57, %v4831_v50 }
0x1518   :  { %v4980_v16 = vadd.f32 %v4979_v1, %v4840_v60 }
0x1519   :  { %v4982_v58 = vadd.f32 %v4981_v47, %v4841_v39 }
0x151b   :  { %v5197_v22 = vmul.f32 -1.442695, %v4982_v58 }
0x1531   :  { %v4908_v24 = vpop.f32.mrb[62].mxu0 }
0x1532   :  { %v4909_v19 = vadd.f32 %v4908_v24, %v4838_v27  ;;  %v4910_v61 = vpop.f32.mrb[63].mxu0 }
0x1533   :  { %v4911_v9 = vadd.f32 %v4910_v61, %v4839_v63 }
0x1534   :  { %v5195_v8 = vmul.f32 -1.442695, %v4909_v19 }
0x1535   :  { %v5196_v33 = vmul.f32 -1.442695, %v4911_v9 }
0x1536   :  { %6988 = vpow2.f32 %v5195_v8 }
0x1537   :  { %6990 = vpow2.f32 %v5196_v33 }
0x1538   :  { %6992 = vpow2.f32 %v5197_v22 }
0x1539   :  { %6994 = vtanh.f32 %v4980_v16 }
0x1540   :  { %v6989_v20 = vpop.eup %6988 }
0x1541   :  { %v6991_v52 = vpop.eup %6990  ;;  %v4987_v30 = vadd.f32 1.0, %v6989_v20 }
0x1542   :  { %v4993_v46 = vadd.f32 1.0, %v6991_v52  ;;  %v6993_v17 = vpop.eup %6992 }
0x1543   :  { %6996 = vrcp.f32 %v4987_v30  ;;  %v6995_v2 = vpop.eup %6994  ;;  %v5000_v25 = vadd.f32 1.0, %v6993_v17 }
0x1544   :  { %6998 = vrcp.f32 %v4993_v46 }
0x1545   :  { %7000 = vrcp.f32 %v5000_v25 }
0x154d   :  { %v6997_v21 = vpop.eup %6996 }
0x154e   :  { %v6999_v18 = vpop.eup %6998  ;;  %v5004_v10 = vmul.f32 %v6997_v21, %v6995_v2 }
0x154f   :  { %v5003_v15 = vmul.f32 %v6999_v18, %v8700_v35  ;;  %v7001_v62 = vpop.eup %7000 }
0x1551   :  { %v5005_v34 = vadd.f32 %v5004_v10, %v5003_v15 }
0x1553   :  { %7002 = vtanh.f32 %v5005_v34 }
0x155d   :  { %v7003_v1 = vpop.eup %7002 }
0x155e   :  { %v5007_v47 = vmul.f32 %v7003_v1, %v7001_v62 }
0x1560   :  { %5561 = vmatmul.mubr.f32.vlgmr.msra.gmra.mrb[64].mxu0 %v5007_v47 }
0x1633   :  { %v5074_v38 = vpop.f32.mrb[64].mxu0 }
0x1634   :  { %v5075_v23 = vadd.f32 %v8722_v49, %v5074_v38  ;;  %v5562_v48 = vpop.f32.mrb[65].mxu0 }
0x1636   :  { %5198 = vst.msk [vmem:[%s8793_s11 + $0x30] sm:$0xff] %vm99_vm0, %v5075_v23 }
0x1637   :  { %5084 = vsyncpa [#allocation5], 1 }
0x1638   :  { %5085 = vsyncpa [#allocation6], 1 }

</bundles_post_ra>
